<compile_context>
chip_gen: v7x
topology: tpu7x:2x2x1
jax: 0.10.0
libtpu: 0.0.40
codegen_flags: <defaults>
</compile_context>

<pallas_src>
import math
import functools

import jax
import jax.numpy as jnp
from jax.experimental import pallas as pl
from jax.experimental.pallas import tpu as pltpu


# --------------------------- in-kernel helpers -------------------------------

def _wide_to_tokens(wide, n_rows, S, D):
    """[n_rows, S*D] -> [n_rows*S, D], rows ordered (row, position)."""
    pieces = []
    for r in range(n_rows):
        for c in range(S):
            pieces.append(wide[r:r + 1, c * D:(c + 1) * D])
    return jnp.concatenate(pieces, axis=0)


def _tokens_to_wide(tok, n_rows, S, D):
    """[n_rows*S, D] -> [n_rows, S*D]  ('a b c -> a (b c)')."""
    rows = []
    for r in range(n_rows):
        rows.append(jnp.concatenate(
            [tok[r * S + c:r * S + c + 1, :] for c in range(S)], axis=1))
    return jnp.concatenate(rows, axis=0)


def _layernorm(x, g, b, eps=1e-5):
    mu = jnp.mean(x, axis=-1, keepdims=True)
    xc = x - mu
    var = jnp.mean(xc * xc, axis=-1, keepdims=True)
    return xc * jax.lax.rsqrt(var + eps) * g + b


def _mha_tokens(tok, wqkv, bqkv, wo, bo, *, n_seq, S, D, nh):
    """Multi-head self-attention on token matrix [n_seq*S, D] (seq-major rows)."""
    f32 = jnp.float32
    qkv = jnp.dot(tok, wqkv, preferred_element_type=f32) + bqkv     # [n_seq*S, 3D]
    dh = D // nh
    scale = 1.0 / math.sqrt(dh)
    ctx_rows = []
    for s in range(n_seq):                                          # static loops
        r0 = s * S
        q = qkv[r0:r0 + S, 0:D]
        k = qkv[r0:r0 + S, D:2 * D]
        v = qkv[r0:r0 + S, 2 * D:3 * D]
        heads = []
        for hd in range(nh):
            c0 = hd * dh
            qh, kh, vh = q[:, c0:c0 + dh], k[:, c0:c0 + dh], v[:, c0:c0 + dh]
            sc = jnp.einsum('qd,kd->qk', qh, kh, preferred_element_type=f32) * scale
            sc = sc - jnp.max(sc, axis=-1, keepdims=True)
            p = jnp.exp(sc)
            p = p * pl.reciprocal(jnp.sum(p, axis=-1, keepdims=True), approx=True)
            heads.append(jnp.dot(p, vh, preferred_element_type=f32))
        ctx_rows.append(jnp.concatenate(heads, axis=1))             # [S, D]
    ctx = jnp.concatenate(ctx_rows, axis=0)                         # [n_seq*S, D]
    return jnp.dot(ctx, wo, preferred_element_type=f32) + bo


# ------------------------------ fused kernel ---------------------------------

def _fused_forward_kernel(
        x_ref,
        w11_ref, b11_ref,
        wqkvc_ref, bqkvc_ref, woc_ref, boc_ref,
        w1_ref, b1_ref,
        ln1g_ref, ln1b_ref,
        wqkvb_ref, bqkvb_ref, wob_ref, bob_ref,
        ln2g_ref, ln2b_ref,
        wm1_ref, bm1_ref, wm2_ref, bm2_ref,
        w2_ref, b2_ref,
        o_ref,
        *, B, in_len, out_len, D, nh):
    f32 = jnp.float32
    x = x_ref[...].astype(f32)                                       # [2B, in_len*H*W]

    # linear11, shared over the real/imag branches (rows 0..B-1 real, B..2B-1 imag)
    h = jnp.dot(x, w11_ref[...], preferred_element_type=f32) + b11_ref[...]   # [2B, in_len*D]
    tok = _wide_to_tokens(h, 2 * B, in_len, D)                       # [2B*in_len, D]

    # cross_atten (self-attention on each branch, shared weights)
    attn = _mha_tokens(tok, wqkvc_ref[...], bqkvc_ref[...], woc_ref[...], boc_ref[...],
                       n_seq=2 * B, S=in_len, D=D, nh=nh)            # [2B*in_len, D]

    # torch.stack((real, imag), dim=2) then 'a b c d -> a (b c d)'
    z_rows = []
    for b in range(B):
        pieces = []
        for c in range(in_len):
            r_real = (0 * B + b) * in_len + c
            r_imag = (1 * B + b) * in_len + c
            pieces.append(attn[r_real:r_real + 1, :])
            pieces.append(attn[r_imag:r_imag + 1, :])
        z_rows.append(jnp.concatenate(pieces, axis=1))               # [1, in_len*2*D]
    z = jnp.concatenate(z_rows, axis=0)                              # [B, in_len*2*D]

    # linear1 -> [B, out_len*D] -> tokens [B*out_len, D]
    x1 = jnp.dot(z, w1_ref[...], preferred_element_type=f32) + b1_ref[...]
    g = _wide_to_tokens(x1, B, out_len, D)                           # [B*out_len, D]

    # Transformer Block (pre-norm)
    h1 = _layernorm(g, ln1g_ref[...], ln1b_ref[...])
    g = g + _mha_tokens(h1, wqkvb_ref[...], bqkvb_ref[...], wob_ref[...], bob_ref[...],
                        n_seq=B, S=out_len, D=D, nh=nh)
    h2 = _layernorm(g, ln2g_ref[...], ln2b_ref[...])
    # TODO(synk): tanh-approx GELU (GPT-2 style); torch nn.GELU default is exact erf.
    mh = jax.nn.gelu(jnp.dot(h2, wm1_ref[...], preferred_element_type=f32) + bm1_ref[...],
                     approximate=True)
    g = g + jnp.dot(mh, wm2_ref[...], preferred_element_type=f32) + bm2_ref[...]

    # 'a b c -> a (b c)' then linear2  (lane-dense [B, out_len*2*H*W] output)
    y_in = _tokens_to_wide(g, B, out_len, D)                         # [B, out_len*D]
    y = jnp.dot(y_in, w2_ref[...], preferred_element_type=f32) + b2_ref[...]
    o_ref[...] = y.astype(o_ref.dtype)


# ------------------------------ parameters -----------------------------------

def _dense_init(key, fan_in, fan_out):
    w = 0.02 * jax.random.normal(key, (fan_in, fan_out), jnp.float32)
    b = jnp.zeros((1, fan_out), jnp.float32)
    return w, b


def _attn_init(key, d_model):
    k1, k2 = jax.random.split(key)
    wqkv, bqkv = _dense_init(k1, d_model, 3 * d_model)   # packed q/k/v
    wo, bo = _dense_init(k2, d_model, d_model)
    return dict(wqkv=wqkv, bqkv=bqkv, wo=wo, bo=bo)


def init_params(key, cfg):
    H, W = cfg['height'], cfg['width']
    in_len, out_len, D = cfg['in_len'], cfg['out_len'], cfg['d_model']
    ks = jax.random.split(key, 7)
    return {
        'linear11': _dense_init(ks[0], in_len * H * W, in_len * D),
        'cross_atten': _attn_init(ks[1], D),
        'linear1': _dense_init(ks[2], in_len * 2 * D, out_len * D),
        'linear2': _dense_init(ks[3], out_len * D, out_len * 2 * H * W),
        'block_attn': _attn_init(ks[4], D),
        'ln1': (jnp.ones((1, D), jnp.float32), jnp.zeros((1, D), jnp.float32)),
        'ln2': (jnp.ones((1, D), jnp.float32), jnp.zeros((1, D), jnp.float32)),
        'mlp': _dense_init(ks[5], D, 4 * D) + _dense_init(ks[6], 4 * D, D),
    }


# ------------------------------ forward pass ---------------------------------

def model_forward(params, x, cfg):
    B = x.shape[0]
    in_len, out_len = cfg['in_len'], cfg['out_len']
    H, W, D, nh = cfg['height'], cfg['width'], cfg['d_model'], cfg['num_heads']

    # 'b c h w -> b (c h w)' for each branch; fold branch into the row axis.
    x_real = x[:, :, 0, :, :].reshape(B, in_len * H * W)
    x_imag = x[:, :, 1, :, :].reshape(B, in_len * H * W)
    x2 = jnp.concatenate([x_real, x_imag], axis=0)        # [2B, in_len*H*W]

    ca, ba = params['cross_atten'], params['block_attn']
    wm1, bm1, wm2, bm2 = params['mlp']
    inputs = (
        x2,
        *params['linear11'],
        ca['wqkv'], ca['bqkv'], ca['wo'], ca['bo'],
        *params['linear1'],
        *params['ln1'],
        ba['wqkv'], ba['bqkv'], ba['wo'], ba['bo'],
        *params['ln2'],
        wm1, bm1, wm2, bm2,
        *params['linear2'],
    )

    kern = functools.partial(_fused_forward_kernel,
                             B=B, in_len=in_len, out_len=out_len, D=D, nh=nh)
    vmem = pl.BlockSpec(memory_space=pltpu.MemorySpace.VMEM)
    y = pl.pallas_call(
        kern,
        out_shape=jax.ShapeDtypeStruct((B, out_len * 2 * H * W), jnp.float32),
        in_specs=[vmem] * len(inputs),
        out_specs=vmem,
    )(*inputs)

    # 'a (b c d e) -> a b c d e'
    return y.reshape(B, out_len, 2, H, W)


# ------------------------- pure-JAX reference (check) ------------------------

def reference_forward(params, x, cfg):
    B = x.shape[0]
    in_len, out_len = cfg['in_len'], cfg['out_len']
    H, W, D, nh = cfg['height'], cfg['width'], cfg['d_model'], cfg['num_heads']
    dh = D // nh

    def mha_ref(t, p):                                  # t: [B, S, D]
        qkv = t @ p['wqkv'] + p['bqkv']
        q, k, v = qkv[..., :D], qkv[..., D:2 * D], qkv[..., 2 * D:]
        qh = q.reshape(*t.shape[:2], nh, dh)
        kh = k.reshape(*t.shape[:2], nh, dh)
        vh = v.reshape(*t.shape[:2], nh, dh)
        sc = jnp.einsum('bqhd,bkhd->bhqk', qh, kh) / math.sqrt(dh)
        pr = jax.nn.softmax(sc, axis=-1)
        ctx = jnp.einsum('bhqk,bkhd->bqhd', pr, vh).reshape(*t.shape[:2], D)
        return ctx @ p['wo'] + p['bo']

    def ln_ref(t, g, b):
        mu = t.mean(-1, keepdims=True)
        var = ((t - mu) ** 2).mean(-1, keepdims=True)
        return (t - mu) * jax.lax.rsqrt(var + 1e-5) * g + b

    w11, b11 = params['linear11']
    xr = (x[:, :, 0].reshape(B, -1) @ w11 + b11).reshape(B, in_len, D)
    xi = (x[:, :, 1].reshape(B, -1) @ w11 + b11).reshape(B, in_len, D)
    xr_a = mha_ref(xr, params['cross_atten'])
    xi_a = mha_ref(xi, params['cross_atten'])
    z = jnp.stack([xr_a, xi_a], axis=2).reshape(B, in_len * 2 * D)
    w1, b1 = params['linear1']
    z = (z @ w1 + b1).reshape(B, out_len, D)
    g1, be1 = params['ln1']
    g2, be2 = params['ln2']
    z = z + mha_ref(ln_ref(z, g1, be1), params['block_attn'])
    wm1, bm1, wm2, bm2 = params['mlp']
    z = z + jax.nn.gelu(ln_ref(z, g2, be2) @ wm1 + bm1, approximate=True) @ wm2 + bm2
    w2, b2 = params['linear2']
    y = z.reshape(B, out_len * D) @ w2 + b2
    return y.reshape(B, out_len, 2, H, W)


# ----------------------------------- main ------------------------------------

if __name__ == "__main__":
    cfg = dict(height=8, width=8, in_len=4, out_len=4, d_model=64, num_heads=4)

    key = jax.random.PRNGKey(0)
    k_param, k_x = jax.random.split(key)
    params = init_params(k_param, cfg)

    # input: [B, in_len, 2(real/imag), H, W]
    x = jax.random.normal(
        k_x, (2, cfg['in_len'], 2, cfg['height'], cfg['width']), jnp.float32)

    fwd = jax.jit(lambda p, xx: model_forward(p, xx, cfg))
    y = jax.block_until_ready(fwd(params, x))

    assert y.shape == (2, cfg['out_len'], 2, cfg['height'], cfg['width'])
    assert bool(jnp.all(jnp.isfinite(y)))

    y_ref = reference_forward(params, x, cfg)
    err = float(jnp.max(jnp.abs(y - y_ref)))
    assert err < 1e-2, f"kernel/reference mismatch: max abs err = {err}"

    print("KERNEL_OK")
</pallas_src>

<mosaic_0001>
module attributes {stable_mosaic.version = 11 : i64} {
  func.func @_fused_forward_kernel(%arg0: memref<4x256xf32, #tpu.memory_space<vmem>>, %arg1: memref<256x256xf32, #tpu.memory_space<vmem>>, %arg2: memref<1x256xf32, #tpu.memory_space<vmem>>, %arg3: memref<64x192xf32, #tpu.memory_space<vmem>>, %arg4: memref<1x192xf32, #tpu.memory_space<vmem>>, %arg5: memref<64x64xf32, #tpu.memory_space<vmem>>, %arg6: memref<1x64xf32, #tpu.memory_space<vmem>>, %arg7: memref<512x256xf32, #tpu.memory_space<vmem>>, %arg8: memref<1x256xf32, #tpu.memory_space<vmem>>, %arg9: memref<1x64xf32, #tpu.memory_space<vmem>>, %arg10: memref<1x64xf32, #tpu.memory_space<vmem>>, %arg11: memref<64x192xf32, #tpu.memory_space<vmem>>, %arg12: memref<1x192xf32, #tpu.memory_space<vmem>>, %arg13: memref<64x64xf32, #tpu.memory_space<vmem>>, %arg14: memref<1x64xf32, #tpu.memory_space<vmem>>, %arg15: memref<1x64xf32, #tpu.memory_space<vmem>>, %arg16: memref<1x64xf32, #tpu.memory_space<vmem>>, %arg17: memref<64x256xf32, #tpu.memory_space<vmem>>, %arg18: memref<1x256xf32, #tpu.memory_space<vmem>>, %arg19: memref<256x64xf32, #tpu.memory_space<vmem>>, %arg20: memref<1x64xf32, #tpu.memory_space<vmem>>, %arg21: memref<256x512xf32, #tpu.memory_space<vmem>>, %arg22: memref<1x512xf32, #tpu.memory_space<vmem>>, %arg23: memref<2x512xf32, #tpu.memory_space<vmem>>) attributes {dimension_semantics = [], scalar_prefetch = 0 : i64, scratch_operands = 0 : i64, tpu.core_type = #tpu.core_type<tc>} {
    %c0 = arith.constant 0 : index
    %c0_0 = arith.constant 0 : index
    %0 = vector.load %arg0[%c0, %c0_0] : memref<4x256xf32, #tpu.memory_space<vmem>>, vector<4x256xf32>
    %c0_1 = arith.constant 0 : index
    %c0_2 = arith.constant 0 : index
    %1 = vector.load %arg1[%c0_1, %c0_2] : memref<256x256xf32, #tpu.memory_space<vmem>>, vector<256x256xf32>
    %cst = arith.constant dense<0.000000e+00> : vector<4x256xf32>
    %2 = tpu.matmul %0, %1, %cst {dimension_numbers = #tpu.dot_dimension_numbers<[1], [0], [0], [1], [0, 0, 1, 1], [], []>} : vector<4x256xf32>, vector<256x256xf32>, vector<4x256xf32> -> vector<4x256xf32>
    %c0_3 = arith.constant 0 : index
    %c0_4 = arith.constant 0 : index
    %3 = vector.load %arg2[%c0_3, %c0_4] : memref<1x256xf32, #tpu.memory_space<vmem>>, vector<1x256xf32>
    %4 = vector.broadcast %3 : vector<1x256xf32> to vector<4x256xf32>
    %5 = arith.addf %2, %4 : vector<4x256xf32>
    %6 = vector.extract_strided_slice %5 {offsets = [0, 0], sizes = [1, 64], strides = [1, 1]} : vector<4x256xf32> to vector<1x64xf32>
    %7 = vector.extract_strided_slice %5 {offsets = [0, 64], sizes = [1, 64], strides = [1, 1]} : vector<4x256xf32> to vector<1x64xf32>
    %8 = vector.extract_strided_slice %5 {offsets = [0, 128], sizes = [1, 64], strides = [1, 1]} : vector<4x256xf32> to vector<1x64xf32>
    %9 = vector.extract_strided_slice %5 {offsets = [0, 192], sizes = [1, 64], strides = [1, 1]} : vector<4x256xf32> to vector<1x64xf32>
    %10 = vector.extract_strided_slice %5 {offsets = [1, 0], sizes = [1, 64], strides = [1, 1]} : vector<4x256xf32> to vector<1x64xf32>
    %11 = vector.extract_strided_slice %5 {offsets = [1, 64], sizes = [1, 64], strides = [1, 1]} : vector<4x256xf32> to vector<1x64xf32>
    %12 = vector.extract_strided_slice %5 {offsets = [1, 128], sizes = [1, 64], strides = [1, 1]} : vector<4x256xf32> to vector<1x64xf32>
    %13 = vector.extract_strided_slice %5 {offsets = [1, 192], sizes = [1, 64], strides = [1, 1]} : vector<4x256xf32> to vector<1x64xf32>
    %14 = vector.extract_strided_slice %5 {offsets = [2, 0], sizes = [1, 64], strides = [1, 1]} : vector<4x256xf32> to vector<1x64xf32>
    %15 = vector.extract_strided_slice %5 {offsets = [2, 64], sizes = [1, 64], strides = [1, 1]} : vector<4x256xf32> to vector<1x64xf32>
    %16 = vector.extract_strided_slice %5 {offsets = [2, 128], sizes = [1, 64], strides = [1, 1]} : vector<4x256xf32> to vector<1x64xf32>
    %17 = vector.extract_strided_slice %5 {offsets = [2, 192], sizes = [1, 64], strides = [1, 1]} : vector<4x256xf32> to vector<1x64xf32>
    %18 = vector.extract_strided_slice %5 {offsets = [3, 0], sizes = [1, 64], strides = [1, 1]} : vector<4x256xf32> to vector<1x64xf32>
    %19 = vector.extract_strided_slice %5 {offsets = [3, 64], sizes = [1, 64], strides = [1, 1]} : vector<4x256xf32> to vector<1x64xf32>
    %20 = vector.extract_strided_slice %5 {offsets = [3, 128], sizes = [1, 64], strides = [1, 1]} : vector<4x256xf32> to vector<1x64xf32>
    %21 = vector.extract_strided_slice %5 {offsets = [3, 192], sizes = [1, 64], strides = [1, 1]} : vector<4x256xf32> to vector<1x64xf32>
    %22 = tpu.concatenate %6, %7, %8, %9, %10, %11, %12, %13, %14, %15, %16, %17, %18, %19, %20, %21 in 0 : vector<1x64xf32>, vector<1x64xf32>, vector<1x64xf32>, vector<1x64xf32>, vector<1x64xf32>, vector<1x64xf32>, vector<1x64xf32>, vector<1x64xf32>, vector<1x64xf32>, vector<1x64xf32>, vector<1x64xf32>, vector<1x64xf32>, vector<1x64xf32>, vector<1x64xf32>, vector<1x64xf32>, vector<1x64xf32> -> vector<16x64xf32>
    %c0_5 = arith.constant 0 : index
    %c0_6 = arith.constant 0 : index
    %23 = vector.load %arg3[%c0_5, %c0_6] : memref<64x192xf32, #tpu.memory_space<vmem>>, vector<64x192xf32>
    %c0_7 = arith.constant 0 : index
    %c0_8 = arith.constant 0 : index
    %24 = vector.load %arg4[%c0_7, %c0_8] : memref<1x192xf32, #tpu.memory_space<vmem>>, vector<1x192xf32>
    %c0_9 = arith.constant 0 : index
    %c0_10 = arith.constant 0 : index
    %25 = vector.load %arg5[%c0_9, %c0_10] : memref<64x64xf32, #tpu.memory_space<vmem>>, vector<64x64xf32>
    %c0_11 = arith.constant 0 : index
    %c0_12 = arith.constant 0 : index
    %26 = vector.load %arg6[%c0_11, %c0_12] : memref<1x64xf32, #tpu.memory_space<vmem>>, vector<1x64xf32>
    %cst_13 = arith.constant dense<0.000000e+00> : vector<16x192xf32>
    %27 = tpu.matmul %22, %23, %cst_13 {dimension_numbers = #tpu.dot_dimension_numbers<[1], [0], [0], [1], [0, 0, 1, 1], [], []>} : vector<16x64xf32>, vector<64x192xf32>, vector<16x192xf32> -> vector<16x192xf32>
    %28 = vector.broadcast %24 : vector<1x192xf32> to vector<16x192xf32>
    %29 = arith.addf %27, %28 : vector<16x192xf32>
    %30 = vector.extract_strided_slice %29 {offsets = [0, 0], sizes = [4, 64], strides = [1, 1]} : vector<16x192xf32> to vector<4x64xf32>
    %31 = vector.extract_strided_slice %29 {offsets = [0, 64], sizes = [4, 64], strides = [1, 1]} : vector<16x192xf32> to vector<4x64xf32>
    %32 = vector.extract_strided_slice %29 {offsets = [0, 128], sizes = [4, 64], strides = [1, 1]} : vector<16x192xf32> to vector<4x64xf32>
    %33 = vector.extract_strided_slice %30 {offsets = [0, 0], sizes = [4, 16], strides = [1, 1]} : vector<4x64xf32> to vector<4x16xf32>
    %34 = vector.extract_strided_slice %31 {offsets = [0, 0], sizes = [4, 16], strides = [1, 1]} : vector<4x64xf32> to vector<4x16xf32>
    %35 = vector.extract_strided_slice %32 {offsets = [0, 0], sizes = [4, 16], strides = [1, 1]} : vector<4x64xf32> to vector<4x16xf32>
    "tpu.trace_start"() <{level = 10 : i32, message = "qd,kd->qk"}> : () -> ()
    %cst_14 = arith.constant dense<0.000000e+00> : vector<4x4xf32>
    %36 = tpu.matmul %33, %34, %cst_14 {dimension_numbers = #tpu.dot_dimension_numbers<[1], [1], [0], [0], [0, 0, 1, 0], [], []>} : vector<4x16xf32>, vector<4x16xf32>, vector<4x4xf32> -> vector<4x4xf32>
    "tpu.trace_stop"() : () -> ()
    %cst_15 = arith.constant 2.500000e-01 : f32
    %37 = vector.broadcast %cst_15 : f32 to vector<4x4xf32>
    %38 = arith.mulf %36, %37 : vector<4x4xf32>
    %cst_16 = arith.constant dense<0xFF800000> : vector<4xf32>
    %39 = vector.multi_reduction <maximumf>, %38, %cst_16 [1] : vector<4x4xf32> to vector<4xf32>
    %40 = vector.shape_cast %39 : vector<4xf32> to vector<4x1xf32>
    %41 = vector.broadcast %40 : vector<4x1xf32> to vector<4x4xf32>
    %42 = arith.subf %38, %41 : vector<4x4xf32>
    %43 = math.exp %42 : vector<4x4xf32>
    %cst_17 = arith.constant dense<0.000000e+00> : vector<4xf32>
    %44 = vector.multi_reduction <add>, %43, %cst_17 [1] : vector<4x4xf32> to vector<4xf32>
    %45 = vector.shape_cast %44 : vector<4xf32> to vector<4x1xf32>
    %46 = tpu.reciprocal %45 {approx = true} : vector<4x1xf32> -> vector<4x1xf32>
    %47 = vector.broadcast %46 : vector<4x1xf32> to vector<4x4xf32>
    %48 = arith.mulf %43, %47 : vector<4x4xf32>
    %cst_18 = arith.constant dense<0.000000e+00> : vector<4x16xf32>
    %49 = tpu.matmul %48, %35, %cst_18 {dimension_numbers = #tpu.dot_dimension_numbers<[1], [0], [0], [1], [0, 0, 1, 1], [], []>} : vector<4x4xf32>, vector<4x16xf32>, vector<4x16xf32> -> vector<4x16xf32>
    %50 = vector.extract_strided_slice %30 {offsets = [0, 16], sizes = [4, 16], strides = [1, 1]} : vector<4x64xf32> to vector<4x16xf32>
    %51 = vector.extract_strided_slice %31 {offsets = [0, 16], sizes = [4, 16], strides = [1, 1]} : vector<4x64xf32> to vector<4x16xf32>
    %52 = vector.extract_strided_slice %32 {offsets = [0, 16], sizes = [4, 16], strides = [1, 1]} : vector<4x64xf32> to vector<4x16xf32>
    "tpu.trace_start"() <{level = 10 : i32, message = "qd,kd->qk"}> : () -> ()
    %cst_19 = arith.constant dense<0.000000e+00> : vector<4x4xf32>
    %53 = tpu.matmul %50, %51, %cst_19 {dimension_numbers = #tpu.dot_dimension_numbers<[1], [1], [0], [0], [0, 0, 1, 0], [], []>} : vector<4x16xf32>, vector<4x16xf32>, vector<4x4xf32> -> vector<4x4xf32>
    "tpu.trace_stop"() : () -> ()
    %cst_20 = arith.constant 2.500000e-01 : f32
    %54 = vector.broadcast %cst_20 : f32 to vector<4x4xf32>
    %55 = arith.mulf %53, %54 : vector<4x4xf32>
    %cst_21 = arith.constant dense<0xFF800000> : vector<4xf32>
    %56 = vector.multi_reduction <maximumf>, %55, %cst_21 [1] : vector<4x4xf32> to vector<4xf32>
    %57 = vector.shape_cast %56 : vector<4xf32> to vector<4x1xf32>
    %58 = vector.broadcast %57 : vector<4x1xf32> to vector<4x4xf32>
    %59 = arith.subf %55, %58 : vector<4x4xf32>
    %60 = math.exp %59 : vector<4x4xf32>
    %cst_22 = arith.constant dense<0.000000e+00> : vector<4xf32>
    %61 = vector.multi_reduction <add>, %60, %cst_22 [1] : vector<4x4xf32> to vector<4xf32>
    %62 = vector.shape_cast %61 : vector<4xf32> to vector<4x1xf32>
    %63 = tpu.reciprocal %62 {approx = true} : vector<4x1xf32> -> vector<4x1xf32>
    %64 = vector.broadcast %63 : vector<4x1xf32> to vector<4x4xf32>
    %65 = arith.mulf %60, %64 : vector<4x4xf32>
    %cst_23 = arith.constant dense<0.000000e+00> : vector<4x16xf32>
    %66 = tpu.matmul %65, %52, %cst_23 {dimension_numbers = #tpu.dot_dimension_numbers<[1], [0], [0], [1], [0, 0, 1, 1], [], []>} : vector<4x4xf32>, vector<4x16xf32>, vector<4x16xf32> -> vector<4x16xf32>
    %67 = vector.extract_strided_slice %30 {offsets = [0, 32], sizes = [4, 16], strides = [1, 1]} : vector<4x64xf32> to vector<4x16xf32>
    %68 = vector.extract_strided_slice %31 {offsets = [0, 32], sizes = [4, 16], strides = [1, 1]} : vector<4x64xf32> to vector<4x16xf32>
    %69 = vector.extract_strided_slice %32 {offsets = [0, 32], sizes = [4, 16], strides = [1, 1]} : vector<4x64xf32> to vector<4x16xf32>
    "tpu.trace_start"() <{level = 10 : i32, message = "qd,kd->qk"}> : () -> ()
    %cst_24 = arith.constant dense<0.000000e+00> : vector<4x4xf32>
    %70 = tpu.matmul %67, %68, %cst_24 {dimension_numbers = #tpu.dot_dimension_numbers<[1], [1], [0], [0], [0, 0, 1, 0], [], []>} : vector<4x16xf32>, vector<4x16xf32>, vector<4x4xf32> -> vector<4x4xf32>
    "tpu.trace_stop"() : () -> ()
    %cst_25 = arith.constant 2.500000e-01 : f32
    %71 = vector.broadcast %cst_25 : f32 to vector<4x4xf32>
    %72 = arith.mulf %70, %71 : vector<4x4xf32>
    %cst_26 = arith.constant dense<0xFF800000> : vector<4xf32>
    %73 = vector.multi_reduction <maximumf>, %72, %cst_26 [1] : vector<4x4xf32> to vector<4xf32>
    %74 = vector.shape_cast %73 : vector<4xf32> to vector<4x1xf32>
    %75 = vector.broadcast %74 : vector<4x1xf32> to vector<4x4xf32>
    %76 = arith.subf %72, %75 : vector<4x4xf32>
    %77 = math.exp %76 : vector<4x4xf32>
    %cst_27 = arith.constant dense<0.000000e+00> : vector<4xf32>
    %78 = vector.multi_reduction <add>, %77, %cst_27 [1] : vector<4x4xf32> to vector<4xf32>
    %79 = vector.shape_cast %78 : vector<4xf32> to vector<4x1xf32>
    %80 = tpu.reciprocal %79 {approx = true} : vector<4x1xf32> -> vector<4x1xf32>
    %81 = vector.broadcast %80 : vector<4x1xf32> to vector<4x4xf32>
    %82 = arith.mulf %77, %81 : vector<4x4xf32>
    %cst_28 = arith.constant dense<0.000000e+00> : vector<4x16xf32>
    %83 = tpu.matmul %82, %69, %cst_28 {dimension_numbers = #tpu.dot_dimension_numbers<[1], [0], [0], [1], [0, 0, 1, 1], [], []>} : vector<4x4xf32>, vector<4x16xf32>, vector<4x16xf32> -> vector<4x16xf32>
    %84 = vector.extract_strided_slice %30 {offsets = [0, 48], sizes = [4, 16], strides = [1, 1]} : vector<4x64xf32> to vector<4x16xf32>
    %85 = vector.extract_strided_slice %31 {offsets = [0, 48], sizes = [4, 16], strides = [1, 1]} : vector<4x64xf32> to vector<4x16xf32>
    %86 = vector.extract_strided_slice %32 {offsets = [0, 48], sizes = [4, 16], strides = [1, 1]} : vector<4x64xf32> to vector<4x16xf32>
    "tpu.trace_start"() <{level = 10 : i32, message = "qd,kd->qk"}> : () -> ()
    %cst_29 = arith.constant dense<0.000000e+00> : vector<4x4xf32>
    %87 = tpu.matmul %84, %85, %cst_29 {dimension_numbers = #tpu.dot_dimension_numbers<[1], [1], [0], [0], [0, 0, 1, 0], [], []>} : vector<4x16xf32>, vector<4x16xf32>, vector<4x4xf32> -> vector<4x4xf32>
    "tpu.trace_stop"() : () -> ()
    %cst_30 = arith.constant 2.500000e-01 : f32
    %88 = vector.broadcast %cst_30 : f32 to vector<4x4xf32>
    %89 = arith.mulf %87, %88 : vector<4x4xf32>
    %cst_31 = arith.constant dense<0xFF800000> : vector<4xf32>
    %90 = vector.multi_reduction <maximumf>, %89, %cst_31 [1] : vector<4x4xf32> to vector<4xf32>
    %91 = vector.shape_cast %90 : vector<4xf32> to vector<4x1xf32>
    %92 = vector.broadcast %91 : vector<4x1xf32> to vector<4x4xf32>
    %93 = arith.subf %89, %92 : vector<4x4xf32>
    %94 = math.exp %93 : vector<4x4xf32>
    %cst_32 = arith.constant dense<0.000000e+00> : vector<4xf32>
    %95 = vector.multi_reduction <add>, %94, %cst_32 [1] : vector<4x4xf32> to vector<4xf32>
    %96 = vector.shape_cast %95 : vector<4xf32> to vector<4x1xf32>
    %97 = tpu.reciprocal %96 {approx = true} : vector<4x1xf32> -> vector<4x1xf32>
    %98 = vector.broadcast %97 : vector<4x1xf32> to vector<4x4xf32>
    %99 = arith.mulf %94, %98 : vector<4x4xf32>
    %cst_33 = arith.constant dense<0.000000e+00> : vector<4x16xf32>
    %100 = tpu.matmul %99, %86, %cst_33 {dimension_numbers = #tpu.dot_dimension_numbers<[1], [0], [0], [1], [0, 0, 1, 1], [], []>} : vector<4x4xf32>, vector<4x16xf32>, vector<4x16xf32> -> vector<4x16xf32>
    %101 = tpu.concatenate %49, %66, %83, %100 in 1 : vector<4x16xf32>, vector<4x16xf32>, vector<4x16xf32>, vector<4x16xf32> -> vector<4x64xf32>
    %102 = vector.extract_strided_slice %29 {offsets = [4, 0], sizes = [4, 64], strides = [1, 1]} : vector<16x192xf32> to vector<4x64xf32>
    %103 = vector.extract_strided_slice %29 {offsets = [4, 64], sizes = [4, 64], strides = [1, 1]} : vector<16x192xf32> to vector<4x64xf32>
    %104 = vector.extract_strided_slice %29 {offsets = [4, 128], sizes = [4, 64], strides = [1, 1]} : vector<16x192xf32> to vector<4x64xf32>
    %105 = vector.extract_strided_slice %102 {offsets = [0, 0], sizes = [4, 16], strides = [1, 1]} : vector<4x64xf32> to vector<4x16xf32>
    %106 = vector.extract_strided_slice %103 {offsets = [0, 0], sizes = [4, 16], strides = [1, 1]} : vector<4x64xf32> to vector<4x16xf32>
    %107 = vector.extract_strided_slice %104 {offsets = [0, 0], sizes = [4, 16], strides = [1, 1]} : vector<4x64xf32> to vector<4x16xf32>
    "tpu.trace_start"() <{level = 10 : i32, message = "qd,kd->qk"}> : () -> ()
    %cst_34 = arith.constant dense<0.000000e+00> : vector<4x4xf32>
    %108 = tpu.matmul %105, %106, %cst_34 {dimension_numbers = #tpu.dot_dimension_numbers<[1], [1], [0], [0], [0, 0, 1, 0], [], []>} : vector<4x16xf32>, vector<4x16xf32>, vector<4x4xf32> -> vector<4x4xf32>
    "tpu.trace_stop"() : () -> ()
    %cst_35 = arith.constant 2.500000e-01 : f32
    %109 = vector.broadcast %cst_35 : f32 to vector<4x4xf32>
    %110 = arith.mulf %108, %109 : vector<4x4xf32>
    %cst_36 = arith.constant dense<0xFF800000> : vector<4xf32>
    %111 = vector.multi_reduction <maximumf>, %110, %cst_36 [1] : vector<4x4xf32> to vector<4xf32>
    %112 = vector.shape_cast %111 : vector<4xf32> to vector<4x1xf32>
    %113 = vector.broadcast %112 : vector<4x1xf32> to vector<4x4xf32>
    %114 = arith.subf %110, %113 : vector<4x4xf32>
    %115 = math.exp %114 : vector<4x4xf32>
    %cst_37 = arith.constant dense<0.000000e+00> : vector<4xf32>
    %116 = vector.multi_reduction <add>, %115, %cst_37 [1] : vector<4x4xf32> to vector<4xf32>
    %117 = vector.shape_cast %116 : vector<4xf32> to vector<4x1xf32>
    %118 = tpu.reciprocal %117 {approx = true} : vector<4x1xf32> -> vector<4x1xf32>
    %119 = vector.broadcast %118 : vector<4x1xf32> to vector<4x4xf32>
    %120 = arith.mulf %115, %119 : vector<4x4xf32>
    %cst_38 = arith.constant dense<0.000000e+00> : vector<4x16xf32>
    %121 = tpu.matmul %120, %107, %cst_38 {dimension_numbers = #tpu.dot_dimension_numbers<[1], [0], [0], [1], [0, 0, 1, 1], [], []>} : vector<4x4xf32>, vector<4x16xf32>, vector<4x16xf32> -> vector<4x16xf32>
    %122 = vector.extract_strided_slice %102 {offsets = [0, 16], sizes = [4, 16], strides = [1, 1]} : vector<4x64xf32> to vector<4x16xf32>
    %123 = vector.extract_strided_slice %103 {offsets = [0, 16], sizes = [4, 16], strides = [1, 1]} : vector<4x64xf32> to vector<4x16xf32>
    %124 = vector.extract_strided_slice %104 {offsets = [0, 16], sizes = [4, 16], strides = [1, 1]} : vector<4x64xf32> to vector<4x16xf32>
    "tpu.trace_start"() <{level = 10 : i32, message = "qd,kd->qk"}> : () -> ()
    %cst_39 = arith.constant dense<0.000000e+00> : vector<4x4xf32>
    %125 = tpu.matmul %122, %123, %cst_39 {dimension_numbers = #tpu.dot_dimension_numbers<[1], [1], [0], [0], [0, 0, 1, 0], [], []>} : vector<4x16xf32>, vector<4x16xf32>, vector<4x4xf32> -> vector<4x4xf32>
    "tpu.trace_stop"() : () -> ()
    %cst_40 = arith.constant 2.500000e-01 : f32
    %126 = vector.broadcast %cst_40 : f32 to vector<4x4xf32>
    %127 = arith.mulf %125, %126 : vector<4x4xf32>
    %cst_41 = arith.constant dense<0xFF800000> : vector<4xf32>
    %128 = vector.multi_reduction <maximumf>, %127, %cst_41 [1] : vector<4x4xf32> to vector<4xf32>
    %129 = vector.shape_cast %128 : vector<4xf32> to vector<4x1xf32>
    %130 = vector.broadcast %129 : vector<4x1xf32> to vector<4x4xf32>
    %131 = arith.subf %127, %130 : vector<4x4xf32>
    %132 = math.exp %131 : vector<4x4xf32>
    %cst_42 = arith.constant dense<0.000000e+00> : vector<4xf32>
    %133 = vector.multi_reduction <add>, %132, %cst_42 [1] : vector<4x4xf32> to vector<4xf32>
    %134 = vector.shape_cast %133 : vector<4xf32> to vector<4x1xf32>
    %135 = tpu.reciprocal %134 {approx = true} : vector<4x1xf32> -> vector<4x1xf32>
    %136 = vector.broadcast %135 : vector<4x1xf32> to vector<4x4xf32>
    %137 = arith.mulf %132, %136 : vector<4x4xf32>
    %cst_43 = arith.constant dense<0.000000e+00> : vector<4x16xf32>
    %138 = tpu.matmul %137, %124, %cst_43 {dimension_numbers = #tpu.dot_dimension_numbers<[1], [0], [0], [1], [0, 0, 1, 1], [], []>} : vector<4x4xf32>, vector<4x16xf32>, vector<4x16xf32> -> vector<4x16xf32>
    %139 = vector.extract_strided_slice %102 {offsets = [0, 32], sizes = [4, 16], strides = [1, 1]} : vector<4x64xf32> to vector<4x16xf32>
    %140 = vector.extract_strided_slice %103 {offsets = [0, 32], sizes = [4, 16], strides = [1, 1]} : vector<4x64xf32> to vector<4x16xf32>
    %141 = vector.extract_strided_slice %104 {offsets = [0, 32], sizes = [4, 16], strides = [1, 1]} : vector<4x64xf32> to vector<4x16xf32>
    "tpu.trace_start"() <{level = 10 : i32, message = "qd,kd->qk"}> : () -> ()
    %cst_44 = arith.constant dense<0.000000e+00> : vector<4x4xf32>
    %142 = tpu.matmul %139, %140, %cst_44 {dimension_numbers = #tpu.dot_dimension_numbers<[1], [1], [0], [0], [0, 0, 1, 0], [], []>} : vector<4x16xf32>, vector<4x16xf32>, vector<4x4xf32> -> vector<4x4xf32>
    "tpu.trace_stop"() : () -> ()
    %cst_45 = arith.constant 2.500000e-01 : f32
    %143 = vector.broadcast %cst_45 : f32 to vector<4x4xf32>
    %144 = arith.mulf %142, %143 : vector<4x4xf32>
    %cst_46 = arith.constant dense<0xFF800000> : vector<4xf32>
    %145 = vector.multi_reduction <maximumf>, %144, %cst_46 [1] : vector<4x4xf32> to vector<4xf32>
    %146 = vector.shape_cast %145 : vector<4xf32> to vector<4x1xf32>
    %147 = vector.broadcast %146 : vector<4x1xf32> to vector<4x4xf32>
    %148 = arith.subf %144, %147 : vector<4x4xf32>
    %149 = math.exp %148 : vector<4x4xf32>
    %cst_47 = arith.constant dense<0.000000e+00> : vector<4xf32>
    %150 = vector.multi_reduction <add>, %149, %cst_47 [1] : vector<4x4xf32> to vector<4xf32>
    %151 = vector.shape_cast %150 : vector<4xf32> to vector<4x1xf32>
    %152 = tpu.reciprocal %151 {approx = true} : vector<4x1xf32> -> vector<4x1xf32>
    %153 = vector.broadcast %152 : vector<4x1xf32> to vector<4x4xf32>
    %154 = arith.mulf %149, %153 : vector<4x4xf32>
    %cst_48 = arith.constant dense<0.000000e+00> : vector<4x16xf32>
    %155 = tpu.matmul %154, %141, %cst_48 {dimension_numbers = #tpu.dot_dimension_numbers<[1], [0], [0], [1], [0, 0, 1, 1], [], []>} : vector<4x4xf32>, vector<4x16xf32>, vector<4x16xf32> -> vector<4x16xf32>
    %156 = vector.extract_strided_slice %102 {offsets = [0, 48], sizes = [4, 16], strides = [1, 1]} : vector<4x64xf32> to vector<4x16xf32>
    %157 = vector.extract_strided_slice %103 {offsets = [0, 48], sizes = [4, 16], strides = [1, 1]} : vector<4x64xf32> to vector<4x16xf32>
    %158 = vector.extract_strided_slice %104 {offsets = [0, 48], sizes = [4, 16], strides = [1, 1]} : vector<4x64xf32> to vector<4x16xf32>
    "tpu.trace_start"() <{level = 10 : i32, message = "qd,kd->qk"}> : () -> ()
    %cst_49 = arith.constant dense<0.000000e+00> : vector<4x4xf32>
    %159 = tpu.matmul %156, %157, %cst_49 {dimension_numbers = #tpu.dot_dimension_numbers<[1], [1], [0], [0], [0, 0, 1, 0], [], []>} : vector<4x16xf32>, vector<4x16xf32>, vector<4x4xf32> -> vector<4x4xf32>
    "tpu.trace_stop"() : () -> ()
    %cst_50 = arith.constant 2.500000e-01 : f32
    %160 = vector.broadcast %cst_50 : f32 to vector<4x4xf32>
    %161 = arith.mulf %159, %160 : vector<4x4xf32>
    %cst_51 = arith.constant dense<0xFF800000> : vector<4xf32>
    %162 = vector.multi_reduction <maximumf>, %161, %cst_51 [1] : vector<4x4xf32> to vector<4xf32>
    %163 = vector.shape_cast %162 : vector<4xf32> to vector<4x1xf32>
    %164 = vector.broadcast %163 : vector<4x1xf32> to vector<4x4xf32>
    %165 = arith.subf %161, %164 : vector<4x4xf32>
    %166 = math.exp %165 : vector<4x4xf32>
    %cst_52 = arith.constant dense<0.000000e+00> : vector<4xf32>
    %167 = vector.multi_reduction <add>, %166, %cst_52 [1] : vector<4x4xf32> to vector<4xf32>
    %168 = vector.shape_cast %167 : vector<4xf32> to vector<4x1xf32>
    %169 = tpu.reciprocal %168 {approx = true} : vector<4x1xf32> -> vector<4x1xf32>
    %170 = vector.broadcast %169 : vector<4x1xf32> to vector<4x4xf32>
    %171 = arith.mulf %166, %170 : vector<4x4xf32>
    %cst_53 = arith.constant dense<0.000000e+00> : vector<4x16xf32>
    %172 = tpu.matmul %171, %158, %cst_53 {dimension_numbers = #tpu.dot_dimension_numbers<[1], [0], [0], [1], [0, 0, 1, 1], [], []>} : vector<4x4xf32>, vector<4x16xf32>, vector<4x16xf32> -> vector<4x16xf32>
    %173 = tpu.concatenate %121, %138, %155, %172 in 1 : vector<4x16xf32>, vector<4x16xf32>, vector<4x16xf32>, vector<4x16xf32> -> vector<4x64xf32>
    %174 = vector.extract_strided_slice %29 {offsets = [8, 0], sizes = [4, 64], strides = [1, 1]} : vector<16x192xf32> to vector<4x64xf32>
    %175 = vector.extract_strided_slice %29 {offsets = [8, 64], sizes = [4, 64], strides = [1, 1]} : vector<16x192xf32> to vector<4x64xf32>
    %176 = vector.extract_strided_slice %29 {offsets = [8, 128], sizes = [4, 64], strides = [1, 1]} : vector<16x192xf32> to vector<4x64xf32>
    %177 = vector.extract_strided_slice %174 {offsets = [0, 0], sizes = [4, 16], strides = [1, 1]} : vector<4x64xf32> to vector<4x16xf32>
    %178 = vector.extract_strided_slice %175 {offsets = [0, 0], sizes = [4, 16], strides = [1, 1]} : vector<4x64xf32> to vector<4x16xf32>
    %179 = vector.extract_strided_slice %176 {offsets = [0, 0], sizes = [4, 16], strides = [1, 1]} : vector<4x64xf32> to vector<4x16xf32>
    "tpu.trace_start"() <{level = 10 : i32, message = "qd,kd->qk"}> : () -> ()
    %cst_54 = arith.constant dense<0.000000e+00> : vector<4x4xf32>
    %180 = tpu.matmul %177, %178, %cst_54 {dimension_numbers = #tpu.dot_dimension_numbers<[1], [1], [0], [0], [0, 0, 1, 0], [], []>} : vector<4x16xf32>, vector<4x16xf32>, vector<4x4xf32> -> vector<4x4xf32>
    "tpu.trace_stop"() : () -> ()
    %cst_55 = arith.constant 2.500000e-01 : f32
    %181 = vector.broadcast %cst_55 : f32 to vector<4x4xf32>
    %182 = arith.mulf %180, %181 : vector<4x4xf32>
    %cst_56 = arith.constant dense<0xFF800000> : vector<4xf32>
    %183 = vector.multi_reduction <maximumf>, %182, %cst_56 [1] : vector<4x4xf32> to vector<4xf32>
    %184 = vector.shape_cast %183 : vector<4xf32> to vector<4x1xf32>
    %185 = vector.broadcast %184 : vector<4x1xf32> to vector<4x4xf32>
    %186 = arith.subf %182, %185 : vector<4x4xf32>
    %187 = math.exp %186 : vector<4x4xf32>
    %cst_57 = arith.constant dense<0.000000e+00> : vector<4xf32>
    %188 = vector.multi_reduction <add>, %187, %cst_57 [1] : vector<4x4xf32> to vector<4xf32>
    %189 = vector.shape_cast %188 : vector<4xf32> to vector<4x1xf32>
    %190 = tpu.reciprocal %189 {approx = true} : vector<4x1xf32> -> vector<4x1xf32>
    %191 = vector.broadcast %190 : vector<4x1xf32> to vector<4x4xf32>
    %192 = arith.mulf %187, %191 : vector<4x4xf32>
    %cst_58 = arith.constant dense<0.000000e+00> : vector<4x16xf32>
    %193 = tpu.matmul %192, %179, %cst_58 {dimension_numbers = #tpu.dot_dimension_numbers<[1], [0], [0], [1], [0, 0, 1, 1], [], []>} : vector<4x4xf32>, vector<4x16xf32>, vector<4x16xf32> -> vector<4x16xf32>
    %194 = vector.extract_strided_slice %174 {offsets = [0, 16], sizes = [4, 16], strides = [1, 1]} : vector<4x64xf32> to vector<4x16xf32>
    %195 = vector.extract_strided_slice %175 {offsets = [0, 16], sizes = [4, 16], strides = [1, 1]} : vector<4x64xf32> to vector<4x16xf32>
    %196 = vector.extract_strided_slice %176 {offsets = [0, 16], sizes = [4, 16], strides = [1, 1]} : vector<4x64xf32> to vector<4x16xf32>
    "tpu.trace_start"() <{level = 10 : i32, message = "qd,kd->qk"}> : () -> ()
    %cst_59 = arith.constant dense<0.000000e+00> : vector<4x4xf32>
    %197 = tpu.matmul %194, %195, %cst_59 {dimension_numbers = #tpu.dot_dimension_numbers<[1], [1], [0], [0], [0, 0, 1, 0], [], []>} : vector<4x16xf32>, vector<4x16xf32>, vector<4x4xf32> -> vector<4x4xf32>
    "tpu.trace_stop"() : () -> ()
    %cst_60 = arith.constant 2.500000e-01 : f32
    %198 = vector.broadcast %cst_60 : f32 to vector<4x4xf32>
    %199 = arith.mulf %197, %198 : vector<4x4xf32>
    %cst_61 = arith.constant dense<0xFF800000> : vector<4xf32>
    %200 = vector.multi_reduction <maximumf>, %199, %cst_61 [1] : vector<4x4xf32> to vector<4xf32>
    %201 = vector.shape_cast %200 : vector<4xf32> to vector<4x1xf32>
    %202 = vector.broadcast %201 : vector<4x1xf32> to vector<4x4xf32>
    %203 = arith.subf %199, %202 : vector<4x4xf32>
    %204 = math.exp %203 : vector<4x4xf32>
    %cst_62 = arith.constant dense<0.000000e+00> : vector<4xf32>
    %205 = vector.multi_reduction <add>, %204, %cst_62 [1] : vector<4x4xf32> to vector<4xf32>
    %206 = vector.shape_cast %205 : vector<4xf32> to vector<4x1xf32>
    %207 = tpu.reciprocal %206 {approx = true} : vector<4x1xf32> -> vector<4x1xf32>
    %208 = vector.broadcast %207 : vector<4x1xf32> to vector<4x4xf32>
    %209 = arith.mulf %204, %208 : vector<4x4xf32>
    %cst_63 = arith.constant dense<0.000000e+00> : vector<4x16xf32>
    %210 = tpu.matmul %209, %196, %cst_63 {dimension_numbers = #tpu.dot_dimension_numbers<[1], [0], [0], [1], [0, 0, 1, 1], [], []>} : vector<4x4xf32>, vector<4x16xf32>, vector<4x16xf32> -> vector<4x16xf32>
    %211 = vector.extract_strided_slice %174 {offsets = [0, 32], sizes = [4, 16], strides = [1, 1]} : vector<4x64xf32> to vector<4x16xf32>
    %212 = vector.extract_strided_slice %175 {offsets = [0, 32], sizes = [4, 16], strides = [1, 1]} : vector<4x64xf32> to vector<4x16xf32>
    %213 = vector.extract_strided_slice %176 {offsets = [0, 32], sizes = [4, 16], strides = [1, 1]} : vector<4x64xf32> to vector<4x16xf32>
    "tpu.trace_start"() <{level = 10 : i32, message = "qd,kd->qk"}> : () -> ()
    %cst_64 = arith.constant dense<0.000000e+00> : vector<4x4xf32>
    %214 = tpu.matmul %211, %212, %cst_64 {dimension_numbers = #tpu.dot_dimension_numbers<[1], [1], [0], [0], [0, 0, 1, 0], [], []>} : vector<4x16xf32>, vector<4x16xf32>, vector<4x4xf32> -> vector<4x4xf32>
    "tpu.trace_stop"() : () -> ()
    %cst_65 = arith.constant 2.500000e-01 : f32
    %215 = vector.broadcast %cst_65 : f32 to vector<4x4xf32>
    %216 = arith.mulf %214, %215 : vector<4x4xf32>
    %cst_66 = arith.constant dense<0xFF800000> : vector<4xf32>
    %217 = vector.multi_reduction <maximumf>, %216, %cst_66 [1] : vector<4x4xf32> to vector<4xf32>
    %218 = vector.shape_cast %217 : vector<4xf32> to vector<4x1xf32>
    %219 = vector.broadcast %218 : vector<4x1xf32> to vector<4x4xf32>
    %220 = arith.subf %216, %219 : vector<4x4xf32>
    %221 = math.exp %220 : vector<4x4xf32>
    %cst_67 = arith.constant dense<0.000000e+00> : vector<4xf32>
    %222 = vector.multi_reduction <add>, %221, %cst_67 [1] : vector<4x4xf32> to vector<4xf32>
    %223 = vector.shape_cast %222 : vector<4xf32> to vector<4x1xf32>
    %224 = tpu.reciprocal %223 {approx = true} : vector<4x1xf32> -> vector<4x1xf32>
    %225 = vector.broadcast %224 : vector<4x1xf32> to vector<4x4xf32>
    %226 = arith.mulf %221, %225 : vector<4x4xf32>
    %cst_68 = arith.constant dense<0.000000e+00> : vector<4x16xf32>
    %227 = tpu.matmul %226, %213, %cst_68 {dimension_numbers = #tpu.dot_dimension_numbers<[1], [0], [0], [1], [0, 0, 1, 1], [], []>} : vector<4x4xf32>, vector<4x16xf32>, vector<4x16xf32> -> vector<4x16xf32>
    %228 = vector.extract_strided_slice %174 {offsets = [0, 48], sizes = [4, 16], strides = [1, 1]} : vector<4x64xf32> to vector<4x16xf32>
    %229 = vector.extract_strided_slice %175 {offsets = [0, 48], sizes = [4, 16], strides = [1, 1]} : vector<4x64xf32> to vector<4x16xf32>
    %230 = vector.extract_strided_slice %176 {offsets = [0, 48], sizes = [4, 16], strides = [1, 1]} : vector<4x64xf32> to vector<4x16xf32>
    "tpu.trace_start"() <{level = 10 : i32, message = "qd,kd->qk"}> : () -> ()
    %cst_69 = arith.constant dense<0.000000e+00> : vector<4x4xf32>
    %231 = tpu.matmul %228, %229, %cst_69 {dimension_numbers = #tpu.dot_dimension_numbers<[1], [1], [0], [0], [0, 0, 1, 0], [], []>} : vector<4x16xf32>, vector<4x16xf32>, vector<4x4xf32> -> vector<4x4xf32>
    "tpu.trace_stop"() : () -> ()
    %cst_70 = arith.constant 2.500000e-01 : f32
    %232 = vector.broadcast %cst_70 : f32 to vector<4x4xf32>
    %233 = arith.mulf %231, %232 : vector<4x4xf32>
    %cst_71 = arith.constant dense<0xFF800000> : vector<4xf32>
    %234 = vector.multi_reduction <maximumf>, %233, %cst_71 [1] : vector<4x4xf32> to vector<4xf32>
    %235 = vector.shape_cast %234 : vector<4xf32> to vector<4x1xf32>
    %236 = vector.broadcast %235 : vector<4x1xf32> to vector<4x4xf32>
    %237 = arith.subf %233, %236 : vector<4x4xf32>
    %238 = math.exp %237 : vector<4x4xf32>
    %cst_72 = arith.constant dense<0.000000e+00> : vector<4xf32>
    %239 = vector.multi_reduction <add>, %238, %cst_72 [1] : vector<4x4xf32> to vector<4xf32>
    %240 = vector.shape_cast %239 : vector<4xf32> to vector<4x1xf32>
    %241 = tpu.reciprocal %240 {approx = true} : vector<4x1xf32> -> vector<4x1xf32>
    %242 = vector.broadcast %241 : vector<4x1xf32> to vector<4x4xf32>
    %243 = arith.mulf %238, %242 : vector<4x4xf32>
    %cst_73 = arith.constant dense<0.000000e+00> : vector<4x16xf32>
    %244 = tpu.matmul %243, %230, %cst_73 {dimension_numbers = #tpu.dot_dimension_numbers<[1], [0], [0], [1], [0, 0, 1, 1], [], []>} : vector<4x4xf32>, vector<4x16xf32>, vector<4x16xf32> -> vector<4x16xf32>
    %245 = tpu.concatenate %193, %210, %227, %244 in 1 : vector<4x16xf32>, vector<4x16xf32>, vector<4x16xf32>, vector<4x16xf32> -> vector<4x64xf32>
    %246 = vector.extract_strided_slice %29 {offsets = [12, 0], sizes = [4, 64], strides = [1, 1]} : vector<16x192xf32> to vector<4x64xf32>
    %247 = vector.extract_strided_slice %29 {offsets = [12, 64], sizes = [4, 64], strides = [1, 1]} : vector<16x192xf32> to vector<4x64xf32>
    %248 = vector.extract_strided_slice %29 {offsets = [12, 128], sizes = [4, 64], strides = [1, 1]} : vector<16x192xf32> to vector<4x64xf32>
    %249 = vector.extract_strided_slice %246 {offsets = [0, 0], sizes = [4, 16], strides = [1, 1]} : vector<4x64xf32> to vector<4x16xf32>
    %250 = vector.extract_strided_slice %247 {offsets = [0, 0], sizes = [4, 16], strides = [1, 1]} : vector<4x64xf32> to vector<4x16xf32>
    %251 = vector.extract_strided_slice %248 {offsets = [0, 0], sizes = [4, 16], strides = [1, 1]} : vector<4x64xf32> to vector<4x16xf32>
    "tpu.trace_start"() <{level = 10 : i32, message = "qd,kd->qk"}> : () -> ()
    %cst_74 = arith.constant dense<0.000000e+00> : vector<4x4xf32>
    %252 = tpu.matmul %249, %250, %cst_74 {dimension_numbers = #tpu.dot_dimension_numbers<[1], [1], [0], [0], [0, 0, 1, 0], [], []>} : vector<4x16xf32>, vector<4x16xf32>, vector<4x4xf32> -> vector<4x4xf32>
    "tpu.trace_stop"() : () -> ()
    %cst_75 = arith.constant 2.500000e-01 : f32
    %253 = vector.broadcast %cst_75 : f32 to vector<4x4xf32>
    %254 = arith.mulf %252, %253 : vector<4x4xf32>
    %cst_76 = arith.constant dense<0xFF800000> : vector<4xf32>
    %255 = vector.multi_reduction <maximumf>, %254, %cst_76 [1] : vector<4x4xf32> to vector<4xf32>
    %256 = vector.shape_cast %255 : vector<4xf32> to vector<4x1xf32>
    %257 = vector.broadcast %256 : vector<4x1xf32> to vector<4x4xf32>
    %258 = arith.subf %254, %257 : vector<4x4xf32>
    %259 = math.exp %258 : vector<4x4xf32>
    %cst_77 = arith.constant dense<0.000000e+00> : vector<4xf32>
    %260 = vector.multi_reduction <add>, %259, %cst_77 [1] : vector<4x4xf32> to vector<4xf32>
    %261 = vector.shape_cast %260 : vector<4xf32> to vector<4x1xf32>
    %262 = tpu.reciprocal %261 {approx = true} : vector<4x1xf32> -> vector<4x1xf32>
    %263 = vector.broadcast %262 : vector<4x1xf32> to vector<4x4xf32>
    %264 = arith.mulf %259, %263 : vector<4x4xf32>
    %cst_78 = arith.constant dense<0.000000e+00> : vector<4x16xf32>
    %265 = tpu.matmul %264, %251, %cst_78 {dimension_numbers = #tpu.dot_dimension_numbers<[1], [0], [0], [1], [0, 0, 1, 1], [], []>} : vector<4x4xf32>, vector<4x16xf32>, vector<4x16xf32> -> vector<4x16xf32>
    %266 = vector.extract_strided_slice %246 {offsets = [0, 16], sizes = [4, 16], strides = [1, 1]} : vector<4x64xf32> to vector<4x16xf32>
    %267 = vector.extract_strided_slice %247 {offsets = [0, 16], sizes = [4, 16], strides = [1, 1]} : vector<4x64xf32> to vector<4x16xf32>
    %268 = vector.extract_strided_slice %248 {offsets = [0, 16], sizes = [4, 16], strides = [1, 1]} : vector<4x64xf32> to vector<4x16xf32>
    "tpu.trace_start"() <{level = 10 : i32, message = "qd,kd->qk"}> : () -> ()
    %cst_79 = arith.constant dense<0.000000e+00> : vector<4x4xf32>
    %269 = tpu.matmul %266, %267, %cst_79 {dimension_numbers = #tpu.dot_dimension_numbers<[1], [1], [0], [0], [0, 0, 1, 0], [], []>} : vector<4x16xf32>, vector<4x16xf32>, vector<4x4xf32> -> vector<4x4xf32>
    "tpu.trace_stop"() : () -> ()
    %cst_80 = arith.constant 2.500000e-01 : f32
    %270 = vector.broadcast %cst_80 : f32 to vector<4x4xf32>
    %271 = arith.mulf %269, %270 : vector<4x4xf32>
    %cst_81 = arith.constant dense<0xFF800000> : vector<4xf32>
    %272 = vector.multi_reduction <maximumf>, %271, %cst_81 [1] : vector<4x4xf32> to vector<4xf32>
    %273 = vector.shape_cast %272 : vector<4xf32> to vector<4x1xf32>
    %274 = vector.broadcast %273 : vector<4x1xf32> to vector<4x4xf32>
    %275 = arith.subf %271, %274 : vector<4x4xf32>
    %276 = math.exp %275 : vector<4x4xf32>
    %cst_82 = arith.constant dense<0.000000e+00> : vector<4xf32>
    %277 = vector.multi_reduction <add>, %276, %cst_82 [1] : vector<4x4xf32> to vector<4xf32>
    %278 = vector.shape_cast %277 : vector<4xf32> to vector<4x1xf32>
    %279 = tpu.reciprocal %278 {approx = true} : vector<4x1xf32> -> vector<4x1xf32>
    %280 = vector.broadcast %279 : vector<4x1xf32> to vector<4x4xf32>
    %281 = arith.mulf %276, %280 : vector<4x4xf32>
    %cst_83 = arith.constant dense<0.000000e+00> : vector<4x16xf32>
    %282 = tpu.matmul %281, %268, %cst_83 {dimension_numbers = #tpu.dot_dimension_numbers<[1], [0], [0], [1], [0, 0, 1, 1], [], []>} : vector<4x4xf32>, vector<4x16xf32>, vector<4x16xf32> -> vector<4x16xf32>
    %283 = vector.extract_strided_slice %246 {offsets = [0, 32], sizes = [4, 16], strides = [1, 1]} : vector<4x64xf32> to vector<4x16xf32>
    %284 = vector.extract_strided_slice %247 {offsets = [0, 32], sizes = [4, 16], strides = [1, 1]} : vector<4x64xf32> to vector<4x16xf32>
    %285 = vector.extract_strided_slice %248 {offsets = [0, 32], sizes = [4, 16], strides = [1, 1]} : vector<4x64xf32> to vector<4x16xf32>
    "tpu.trace_start"() <{level = 10 : i32, message = "qd,kd->qk"}> : () -> ()
    %cst_84 = arith.constant dense<0.000000e+00> : vector<4x4xf32>
    %286 = tpu.matmul %283, %284, %cst_84 {dimension_numbers = #tpu.dot_dimension_numbers<[1], [1], [0], [0], [0, 0, 1, 0], [], []>} : vector<4x16xf32>, vector<4x16xf32>, vector<4x4xf32> -> vector<4x4xf32>
    "tpu.trace_stop"() : () -> ()
    %cst_85 = arith.constant 2.500000e-01 : f32
    %287 = vector.broadcast %cst_85 : f32 to vector<4x4xf32>
    %288 = arith.mulf %286, %287 : vector<4x4xf32>
    %cst_86 = arith.constant dense<0xFF800000> : vector<4xf32>
    %289 = vector.multi_reduction <maximumf>, %288, %cst_86 [1] : vector<4x4xf32> to vector<4xf32>
    %290 = vector.shape_cast %289 : vector<4xf32> to vector<4x1xf32>
    %291 = vector.broadcast %290 : vector<4x1xf32> to vector<4x4xf32>
    %292 = arith.subf %288, %291 : vector<4x4xf32>
    %293 = math.exp %292 : vector<4x4xf32>
    %cst_87 = arith.constant dense<0.000000e+00> : vector<4xf32>
    %294 = vector.multi_reduction <add>, %293, %cst_87 [1] : vector<4x4xf32> to vector<4xf32>
    %295 = vector.shape_cast %294 : vector<4xf32> to vector<4x1xf32>
    %296 = tpu.reciprocal %295 {approx = true} : vector<4x1xf32> -> vector<4x1xf32>
    %297 = vector.broadcast %296 : vector<4x1xf32> to vector<4x4xf32>
    %298 = arith.mulf %293, %297 : vector<4x4xf32>
    %cst_88 = arith.constant dense<0.000000e+00> : vector<4x16xf32>
    %299 = tpu.matmul %298, %285, %cst_88 {dimension_numbers = #tpu.dot_dimension_numbers<[1], [0], [0], [1], [0, 0, 1, 1], [], []>} : vector<4x4xf32>, vector<4x16xf32>, vector<4x16xf32> -> vector<4x16xf32>
    %300 = vector.extract_strided_slice %246 {offsets = [0, 48], sizes = [4, 16], strides = [1, 1]} : vector<4x64xf32> to vector<4x16xf32>
    %301 = vector.extract_strided_slice %247 {offsets = [0, 48], sizes = [4, 16], strides = [1, 1]} : vector<4x64xf32> to vector<4x16xf32>
    %302 = vector.extract_strided_slice %248 {offsets = [0, 48], sizes = [4, 16], strides = [1, 1]} : vector<4x64xf32> to vector<4x16xf32>
    "tpu.trace_start"() <{level = 10 : i32, message = "qd,kd->qk"}> : () -> ()
    %cst_89 = arith.constant dense<0.000000e+00> : vector<4x4xf32>
    %303 = tpu.matmul %300, %301, %cst_89 {dimension_numbers = #tpu.dot_dimension_numbers<[1], [1], [0], [0], [0, 0, 1, 0], [], []>} : vector<4x16xf32>, vector<4x16xf32>, vector<4x4xf32> -> vector<4x4xf32>
    "tpu.trace_stop"() : () -> ()
    %cst_90 = arith.constant 2.500000e-01 : f32
    %304 = vector.broadcast %cst_90 : f32 to vector<4x4xf32>
    %305 = arith.mulf %303, %304 : vector<4x4xf32>
    %cst_91 = arith.constant dense<0xFF800000> : vector<4xf32>
    %306 = vector.multi_reduction <maximumf>, %305, %cst_91 [1] : vector<4x4xf32> to vector<4xf32>
    %307 = vector.shape_cast %306 : vector<4xf32> to vector<4x1xf32>
    %308 = vector.broadcast %307 : vector<4x1xf32> to vector<4x4xf32>
    %309 = arith.subf %305, %308 : vector<4x4xf32>
    %310 = math.exp %309 : vector<4x4xf32>
    %cst_92 = arith.constant dense<0.000000e+00> : vector<4xf32>
    %311 = vector.multi_reduction <add>, %310, %cst_92 [1] : vector<4x4xf32> to vector<4xf32>
    %312 = vector.shape_cast %311 : vector<4xf32> to vector<4x1xf32>
    %313 = tpu.reciprocal %312 {approx = true} : vector<4x1xf32> -> vector<4x1xf32>
    %314 = vector.broadcast %313 : vector<4x1xf32> to vector<4x4xf32>
    %315 = arith.mulf %310, %314 : vector<4x4xf32>
    %cst_93 = arith.constant dense<0.000000e+00> : vector<4x16xf32>
    %316 = tpu.matmul %315, %302, %cst_93 {dimension_numbers = #tpu.dot_dimension_numbers<[1], [0], [0], [1], [0, 0, 1, 1], [], []>} : vector<4x4xf32>, vector<4x16xf32>, vector<4x16xf32> -> vector<4x16xf32>
    %317 = tpu.concatenate %265, %282, %299, %316 in 1 : vector<4x16xf32>, vector<4x16xf32>, vector<4x16xf32>, vector<4x16xf32> -> vector<4x64xf32>
    %318 = tpu.concatenate %101, %173, %245, %317 in 0 : vector<4x64xf32>, vector<4x64xf32>, vector<4x64xf32>, vector<4x64xf32> -> vector<16x64xf32>
    %cst_94 = arith.constant dense<0.000000e+00> : vector<16x64xf32>
    %319 = tpu.matmul %318, %25, %cst_94 {dimension_numbers = #tpu.dot_dimension_numbers<[1], [0], [0], [1], [0, 0, 1, 1], [], []>} : vector<16x64xf32>, vector<64x64xf32>, vector<16x64xf32> -> vector<16x64xf32>
    %320 = vector.broadcast %26 : vector<1x64xf32> to vector<16x64xf32>
    %321 = arith.addf %319, %320 : vector<16x64xf32>
    %322 = vector.extract_strided_slice %321 {offsets = [0, 0], sizes = [1, 64], strides = [1, 1]} : vector<16x64xf32> to vector<1x64xf32>
    %323 = vector.extract_strided_slice %321 {offsets = [8, 0], sizes = [1, 64], strides = [1, 1]} : vector<16x64xf32> to vector<1x64xf32>
    %324 = vector.extract_strided_slice %321 {offsets = [1, 0], sizes = [1, 64], strides = [1, 1]} : vector<16x64xf32> to vector<1x64xf32>
    %325 = vector.extract_strided_slice %321 {offsets = [9, 0], sizes = [1, 64], strides = [1, 1]} : vector<16x64xf32> to vector<1x64xf32>
    %326 = vector.extract_strided_slice %321 {offsets = [2, 0], sizes = [1, 64], strides = [1, 1]} : vector<16x64xf32> to vector<1x64xf32>
    %327 = vector.extract_strided_slice %321 {offsets = [10, 0], sizes = [1, 64], strides = [1, 1]} : vector<16x64xf32> to vector<1x64xf32>
    %328 = vector.extract_strided_slice %321 {offsets = [3, 0], sizes = [1, 64], strides = [1, 1]} : vector<16x64xf32> to vector<1x64xf32>
    %329 = vector.extract_strided_slice %321 {offsets = [11, 0], sizes = [1, 64], strides = [1, 1]} : vector<16x64xf32> to vector<1x64xf32>
    %330 = tpu.concatenate %322, %323, %324, %325, %326, %327, %328, %329 in 1 : vector<1x64xf32>, vector<1x64xf32>, vector<1x64xf32>, vector<1x64xf32>, vector<1x64xf32>, vector<1x64xf32>, vector<1x64xf32>, vector<1x64xf32> -> vector<1x512xf32>
    %331 = vector.extract_strided_slice %321 {offsets = [4, 0], sizes = [1, 64], strides = [1, 1]} : vector<16x64xf32> to vector<1x64xf32>
    %332 = vector.extract_strided_slice %321 {offsets = [12, 0], sizes = [1, 64], strides = [1, 1]} : vector<16x64xf32> to vector<1x64xf32>
    %333 = vector.extract_strided_slice %321 {offsets = [5, 0], sizes = [1, 64], strides = [1, 1]} : vector<16x64xf32> to vector<1x64xf32>
    %334 = vector.extract_strided_slice %321 {offsets = [13, 0], sizes = [1, 64], strides = [1, 1]} : vector<16x64xf32> to vector<1x64xf32>
    %335 = vector.extract_strided_slice %321 {offsets = [6, 0], sizes = [1, 64], strides = [1, 1]} : vector<16x64xf32> to vector<1x64xf32>
    %336 = vector.extract_strided_slice %321 {offsets = [14, 0], sizes = [1, 64], strides = [1, 1]} : vector<16x64xf32> to vector<1x64xf32>
    %337 = vector.extract_strided_slice %321 {offsets = [7, 0], sizes = [1, 64], strides = [1, 1]} : vector<16x64xf32> to vector<1x64xf32>
    %338 = vector.extract_strided_slice %321 {offsets = [15, 0], sizes = [1, 64], strides = [1, 1]} : vector<16x64xf32> to vector<1x64xf32>
    %339 = tpu.concatenate %331, %332, %333, %334, %335, %336, %337, %338 in 1 : vector<1x64xf32>, vector<1x64xf32>, vector<1x64xf32>, vector<1x64xf32>, vector<1x64xf32>, vector<1x64xf32>, vector<1x64xf32>, vector<1x64xf32> -> vector<1x512xf32>
    %340 = tpu.concatenate %330, %339 in 0 : vector<1x512xf32>, vector<1x512xf32> -> vector<2x512xf32>
    %c0_95 = arith.constant 0 : index
    %c0_96 = arith.constant 0 : index
    %341 = vector.load %arg7[%c0_95, %c0_96] : memref<512x256xf32, #tpu.memory_space<vmem>>, vector<512x256xf32>
    %cst_97 = arith.constant dense<0.000000e+00> : vector<2x256xf32>
    %342 = tpu.matmul %340, %341, %cst_97 {dimension_numbers = #tpu.dot_dimension_numbers<[1], [0], [0], [1], [0, 0, 1, 1], [], []>} : vector<2x512xf32>, vector<512x256xf32>, vector<2x256xf32> -> vector<2x256xf32>
    %c0_98 = arith.constant 0 : index
    %c0_99 = arith.constant 0 : index
    %343 = vector.load %arg8[%c0_98, %c0_99] : memref<1x256xf32, #tpu.memory_space<vmem>>, vector<1x256xf32>
    %344 = vector.broadcast %343 : vector<1x256xf32> to vector<2x256xf32>
    %345 = arith.addf %342, %344 : vector<2x256xf32>
    %346 = vector.extract_strided_slice %345 {offsets = [0, 0], sizes = [1, 64], strides = [1, 1]} : vector<2x256xf32> to vector<1x64xf32>
    %347 = vector.extract_strided_slice %345 {offsets = [0, 64], sizes = [1, 64], strides = [1, 1]} : vector<2x256xf32> to vector<1x64xf32>
    %348 = vector.extract_strided_slice %345 {offsets = [0, 128], sizes = [1, 64], strides = [1, 1]} : vector<2x256xf32> to vector<1x64xf32>
    %349 = vector.extract_strided_slice %345 {offsets = [0, 192], sizes = [1, 64], strides = [1, 1]} : vector<2x256xf32> to vector<1x64xf32>
    %350 = vector.extract_strided_slice %345 {offsets = [1, 0], sizes = [1, 64], strides = [1, 1]} : vector<2x256xf32> to vector<1x64xf32>
    %351 = vector.extract_strided_slice %345 {offsets = [1, 64], sizes = [1, 64], strides = [1, 1]} : vector<2x256xf32> to vector<1x64xf32>
    %352 = vector.extract_strided_slice %345 {offsets = [1, 128], sizes = [1, 64], strides = [1, 1]} : vector<2x256xf32> to vector<1x64xf32>
    %353 = vector.extract_strided_slice %345 {offsets = [1, 192], sizes = [1, 64], strides = [1, 1]} : vector<2x256xf32> to vector<1x64xf32>
    %354 = tpu.concatenate %346, %347, %348, %349, %350, %351, %352, %353 in 0 : vector<1x64xf32>, vector<1x64xf32>, vector<1x64xf32>, vector<1x64xf32>, vector<1x64xf32>, vector<1x64xf32>, vector<1x64xf32>, vector<1x64xf32> -> vector<8x64xf32>
    %c0_100 = arith.constant 0 : index
    %c0_101 = arith.constant 0 : index
    %355 = vector.load %arg9[%c0_100, %c0_101] : memref<1x64xf32, #tpu.memory_space<vmem>>, vector<1x64xf32>
    %c0_102 = arith.constant 0 : index
    %c0_103 = arith.constant 0 : index
    %356 = vector.load %arg10[%c0_102, %c0_103] : memref<1x64xf32, #tpu.memory_space<vmem>>, vector<1x64xf32>
    %cst_104 = arith.constant dense<0.000000e+00> : vector<8xf32>
    %357 = vector.multi_reduction <add>, %354, %cst_104 [1] : vector<8x64xf32> to vector<8xf32>
    %358 = vector.shape_cast %357 : vector<8xf32> to vector<8x1xf32>
    %cst_105 = arith.constant 6.400000e+01 : f32
    %359 = vector.broadcast %cst_105 : f32 to vector<8x1xf32>
    %360 = arith.divf %358, %359 : vector<8x1xf32>
    %361 = vector.broadcast %360 : vector<8x1xf32> to vector<8x64xf32>
    %362 = arith.subf %354, %361 : vector<8x64xf32>
    %363 = arith.mulf %362, %362 : vector<8x64xf32>
    %cst_106 = arith.constant dense<0.000000e+00> : vector<8xf32>
    %364 = vector.multi_reduction <add>, %363, %cst_106 [1] : vector<8x64xf32> to vector<8xf32>
    %365 = vector.shape_cast %364 : vector<8xf32> to vector<8x1xf32>
    %cst_107 = arith.constant 6.400000e+01 : f32
    %366 = vector.broadcast %cst_107 : f32 to vector<8x1xf32>
    %367 = arith.divf %365, %366 : vector<8x1xf32>
    %cst_108 = arith.constant 9.99999974E-6 : f32
    %368 = vector.broadcast %cst_108 : f32 to vector<8x1xf32>
    %369 = arith.addf %367, %368 : vector<8x1xf32>
    %370 = math.rsqrt %369 : vector<8x1xf32>
    %371 = vector.broadcast %370 : vector<8x1xf32> to vector<8x64xf32>
    %372 = arith.mulf %362, %371 : vector<8x64xf32>
    %373 = vector.broadcast %355 : vector<1x64xf32> to vector<8x64xf32>
    %374 = arith.mulf %372, %373 : vector<8x64xf32>
    %375 = vector.broadcast %356 : vector<1x64xf32> to vector<8x64xf32>
    %376 = arith.addf %374, %375 : vector<8x64xf32>
    %c0_109 = arith.constant 0 : index
    %c0_110 = arith.constant 0 : index
    %377 = vector.load %arg11[%c0_109, %c0_110] : memref<64x192xf32, #tpu.memory_space<vmem>>, vector<64x192xf32>
    %c0_111 = arith.constant 0 : index
    %c0_112 = arith.constant 0 : index
    %378 = vector.load %arg12[%c0_111, %c0_112] : memref<1x192xf32, #tpu.memory_space<vmem>>, vector<1x192xf32>
    %c0_113 = arith.constant 0 : index
    %c0_114 = arith.constant 0 : index
    %379 = vector.load %arg13[%c0_113, %c0_114] : memref<64x64xf32, #tpu.memory_space<vmem>>, vector<64x64xf32>
    %c0_115 = arith.constant 0 : index
    %c0_116 = arith.constant 0 : index
    %380 = vector.load %arg14[%c0_115, %c0_116] : memref<1x64xf32, #tpu.memory_space<vmem>>, vector<1x64xf32>
    %cst_117 = arith.constant dense<0.000000e+00> : vector<8x192xf32>
    %381 = tpu.matmul %376, %377, %cst_117 {dimension_numbers = #tpu.dot_dimension_numbers<[1], [0], [0], [1], [0, 0, 1, 1], [], []>} : vector<8x64xf32>, vector<64x192xf32>, vector<8x192xf32> -> vector<8x192xf32>
    %382 = vector.broadcast %378 : vector<1x192xf32> to vector<8x192xf32>
    %383 = arith.addf %381, %382 : vector<8x192xf32>
    %384 = vector.extract_strided_slice %383 {offsets = [0, 0], sizes = [4, 64], strides = [1, 1]} : vector<8x192xf32> to vector<4x64xf32>
    %385 = vector.extract_strided_slice %383 {offsets = [0, 64], sizes = [4, 64], strides = [1, 1]} : vector<8x192xf32> to vector<4x64xf32>
    %386 = vector.extract_strided_slice %383 {offsets = [0, 128], sizes = [4, 64], strides = [1, 1]} : vector<8x192xf32> to vector<4x64xf32>
    %387 = vector.extract_strided_slice %384 {offsets = [0, 0], sizes = [4, 16], strides = [1, 1]} : vector<4x64xf32> to vector<4x16xf32>
    %388 = vector.extract_strided_slice %385 {offsets = [0, 0], sizes = [4, 16], strides = [1, 1]} : vector<4x64xf32> to vector<4x16xf32>
    %389 = vector.extract_strided_slice %386 {offsets = [0, 0], sizes = [4, 16], strides = [1, 1]} : vector<4x64xf32> to vector<4x16xf32>
    "tpu.trace_start"() <{level = 10 : i32, message = "qd,kd->qk"}> : () -> ()
    %cst_118 = arith.constant dense<0.000000e+00> : vector<4x4xf32>
    %390 = tpu.matmul %387, %388, %cst_118 {dimension_numbers = #tpu.dot_dimension_numbers<[1], [1], [0], [0], [0, 0, 1, 0], [], []>} : vector<4x16xf32>, vector<4x16xf32>, vector<4x4xf32> -> vector<4x4xf32>
    "tpu.trace_stop"() : () -> ()
    %cst_119 = arith.constant 2.500000e-01 : f32
    %391 = vector.broadcast %cst_119 : f32 to vector<4x4xf32>
    %392 = arith.mulf %390, %391 : vector<4x4xf32>
    %cst_120 = arith.constant dense<0xFF800000> : vector<4xf32>
    %393 = vector.multi_reduction <maximumf>, %392, %cst_120 [1] : vector<4x4xf32> to vector<4xf32>
    %394 = vector.shape_cast %393 : vector<4xf32> to vector<4x1xf32>
    %395 = vector.broadcast %394 : vector<4x1xf32> to vector<4x4xf32>
    %396 = arith.subf %392, %395 : vector<4x4xf32>
    %397 = math.exp %396 : vector<4x4xf32>
    %cst_121 = arith.constant dense<0.000000e+00> : vector<4xf32>
    %398 = vector.multi_reduction <add>, %397, %cst_121 [1] : vector<4x4xf32> to vector<4xf32>
    %399 = vector.shape_cast %398 : vector<4xf32> to vector<4x1xf32>
    %400 = tpu.reciprocal %399 {approx = true} : vector<4x1xf32> -> vector<4x1xf32>
    %401 = vector.broadcast %400 : vector<4x1xf32> to vector<4x4xf32>
    %402 = arith.mulf %397, %401 : vector<4x4xf32>
    %cst_122 = arith.constant dense<0.000000e+00> : vector<4x16xf32>
    %403 = tpu.matmul %402, %389, %cst_122 {dimension_numbers = #tpu.dot_dimension_numbers<[1], [0], [0], [1], [0, 0, 1, 1], [], []>} : vector<4x4xf32>, vector<4x16xf32>, vector<4x16xf32> -> vector<4x16xf32>
    %404 = vector.extract_strided_slice %384 {offsets = [0, 16], sizes = [4, 16], strides = [1, 1]} : vector<4x64xf32> to vector<4x16xf32>
    %405 = vector.extract_strided_slice %385 {offsets = [0, 16], sizes = [4, 16], strides = [1, 1]} : vector<4x64xf32> to vector<4x16xf32>
    %406 = vector.extract_strided_slice %386 {offsets = [0, 16], sizes = [4, 16], strides = [1, 1]} : vector<4x64xf32> to vector<4x16xf32>
    "tpu.trace_start"() <{level = 10 : i32, message = "qd,kd->qk"}> : () -> ()
    %cst_123 = arith.constant dense<0.000000e+00> : vector<4x4xf32>
    %407 = tpu.matmul %404, %405, %cst_123 {dimension_numbers = #tpu.dot_dimension_numbers<[1], [1], [0], [0], [0, 0, 1, 0], [], []>} : vector<4x16xf32>, vector<4x16xf32>, vector<4x4xf32> -> vector<4x4xf32>
    "tpu.trace_stop"() : () -> ()
    %cst_124 = arith.constant 2.500000e-01 : f32
    %408 = vector.broadcast %cst_124 : f32 to vector<4x4xf32>
    %409 = arith.mulf %407, %408 : vector<4x4xf32>
    %cst_125 = arith.constant dense<0xFF800000> : vector<4xf32>
    %410 = vector.multi_reduction <maximumf>, %409, %cst_125 [1] : vector<4x4xf32> to vector<4xf32>
    %411 = vector.shape_cast %410 : vector<4xf32> to vector<4x1xf32>
    %412 = vector.broadcast %411 : vector<4x1xf32> to vector<4x4xf32>
    %413 = arith.subf %409, %412 : vector<4x4xf32>
    %414 = math.exp %413 : vector<4x4xf32>
    %cst_126 = arith.constant dense<0.000000e+00> : vector<4xf32>
    %415 = vector.multi_reduction <add>, %414, %cst_126 [1] : vector<4x4xf32> to vector<4xf32>
    %416 = vector.shape_cast %415 : vector<4xf32> to vector<4x1xf32>
    %417 = tpu.reciprocal %416 {approx = true} : vector<4x1xf32> -> vector<4x1xf32>
    %418 = vector.broadcast %417 : vector<4x1xf32> to vector<4x4xf32>
    %419 = arith.mulf %414, %418 : vector<4x4xf32>
    %cst_127 = arith.constant dense<0.000000e+00> : vector<4x16xf32>
    %420 = tpu.matmul %419, %406, %cst_127 {dimension_numbers = #tpu.dot_dimension_numbers<[1], [0], [0], [1], [0, 0, 1, 1], [], []>} : vector<4x4xf32>, vector<4x16xf32>, vector<4x16xf32> -> vector<4x16xf32>
    %421 = vector.extract_strided_slice %384 {offsets = [0, 32], sizes = [4, 16], strides = [1, 1]} : vector<4x64xf32> to vector<4x16xf32>
    %422 = vector.extract_strided_slice %385 {offsets = [0, 32], sizes = [4, 16], strides = [1, 1]} : vector<4x64xf32> to vector<4x16xf32>
    %423 = vector.extract_strided_slice %386 {offsets = [0, 32], sizes = [4, 16], strides = [1, 1]} : vector<4x64xf32> to vector<4x16xf32>
    "tpu.trace_start"() <{level = 10 : i32, message = "qd,kd->qk"}> : () -> ()
    %cst_128 = arith.constant dense<0.000000e+00> : vector<4x4xf32>
    %424 = tpu.matmul %421, %422, %cst_128 {dimension_numbers = #tpu.dot_dimension_numbers<[1], [1], [0], [0], [0, 0, 1, 0], [], []>} : vector<4x16xf32>, vector<4x16xf32>, vector<4x4xf32> -> vector<4x4xf32>
    "tpu.trace_stop"() : () -> ()
    %cst_129 = arith.constant 2.500000e-01 : f32
    %425 = vector.broadcast %cst_129 : f32 to vector<4x4xf32>
    %426 = arith.mulf %424, %425 : vector<4x4xf32>
    %cst_130 = arith.constant dense<0xFF800000> : vector<4xf32>
    %427 = vector.multi_reduction <maximumf>, %426, %cst_130 [1] : vector<4x4xf32> to vector<4xf32>
    %428 = vector.shape_cast %427 : vector<4xf32> to vector<4x1xf32>
    %429 = vector.broadcast %428 : vector<4x1xf32> to vector<4x4xf32>
    %430 = arith.subf %426, %429 : vector<4x4xf32>
    %431 = math.exp %430 : vector<4x4xf32>
    %cst_131 = arith.constant dense<0.000000e+00> : vector<4xf32>
    %432 = vector.multi_reduction <add>, %431, %cst_131 [1] : vector<4x4xf32> to vector<4xf32>
    %433 = vector.shape_cast %432 : vector<4xf32> to vector<4x1xf32>
    %434 = tpu.reciprocal %433 {approx = true} : vector<4x1xf32> -> vector<4x1xf32>
    %435 = vector.broadcast %434 : vector<4x1xf32> to vector<4x4xf32>
    %436 = arith.mulf %431, %435 : vector<4x4xf32>
    %cst_132 = arith.constant dense<0.000000e+00> : vector<4x16xf32>
    %437 = tpu.matmul %436, %423, %cst_132 {dimension_numbers = #tpu.dot_dimension_numbers<[1], [0], [0], [1], [0, 0, 1, 1], [], []>} : vector<4x4xf32>, vector<4x16xf32>, vector<4x16xf32> -> vector<4x16xf32>
    %438 = vector.extract_strided_slice %384 {offsets = [0, 48], sizes = [4, 16], strides = [1, 1]} : vector<4x64xf32> to vector<4x16xf32>
    %439 = vector.extract_strided_slice %385 {offsets = [0, 48], sizes = [4, 16], strides = [1, 1]} : vector<4x64xf32> to vector<4x16xf32>
    %440 = vector.extract_strided_slice %386 {offsets = [0, 48], sizes = [4, 16], strides = [1, 1]} : vector<4x64xf32> to vector<4x16xf32>
    "tpu.trace_start"() <{level = 10 : i32, message = "qd,kd->qk"}> : () -> ()
    %cst_133 = arith.constant dense<0.000000e+00> : vector<4x4xf32>
    %441 = tpu.matmul %438, %439, %cst_133 {dimension_numbers = #tpu.dot_dimension_numbers<[1], [1], [0], [0], [0, 0, 1, 0], [], []>} : vector<4x16xf32>, vector<4x16xf32>, vector<4x4xf32> -> vector<4x4xf32>
    "tpu.trace_stop"() : () -> ()
    %cst_134 = arith.constant 2.500000e-01 : f32
    %442 = vector.broadcast %cst_134 : f32 to vector<4x4xf32>
    %443 = arith.mulf %441, %442 : vector<4x4xf32>
    %cst_135 = arith.constant dense<0xFF800000> : vector<4xf32>
    %444 = vector.multi_reduction <maximumf>, %443, %cst_135 [1] : vector<4x4xf32> to vector<4xf32>
    %445 = vector.shape_cast %444 : vector<4xf32> to vector<4x1xf32>
    %446 = vector.broadcast %445 : vector<4x1xf32> to vector<4x4xf32>
    %447 = arith.subf %443, %446 : vector<4x4xf32>
    %448 = math.exp %447 : vector<4x4xf32>
    %cst_136 = arith.constant dense<0.000000e+00> : vector<4xf32>
    %449 = vector.multi_reduction <add>, %448, %cst_136 [1] : vector<4x4xf32> to vector<4xf32>
    %450 = vector.shape_cast %449 : vector<4xf32> to vector<4x1xf32>
    %451 = tpu.reciprocal %450 {approx = true} : vector<4x1xf32> -> vector<4x1xf32>
    %452 = vector.broadcast %451 : vector<4x1xf32> to vector<4x4xf32>
    %453 = arith.mulf %448, %452 : vector<4x4xf32>
    %cst_137 = arith.constant dense<0.000000e+00> : vector<4x16xf32>
    %454 = tpu.matmul %453, %440, %cst_137 {dimension_numbers = #tpu.dot_dimension_numbers<[1], [0], [0], [1], [0, 0, 1, 1], [], []>} : vector<4x4xf32>, vector<4x16xf32>, vector<4x16xf32> -> vector<4x16xf32>
    %455 = tpu.concatenate %403, %420, %437, %454 in 1 : vector<4x16xf32>, vector<4x16xf32>, vector<4x16xf32>, vector<4x16xf32> -> vector<4x64xf32>
    %456 = vector.extract_strided_slice %383 {offsets = [4, 0], sizes = [4, 64], strides = [1, 1]} : vector<8x192xf32> to vector<4x64xf32>
    %457 = vector.extract_strided_slice %383 {offsets = [4, 64], sizes = [4, 64], strides = [1, 1]} : vector<8x192xf32> to vector<4x64xf32>
    %458 = vector.extract_strided_slice %383 {offsets = [4, 128], sizes = [4, 64], strides = [1, 1]} : vector<8x192xf32> to vector<4x64xf32>
    %459 = vector.extract_strided_slice %456 {offsets = [0, 0], sizes = [4, 16], strides = [1, 1]} : vector<4x64xf32> to vector<4x16xf32>
    %460 = vector.extract_strided_slice %457 {offsets = [0, 0], sizes = [4, 16], strides = [1, 1]} : vector<4x64xf32> to vector<4x16xf32>
    %461 = vector.extract_strided_slice %458 {offsets = [0, 0], sizes = [4, 16], strides = [1, 1]} : vector<4x64xf32> to vector<4x16xf32>
    "tpu.trace_start"() <{level = 10 : i32, message = "qd,kd->qk"}> : () -> ()
    %cst_138 = arith.constant dense<0.000000e+00> : vector<4x4xf32>
    %462 = tpu.matmul %459, %460, %cst_138 {dimension_numbers = #tpu.dot_dimension_numbers<[1], [1], [0], [0], [0, 0, 1, 0], [], []>} : vector<4x16xf32>, vector<4x16xf32>, vector<4x4xf32> -> vector<4x4xf32>
    "tpu.trace_stop"() : () -> ()
    %cst_139 = arith.constant 2.500000e-01 : f32
    %463 = vector.broadcast %cst_139 : f32 to vector<4x4xf32>
    %464 = arith.mulf %462, %463 : vector<4x4xf32>
    %cst_140 = arith.constant dense<0xFF800000> : vector<4xf32>
    %465 = vector.multi_reduction <maximumf>, %464, %cst_140 [1] : vector<4x4xf32> to vector<4xf32>
    %466 = vector.shape_cast %465 : vector<4xf32> to vector<4x1xf32>
    %467 = vector.broadcast %466 : vector<4x1xf32> to vector<4x4xf32>
    %468 = arith.subf %464, %467 : vector<4x4xf32>
    %469 = math.exp %468 : vector<4x4xf32>
    %cst_141 = arith.constant dense<0.000000e+00> : vector<4xf32>
    %470 = vector.multi_reduction <add>, %469, %cst_141 [1] : vector<4x4xf32> to vector<4xf32>
    %471 = vector.shape_cast %470 : vector<4xf32> to vector<4x1xf32>
    %472 = tpu.reciprocal %471 {approx = true} : vector<4x1xf32> -> vector<4x1xf32>
    %473 = vector.broadcast %472 : vector<4x1xf32> to vector<4x4xf32>
    %474 = arith.mulf %469, %473 : vector<4x4xf32>
    %cst_142 = arith.constant dense<0.000000e+00> : vector<4x16xf32>
    %475 = tpu.matmul %474, %461, %cst_142 {dimension_numbers = #tpu.dot_dimension_numbers<[1], [0], [0], [1], [0, 0, 1, 1], [], []>} : vector<4x4xf32>, vector<4x16xf32>, vector<4x16xf32> -> vector<4x16xf32>
    %476 = vector.extract_strided_slice %456 {offsets = [0, 16], sizes = [4, 16], strides = [1, 1]} : vector<4x64xf32> to vector<4x16xf32>
    %477 = vector.extract_strided_slice %457 {offsets = [0, 16], sizes = [4, 16], strides = [1, 1]} : vector<4x64xf32> to vector<4x16xf32>
    %478 = vector.extract_strided_slice %458 {offsets = [0, 16], sizes = [4, 16], strides = [1, 1]} : vector<4x64xf32> to vector<4x16xf32>
    "tpu.trace_start"() <{level = 10 : i32, message = "qd,kd->qk"}> : () -> ()
    %cst_143 = arith.constant dense<0.000000e+00> : vector<4x4xf32>
    %479 = tpu.matmul %476, %477, %cst_143 {dimension_numbers = #tpu.dot_dimension_numbers<[1], [1], [0], [0], [0, 0, 1, 0], [], []>} : vector<4x16xf32>, vector<4x16xf32>, vector<4x4xf32> -> vector<4x4xf32>
    "tpu.trace_stop"() : () -> ()
    %cst_144 = arith.constant 2.500000e-01 : f32
    %480 = vector.broadcast %cst_144 : f32 to vector<4x4xf32>
    %481 = arith.mulf %479, %480 : vector<4x4xf32>
    %cst_145 = arith.constant dense<0xFF800000> : vector<4xf32>
    %482 = vector.multi_reduction <maximumf>, %481, %cst_145 [1] : vector<4x4xf32> to vector<4xf32>
    %483 = vector.shape_cast %482 : vector<4xf32> to vector<4x1xf32>
    %484 = vector.broadcast %483 : vector<4x1xf32> to vector<4x4xf32>
    %485 = arith.subf %481, %484 : vector<4x4xf32>
    %486 = math.exp %485 : vector<4x4xf32>
    %cst_146 = arith.constant dense<0.000000e+00> : vector<4xf32>
    %487 = vector.multi_reduction <add>, %486, %cst_146 [1] : vector<4x4xf32> to vector<4xf32>
    %488 = vector.shape_cast %487 : vector<4xf32> to vector<4x1xf32>
    %489 = tpu.reciprocal %488 {approx = true} : vector<4x1xf32> -> vector<4x1xf32>
    %490 = vector.broadcast %489 : vector<4x1xf32> to vector<4x4xf32>
    %491 = arith.mulf %486, %490 : vector<4x4xf32>
    %cst_147 = arith.constant dense<0.000000e+00> : vector<4x16xf32>
    %492 = tpu.matmul %491, %478, %cst_147 {dimension_numbers = #tpu.dot_dimension_numbers<[1], [0], [0], [1], [0, 0, 1, 1], [], []>} : vector<4x4xf32>, vector<4x16xf32>, vector<4x16xf32> -> vector<4x16xf32>
    %493 = vector.extract_strided_slice %456 {offsets = [0, 32], sizes = [4, 16], strides = [1, 1]} : vector<4x64xf32> to vector<4x16xf32>
    %494 = vector.extract_strided_slice %457 {offsets = [0, 32], sizes = [4, 16], strides = [1, 1]} : vector<4x64xf32> to vector<4x16xf32>
    %495 = vector.extract_strided_slice %458 {offsets = [0, 32], sizes = [4, 16], strides = [1, 1]} : vector<4x64xf32> to vector<4x16xf32>
    "tpu.trace_start"() <{level = 10 : i32, message = "qd,kd->qk"}> : () -> ()
    %cst_148 = arith.constant dense<0.000000e+00> : vector<4x4xf32>
    %496 = tpu.matmul %493, %494, %cst_148 {dimension_numbers = #tpu.dot_dimension_numbers<[1], [1], [0], [0], [0, 0, 1, 0], [], []>} : vector<4x16xf32>, vector<4x16xf32>, vector<4x4xf32> -> vector<4x4xf32>
    "tpu.trace_stop"() : () -> ()
    %cst_149 = arith.constant 2.500000e-01 : f32
    %497 = vector.broadcast %cst_149 : f32 to vector<4x4xf32>
    %498 = arith.mulf %496, %497 : vector<4x4xf32>
    %cst_150 = arith.constant dense<0xFF800000> : vector<4xf32>
    %499 = vector.multi_reduction <maximumf>, %498, %cst_150 [1] : vector<4x4xf32> to vector<4xf32>
    %500 = vector.shape_cast %499 : vector<4xf32> to vector<4x1xf32>
    %501 = vector.broadcast %500 : vector<4x1xf32> to vector<4x4xf32>
    %502 = arith.subf %498, %501 : vector<4x4xf32>
    %503 = math.exp %502 : vector<4x4xf32>
    %cst_151 = arith.constant dense<0.000000e+00> : vector<4xf32>
    %504 = vector.multi_reduction <add>, %503, %cst_151 [1] : vector<4x4xf32> to vector<4xf32>
    %505 = vector.shape_cast %504 : vector<4xf32> to vector<4x1xf32>
    %506 = tpu.reciprocal %505 {approx = true} : vector<4x1xf32> -> vector<4x1xf32>
    %507 = vector.broadcast %506 : vector<4x1xf32> to vector<4x4xf32>
    %508 = arith.mulf %503, %507 : vector<4x4xf32>
    %cst_152 = arith.constant dense<0.000000e+00> : vector<4x16xf32>
    %509 = tpu.matmul %508, %495, %cst_152 {dimension_numbers = #tpu.dot_dimension_numbers<[1], [0], [0], [1], [0, 0, 1, 1], [], []>} : vector<4x4xf32>, vector<4x16xf32>, vector<4x16xf32> -> vector<4x16xf32>
    %510 = vector.extract_strided_slice %456 {offsets = [0, 48], sizes = [4, 16], strides = [1, 1]} : vector<4x64xf32> to vector<4x16xf32>
    %511 = vector.extract_strided_slice %457 {offsets = [0, 48], sizes = [4, 16], strides = [1, 1]} : vector<4x64xf32> to vector<4x16xf32>
    %512 = vector.extract_strided_slice %458 {offsets = [0, 48], sizes = [4, 16], strides = [1, 1]} : vector<4x64xf32> to vector<4x16xf32>
    "tpu.trace_start"() <{level = 10 : i32, message = "qd,kd->qk"}> : () -> ()
    %cst_153 = arith.constant dense<0.000000e+00> : vector<4x4xf32>
    %513 = tpu.matmul %510, %511, %cst_153 {dimension_numbers = #tpu.dot_dimension_numbers<[1], [1], [0], [0], [0, 0, 1, 0], [], []>} : vector<4x16xf32>, vector<4x16xf32>, vector<4x4xf32> -> vector<4x4xf32>
    "tpu.trace_stop"() : () -> ()
    %cst_154 = arith.constant 2.500000e-01 : f32
    %514 = vector.broadcast %cst_154 : f32 to vector<4x4xf32>
    %515 = arith.mulf %513, %514 : vector<4x4xf32>
    %cst_155 = arith.constant dense<0xFF800000> : vector<4xf32>
    %516 = vector.multi_reduction <maximumf>, %515, %cst_155 [1] : vector<4x4xf32> to vector<4xf32>
    %517 = vector.shape_cast %516 : vector<4xf32> to vector<4x1xf32>
    %518 = vector.broadcast %517 : vector<4x1xf32> to vector<4x4xf32>
    %519 = arith.subf %515, %518 : vector<4x4xf32>
    %520 = math.exp %519 : vector<4x4xf32>
    %cst_156 = arith.constant dense<0.000000e+00> : vector<4xf32>
    %521 = vector.multi_reduction <add>, %520, %cst_156 [1] : vector<4x4xf32> to vector<4xf32>
    %522 = vector.shape_cast %521 : vector<4xf32> to vector<4x1xf32>
    %523 = tpu.reciprocal %522 {approx = true} : vector<4x1xf32> -> vector<4x1xf32>
    %524 = vector.broadcast %523 : vector<4x1xf32> to vector<4x4xf32>
    %525 = arith.mulf %520, %524 : vector<4x4xf32>
    %cst_157 = arith.constant dense<0.000000e+00> : vector<4x16xf32>
    %526 = tpu.matmul %525, %512, %cst_157 {dimension_numbers = #tpu.dot_dimension_numbers<[1], [0], [0], [1], [0, 0, 1, 1], [], []>} : vector<4x4xf32>, vector<4x16xf32>, vector<4x16xf32> -> vector<4x16xf32>
    %527 = tpu.concatenate %475, %492, %509, %526 in 1 : vector<4x16xf32>, vector<4x16xf32>, vector<4x16xf32>, vector<4x16xf32> -> vector<4x64xf32>
    %528 = tpu.concatenate %455, %527 in 0 : vector<4x64xf32>, vector<4x64xf32> -> vector<8x64xf32>
    %cst_158 = arith.constant dense<0.000000e+00> : vector<8x64xf32>
    %529 = tpu.matmul %528, %379, %cst_158 {dimension_numbers = #tpu.dot_dimension_numbers<[1], [0], [0], [1], [0, 0, 1, 1], [], []>} : vector<8x64xf32>, vector<64x64xf32>, vector<8x64xf32> -> vector<8x64xf32>
    %530 = vector.broadcast %380 : vector<1x64xf32> to vector<8x64xf32>
    %531 = arith.addf %529, %530 : vector<8x64xf32>
    %532 = arith.addf %354, %531 : vector<8x64xf32>
    %c0_159 = arith.constant 0 : index
    %c0_160 = arith.constant 0 : index
    %533 = vector.load %arg15[%c0_159, %c0_160] : memref<1x64xf32, #tpu.memory_space<vmem>>, vector<1x64xf32>
    %c0_161 = arith.constant 0 : index
    %c0_162 = arith.constant 0 : index
    %534 = vector.load %arg16[%c0_161, %c0_162] : memref<1x64xf32, #tpu.memory_space<vmem>>, vector<1x64xf32>
    %cst_163 = arith.constant dense<0.000000e+00> : vector<8xf32>
    %535 = vector.multi_reduction <add>, %532, %cst_163 [1] : vector<8x64xf32> to vector<8xf32>
    %536 = vector.shape_cast %535 : vector<8xf32> to vector<8x1xf32>
    %cst_164 = arith.constant 6.400000e+01 : f32
    %537 = vector.broadcast %cst_164 : f32 to vector<8x1xf32>
    %538 = arith.divf %536, %537 : vector<8x1xf32>
    %539 = vector.broadcast %538 : vector<8x1xf32> to vector<8x64xf32>
    %540 = arith.subf %532, %539 : vector<8x64xf32>
    %541 = arith.mulf %540, %540 : vector<8x64xf32>
    %cst_165 = arith.constant dense<0.000000e+00> : vector<8xf32>
    %542 = vector.multi_reduction <add>, %541, %cst_165 [1] : vector<8x64xf32> to vector<8xf32>
    %543 = vector.shape_cast %542 : vector<8xf32> to vector<8x1xf32>
    %cst_166 = arith.constant 6.400000e+01 : f32
    %544 = vector.broadcast %cst_166 : f32 to vector<8x1xf32>
    %545 = arith.divf %543, %544 : vector<8x1xf32>
    %cst_167 = arith.constant 9.99999974E-6 : f32
    %546 = vector.broadcast %cst_167 : f32 to vector<8x1xf32>
    %547 = arith.addf %545, %546 : vector<8x1xf32>
    %548 = math.rsqrt %547 : vector<8x1xf32>
    %549 = vector.broadcast %548 : vector<8x1xf32> to vector<8x64xf32>
    %550 = arith.mulf %540, %549 : vector<8x64xf32>
    %551 = vector.broadcast %533 : vector<1x64xf32> to vector<8x64xf32>
    %552 = arith.mulf %550, %551 : vector<8x64xf32>
    %553 = vector.broadcast %534 : vector<1x64xf32> to vector<8x64xf32>
    %554 = arith.addf %552, %553 : vector<8x64xf32>
    %c0_168 = arith.constant 0 : index
    %c0_169 = arith.constant 0 : index
    %555 = vector.load %arg17[%c0_168, %c0_169] : memref<64x256xf32, #tpu.memory_space<vmem>>, vector<64x256xf32>
    %cst_170 = arith.constant dense<0.000000e+00> : vector<8x256xf32>
    %556 = tpu.matmul %554, %555, %cst_170 {dimension_numbers = #tpu.dot_dimension_numbers<[1], [0], [0], [1], [0, 0, 1, 1], [], []>} : vector<8x64xf32>, vector<64x256xf32>, vector<8x256xf32> -> vector<8x256xf32>
    %c0_171 = arith.constant 0 : index
    %c0_172 = arith.constant 0 : index
    %557 = vector.load %arg18[%c0_171, %c0_172] : memref<1x256xf32, #tpu.memory_space<vmem>>, vector<1x256xf32>
    %558 = vector.broadcast %557 : vector<1x256xf32> to vector<8x256xf32>
    %559 = arith.addf %556, %558 : vector<8x256xf32>
    %560 = arith.mulf %559, %559 : vector<8x256xf32>
    %561 = arith.mulf %559, %560 : vector<8x256xf32>
    %cst_173 = arith.constant 4.471500e-02 : f32
    %562 = vector.broadcast %cst_173 : f32 to vector<8x256xf32>
    %563 = arith.mulf %562, %561 : vector<8x256xf32>
    %564 = arith.addf %559, %563 : vector<8x256xf32>
    %cst_174 = arith.constant 0.797884583 : f32
    %565 = vector.broadcast %cst_174 : f32 to vector<8x256xf32>
    %566 = arith.mulf %565, %564 : vector<8x256xf32>
    %567 = math.tanh %566 : vector<8x256xf32>
    %cst_175 = arith.constant 1.000000e+00 : f32
    %568 = vector.broadcast %cst_175 : f32 to vector<8x256xf32>
    %569 = arith.addf %568, %567 : vector<8x256xf32>
    %cst_176 = arith.constant 5.000000e-01 : f32
    %570 = vector.broadcast %cst_176 : f32 to vector<8x256xf32>
    %571 = arith.mulf %570, %569 : vector<8x256xf32>
    %572 = arith.mulf %559, %571 : vector<8x256xf32>
    %c0_177 = arith.constant 0 : index
    %c0_178 = arith.constant 0 : index
    %573 = vector.load %arg19[%c0_177, %c0_178] : memref<256x64xf32, #tpu.memory_space<vmem>>, vector<256x64xf32>
    %cst_179 = arith.constant dense<0.000000e+00> : vector<8x64xf32>
    %574 = tpu.matmul %572, %573, %cst_179 {dimension_numbers = #tpu.dot_dimension_numbers<[1], [0], [0], [1], [0, 0, 1, 1], [], []>} : vector<8x256xf32>, vector<256x64xf32>, vector<8x64xf32> -> vector<8x64xf32>
    %575 = arith.addf %532, %574 : vector<8x64xf32>
    %c0_180 = arith.constant 0 : index
    %c0_181 = arith.constant 0 : index
    %576 = vector.load %arg20[%c0_180, %c0_181] : memref<1x64xf32, #tpu.memory_space<vmem>>, vector<1x64xf32>
    %577 = vector.broadcast %576 : vector<1x64xf32> to vector<8x64xf32>
    %578 = arith.addf %575, %577 : vector<8x64xf32>
    %579 = vector.extract_strided_slice %578 {offsets = [0, 0], sizes = [1, 64], strides = [1, 1]} : vector<8x64xf32> to vector<1x64xf32>
    %580 = vector.extract_strided_slice %578 {offsets = [1, 0], sizes = [1, 64], strides = [1, 1]} : vector<8x64xf32> to vector<1x64xf32>
    %581 = vector.extract_strided_slice %578 {offsets = [2, 0], sizes = [1, 64], strides = [1, 1]} : vector<8x64xf32> to vector<1x64xf32>
    %582 = vector.extract_strided_slice %578 {offsets = [3, 0], sizes = [1, 64], strides = [1, 1]} : vector<8x64xf32> to vector<1x64xf32>
    %583 = tpu.concatenate %579, %580, %581, %582 in 1 : vector<1x64xf32>, vector<1x64xf32>, vector<1x64xf32>, vector<1x64xf32> -> vector<1x256xf32>
    %584 = vector.extract_strided_slice %578 {offsets = [4, 0], sizes = [1, 64], strides = [1, 1]} : vector<8x64xf32> to vector<1x64xf32>
    %585 = vector.extract_strided_slice %578 {offsets = [5, 0], sizes = [1, 64], strides = [1, 1]} : vector<8x64xf32> to vector<1x64xf32>
    %586 = vector.extract_strided_slice %578 {offsets = [6, 0], sizes = [1, 64], strides = [1, 1]} : vector<8x64xf32> to vector<1x64xf32>
    %587 = vector.extract_strided_slice %578 {offsets = [7, 0], sizes = [1, 64], strides = [1, 1]} : vector<8x64xf32> to vector<1x64xf32>
    %588 = tpu.concatenate %584, %585, %586, %587 in 1 : vector<1x64xf32>, vector<1x64xf32>, vector<1x64xf32>, vector<1x64xf32> -> vector<1x256xf32>
    %589 = tpu.concatenate %583, %588 in 0 : vector<1x256xf32>, vector<1x256xf32> -> vector<2x256xf32>
    %c0_182 = arith.constant 0 : index
    %c0_183 = arith.constant 0 : index
    %590 = vector.load %arg21[%c0_182, %c0_183] : memref<256x512xf32, #tpu.memory_space<vmem>>, vector<256x512xf32>
    %cst_184 = arith.constant dense<0.000000e+00> : vector<2x512xf32>
    %591 = tpu.matmul %589, %590, %cst_184 {dimension_numbers = #tpu.dot_dimension_numbers<[1], [0], [0], [1], [0, 0, 1, 1], [], []>} : vector<2x256xf32>, vector<256x512xf32>, vector<2x512xf32> -> vector<2x512xf32>
    %c0_185 = arith.constant 0 : index
    %c0_186 = arith.constant 0 : index
    %592 = vector.load %arg22[%c0_185, %c0_186] : memref<1x512xf32, #tpu.memory_space<vmem>>, vector<1x512xf32>
    %593 = vector.broadcast %592 : vector<1x512xf32> to vector<2x512xf32>
    %594 = arith.addf %591, %593 : vector<2x512xf32>
    %c0_187 = arith.constant 0 : index
    %c0_188 = arith.constant 0 : index
    %595 = vector.load %arg23[%c0_187, %c0_188] : memref<2x512xf32, #tpu.memory_space<vmem>>, vector<2x512xf32>
    tpu.vector_store %arg23[%c0_187, %c0_188], %594 {strides = array<i32>} : memref<2x512xf32, #tpu.memory_space<vmem>>, vector<2x512xf32>,
    return
  }
}

</mosaic_0001>

<bundles_post_ra>
// kernel: squeeze.2
= control target key start
LH: loop header
LB: loop body
LE: loop exit
PB: predicated region body
PF: predicated region fallthrough
CT: control target
= control target key end

     0   :  { %s15_s8 = smov 6  ;;  %vm17_vm0 = vcmask 1042433   ;;  %vm21_vm1 = vcmask 1043459   ;;  %s49_s15 = smov 6  ;;  %vm6_vm2 = vcmask 1043458   ;;  %vm8_vm3 = vcmask 64512   ;;  %s541_s0 = inlined_call_operand.vmem [shape: f32[2,4,1,8,8], index: 0, kind: input, shape index: {}]   ;;  %s542_s1 = inlined_call_operand.vmem [shape: f32[2,256], index: 1, kind: output, shape index: {}]  }
   0x1   :  { %v278_v0 = vld [vmem:[%s541_s0 + $0xf] sm:$0x1]   ;;  %v280_v1 = vld [vmem:[%s541_s0 + $0x3c] sm:$0x8]   ;;  %v284_v3 = vld [vmem:[%s541_s0 + $0xd] sm:$0x1]  }
   0x2   :  { %v279_v2 = vld [vmem:[%s541_s0 + $0x3f] ss:$-16 sm:%s15_s8]   ;;  %v286_v5 = vld [vmem:[%s541_s0 + $0x3a] sm:$0x8]   ;;  %v281_v6 = vld [vmem:[%s541_s0 + $0xe] sm:$0x1]  }
   0x3   :  { %v18_v4 = vsel %vm17_vm0, %v279_v2, %v278_v0  ;;  %v285_v8 = vld [vmem:[%s541_s0 + $0x3d] ss:$-16 sm:%s49_s15]   ;;  %s32_s22 = smov 6  ;;  %v283_v9 = vld [vmem:[%s541_s0 + $0x3b] sm:$0x8]   ;;  %s339_s25 = smov 120  }
   0x4   :  { %v22_v7 = vsel %vm21_vm1, %v280_v1, %v18_v4  ;;  %v52_v10 = vsel %vm17_vm0, %v285_v8, %v284_v3  ;;  %v282_v11 = vld [vmem:[%s541_s0 + $0x3e] ss:$-16 sm:%s32_s22]   ;;  %v287_v12 = vld [vmem:[%s541_s0 + $0xc] sm:$0x1]   ;;  %s66_s30 = smov 6  ;;  %s340_s8 = smov 104  }
   0x5   :  { %23 = vrot.lane.b32.xlu0 %v22_v7, %s339_s25  ;;  %v56_v13 = vsel %vm21_vm1, %v286_v5, %v52_v10  ;;  %v35_v14 = vsel %vm17_vm0, %v282_v11, %v281_v6  ;;  %v288_v15 = vld [vmem:[%s541_s0 + $0x3c] ss:$-16 sm:%s66_s30]   ;;  %v290_v17 = vld [vmem:[%s541_s0 + $0xb] sm:$0x1]   ;;  %s83_s9 = smov 6  ;;  %s100_s16 = smov 6 }
   0x6   :  { %v289_v16 = vld [vmem:[%s541_s0 + $0x39] sm:$0x8]   ;;  %57 = vrot.lane.b32.xlu1 %v56_v13, %s340_s8  ;;  %v39_v18 = vsel %vm21_vm1, %v283_v9, %v35_v14  ;;  %v69_v19 = vsel %vm17_vm0, %v288_v15, %v287_v12  ;;  %v292_v20 = vld [vmem:[%s541_s0 + $0x38] sm:$0x8]   ;;  %v293_v21 = vld [vmem:[%s541_s0 + $0xa] sm:$0x1]  }
   0x7   :  { %v73_v22 = vsel %vm21_vm1, %v289_v16, %v69_v19  ;;  %v291_v23 = vld [vmem:[%s541_s0 + $0x3b] ss:$-16 sm:%s83_s9]   ;;  %v295_v24 = vld [vmem:[%s541_s0 + $0x37] sm:$0x8]   ;;  %s341_s19 = smov 112   ;;  %s117_s24 = smov 6 }
   0x8   :  { %v86_v25 = vsel %vm17_vm0, %v291_v23, %v290_v17  ;;  %v294_v26 = vld [vmem:[%s541_s0 + $0x3a] ss:$-16 sm:%s100_s16]   ;;  %v296_v27 = vld [vmem:[%s541_s0 + $0x9] sm:$0x1]   ;;  %v299_v31 = vld [vmem:[%s541_s0 + $0x8] sm:$0x1]  }
   0x9   :  { %40 = vrot.lane.b32.xlu0 %v39_v18, %s341_s19  ;;  %v90_v28 = vsel %vm21_vm1, %v292_v20, %v86_v25  ;;  %v103_v29 = vsel %vm17_vm0, %v294_v26, %v293_v21  ;;  %v297_v30 = vld [vmem:[%s541_s0 + $0x39] ss:$-16 sm:%s117_s24]   ;;  %s342_s29 = smov 96   ;;  %s134_s3 = smov 6  ;;  %v302_v36 = vld [vmem:[%s541_s0 + $0x7] sm:$0x1]  }
   0xa   :  { %74 = vrot.lane.b32.xlu1 %v73_v22, %s342_s29  ;;  %v120_v32 = vsel %vm17_vm0, %v297_v30, %v296_v27  ;;  %v298_v33 = vld [vmem:[%s541_s0 + $0x36] sm:$0x8]   ;;  %v107_v34 = vsel %vm21_vm1, %v295_v24, %v103_v29  ;;  %v300_v35 = vld [vmem:[%s541_s0 + $0x38] ss:$-16 sm:%s134_s3]   ;;  %s151_s8 = smov 6  ;;  %s343_s9 = smov 88  }
   0xb   :  { %v137_v37 = vsel %vm17_vm0, %v300_v35, %v299_v31  ;;  %v301_v38 = vld [vmem:[%s541_s0 + $0x35] sm:$0x8]   ;;  %v303_v39 = vld [vmem:[%s541_s0 + $0x37] ss:$-16 sm:%s151_s8]   ;;  %s168_s14 = smov 6  ;;  %v124_v40 = vsel %vm21_vm1, %v298_v33, %v120_v32  ;;  %s344_s19 = smov 80  }
   0xc   :  { %v305_v41 = vld [vmem:[%s541_s0 + $0x6] sm:$0x1]   ;;  %v154_v43 = vsel %vm17_vm0, %v303_v39, %v302_v36  ;;  %v304_v44 = vld [vmem:[%s541_s0 + $0x34] sm:$0x8]   ;;  %s185_s22 = smov 6  ;;  %v141_v45 = vsel %vm21_vm1, %v301_v38, %v137_v37  ;;  %s202_s27 = smov 6 }
   0xd   :  { %91 = vrot.lane.b32.xlu0 %v90_v28, %s343_s9  ;;  %v306_v42 = vld [vmem:[%s541_s0 + $0x36] ss:$-16 sm:%s168_s14]   ;;  %v308_v46 = vld [vmem:[%s541_s0 + $0x5] sm:$0x1]   ;;  %s345_s28 = smov 72   ;;  %s219_s2 = smov 6  ;;  %v158_v50 = vsel %vm21_vm1, %v304_v44, %v154_v43 }
   0xe   :  { %108 = vrot.lane.b32.xlu1 %v107_v34, %s344_s19  ;;  %v309_v47 = vld [vmem:[%s541_s0 + $0x35] ss:$-16 sm:%s185_s22]   ;;  %v171_v48 = vsel %vm17_vm0, %v306_v42, %v305_v41  ;;  %v307_v49 = vld [vmem:[%s541_s0 + $0x33] sm:$0x8]   ;;  %s346_s9 = smov 64   ;;  %s236_s14 = smov 6 }
   0xf   :  { %v310_v51 = vld [vmem:[%s541_s0 + $0x32] sm:$0x8]   ;;  %v311_v52 = vld [vmem:[%s541_s0 + $0x4] sm:$0x1]   ;;  %v188_v54 = vsel %vm17_vm0, %v309_v47, %v308_v46  ;;  %v313_v55 = vld [vmem:[%s541_s0 + $0x31] sm:$0x8]   ;;  %v175_v57 = vsel %vm21_vm1, %v307_v49, %v171_v48 }
  0x10   :  { %v312_v53 = vld [vmem:[%s541_s0 + $0x34] ss:$-16 sm:%s202_s27]   ;;  %v314_v56 = vld [vmem:[%s541_s0 + $0x3] sm:$0x1]   ;;  %v317_v59 = vld [vmem:[%s541_s0 + $0x2] sm:$0x1]   ;;  %v192_v62 = vsel %vm21_vm1, %v310_v51, %v188_v54 }
  0x11   :  { %125 = vrot.lane.b32.xlu0 %v124_v40, %s345_s28  ;;  %v315_v58 = vld [vmem:[%s541_s0 + $0x33] ss:$-16 sm:%s219_s2]   ;;  %s253_s19 = smov 6  ;;  %s347_s20 = smov 56   ;;  %v205_v60 = vsel %vm17_vm0, %v312_v53, %v311_v52  ;;  %v320_v5 = vld [vmem:[%s541_s0 + $0x1] sm:$0x1]  }
  0x12   :  { %142 = vrot.lane.b32.xlu1 %v141_v45, %s346_s9  ;;  %v318_v61 = vld [vmem:[%s541_s0 + $0x32] ss:$-16 sm:%s236_s14]   ;;  %s2_s23 = smov 3  ;;  %s4_s24 = smov 12  ;;  %v222_v1 = vsel %vm17_vm0, %v315_v58, %v314_v56  ;;  %v316_v2 = vld [vmem:[%s541_s0 + $0x30] sm:$0x8]   ;;  %v209_v4 = vsel %vm21_vm1, %v313_v55, %v205_v60 }
  0x13   :  { %v3_v63 = vld [vmem:[%s541_s0] ss:$16 sm:%s2_s23]   ;;  %s348_s29 = smov 48   ;;  %v321_v6 = vld [vmem:[%s541_s0 + $0x31] ss:$-16 sm:%s253_s19]   ;;  %s349_s7 = smov 40   ;;  %v239_v7 = vsel %vm17_vm0, %v318_v61, %v317_v59  ;;  %v226_v9 = vsel %vm21_vm1, %v316_v2, %v222_v1 }
  0x14   :  { %v5_v0 = vld [vmem:[%s541_s0] ss:$16 sm:%s4_s24]   ;;  %v319_v8 = vld [vmem:[%s541_s0 + $0x2f] sm:$0x8]   ;;  %s350_s10 = smov 32   ;;  %v256_v10 = vsel %vm17_vm0, %v321_v6, %v320_v5  ;;  %s352_s13 = smov 16  }
  0x15   :  { %159 = vrot.lane.b32.xlu0 %v158_v50, %s347_s20  ;;  %v7_v3 = vsel %vm6_vm2, %v5_v0, %v3_v63  ;;  %v322_v11 = vld [vmem:[%s541_s0 + $0x2e] sm:$0x8]   ;;  %v243_v12 = vsel %vm21_vm1, %v319_v8, %v239_v7  ;;  %s351_s0 = smov 24   ;;  %s353_s14 = smov 8   ;;  %vm25_vm4 = vcmask 1048512   ;;  %vm42_vm5 = vcmask 982912  }
  0x16   :  { %176 = vrot.lane.b32.xlu1 %v175_v57, %s348_s29  ;;  %9 = vst.msk [vmem:[#allocation0] ss:$8 sm:$0x3] %vm8_vm3, %v7_v3   ;;  %11 = vst.msk [vmem:[#allocation0 - $0xf] ss:$8 sm:$0xc] %vm8_vm3, %v7_v3   ;;  %v260_v13 = vsel %vm21_vm1, %v322_v11, %v256_v10 }
  0x17   :  { %vm59_vm6 = vcmask 917312   ;;  %vm76_vm7 = vcmask 851712   ;;  %vm93_vm8 = vcmask 786112   ;;  %vm110_vm9 = vcmask 720512  }
  0x18   :  { %vm127_vm10 = vcmask 654912   ;;  %vm144_vm11 = vcmask 589312   ;;  %vm161_vm12 = vcmask 523712   ;;  %vm178_vm13 = vcmask 458112  }
  0x19   :  { %193 = vrot.lane.b32.xlu0 %v192_v62, %s349_s7  ;;  %vm195_vm14 = vcmask 392512   ;;  %vm212_vm15 = vcmask 326912   ;;  %vm229_vm0 = vcmask 261312   ;;  %vm246_vm1 = vcmask 195712  }
  0x1a   :  { %210 = vrot.lane.b32.xlu1 %v209_v4, %s350_s10  ;;  %vm263_vm2 = vcmask 130112  }
  0x1d   :  { %227 = vrot.lane.b32.xlu0 %v226_v9, %s351_s0 }
  0x1e   :  { %244 = vrot.lane.b32.xlu1 %v243_v12, %s352_s13 }
  0x21   :  { %261 = vrot.lane.b32.xlu0 %v260_v13, %s353_s14 }
  0x77   :  { %v24_v14 = vpop.permute.xlu0 %23  }
  0x78   :  { %26 = vst.msk [vmem:[#allocation0] sm:$0x3] %vm25_vm4, %v24_v14   ;;  %28 = vst.msk [vmem:[#allocation0 + $0x6] sm:$0xc] %vm25_vm4, %v24_v14   ;;  %v58_v15 = vpop.permute.xlu1 %57  }
  0x7b   :  { %v41_v16 = vpop.permute.xlu0 %40  }
  0x7c   :  { %43 = vst.msk [vmem:[#allocation0] sm:$0x3] %vm42_vm5, %v41_v16   ;;  %45 = vst.msk [vmem:[#allocation0 + $0x6] sm:$0xc] %vm42_vm5, %v41_v16   ;;  %v75_v17 = vpop.permute.xlu1 %74  }
  0x7d   :  { %60 = vst.msk [vmem:[#allocation0] sm:$0x3] %vm59_vm6, %v58_v15   ;;  %62 = vst.msk [vmem:[#allocation0 + $0x6] sm:$0xc] %vm59_vm6, %v58_v15  }
  0x7e   :  { %77 = vst.msk [vmem:[#allocation0] sm:$0x3] %vm76_vm7, %v75_v17   ;;  %79 = vst.msk [vmem:[#allocation0 + $0x6] sm:$0xc] %vm76_vm7, %v75_v17  }
  0x7f   :  { %v92_v18 = vpop.permute.xlu0 %91  }
  0x80   :  { %94 = vst.msk [vmem:[#allocation0] sm:$0x3] %vm93_vm8, %v92_v18   ;;  %96 = vst.msk [vmem:[#allocation0 + $0x6] sm:$0xc] %vm93_vm8, %v92_v18   ;;  %v109_v19 = vpop.permute.xlu1 %108  }
  0x81   :  { %111 = vst.msk [vmem:[#allocation0] sm:$0x3] %vm110_vm9, %v109_v19   ;;  %113 = vst.msk [vmem:[#allocation0 + $0x6] sm:$0xc] %vm110_vm9, %v109_v19  }
  0x83   :  { %v126_v20 = vpop.permute.xlu0 %125  }
  0x84   :  { %128 = vst.msk [vmem:[#allocation0] sm:$0x3] %vm127_vm10, %v126_v20   ;;  %130 = vst.msk [vmem:[#allocation0 + $0x6] sm:$0xc] %vm127_vm10, %v126_v20   ;;  %v143_v21 = vpop.permute.xlu1 %142  }
  0x85   :  { %145 = vst.msk [vmem:[#allocation0] sm:$0x3] %vm144_vm11, %v143_v21   ;;  %147 = vst.msk [vmem:[#allocation0 + $0x6] sm:$0xc] %vm144_vm11, %v143_v21  }
  0x87   :  { %v160_v22 = vpop.permute.xlu0 %159  }
  0x88   :  { %162 = vst.msk [vmem:[#allocation0] sm:$0x3] %vm161_vm12, %v160_v22   ;;  %164 = vst.msk [vmem:[#allocation0 + $0x6] sm:$0xc] %vm161_vm12, %v160_v22   ;;  %v177_v23 = vpop.permute.xlu1 %176  }
  0x89   :  { %179 = vst.msk [vmem:[#allocation0] sm:$0x3] %vm178_vm13, %v177_v23   ;;  %181 = vst.msk [vmem:[#allocation0 + $0x6] sm:$0xc] %vm178_vm13, %v177_v23  }
  0x8b   :  { %v194_v24 = vpop.permute.xlu0 %193  }
  0x8c   :  { %196 = vst.msk [vmem:[#allocation0] sm:$0x3] %vm195_vm14, %v194_v24   ;;  %198 = vst.msk [vmem:[#allocation0 + $0x6] sm:$0xc] %vm195_vm14, %v194_v24   ;;  %v211_v25 = vpop.permute.xlu1 %210  }
  0x8d   :  { %213 = vst.msk [vmem:[#allocation0] sm:$0x3] %vm212_vm15, %v211_v25   ;;  %215 = vst.msk [vmem:[#allocation0 + $0x6] sm:$0xc] %vm212_vm15, %v211_v25  }
  0x8f   :  { %v228_v26 = vpop.permute.xlu0 %227  }
  0x90   :  { %230 = vst.msk [vmem:[#allocation0] sm:$0x3] %vm229_vm0, %v228_v26   ;;  %232 = vst.msk [vmem:[#allocation0 + $0x6] sm:$0xc] %vm229_vm0, %v228_v26   ;;  %v245_v27 = vpop.permute.xlu1 %244  }
  0x91   :  { %247 = vst.msk [vmem:[#allocation0] sm:$0x3] %vm246_vm1, %v245_v27   ;;  %249 = vst.msk [vmem:[#allocation0 + $0x6] sm:$0xc] %vm246_vm1, %v245_v27  }
  0x93   :  { %v262_v28 = vpop.permute.xlu0 %261  }
  0x94   :  { %264 = vst.msk [vmem:[#allocation0] sm:$0x3] %vm263_vm2, %v262_v28   ;;  %266 = vst.msk [vmem:[#allocation0 + $0x6] sm:$0xc] %vm263_vm2, %v262_v28  }
  0x9b   :  { %v270_v29 = vld [vmem:[#allocation0] sm:$0x3]  ;;  %v274_v30 = vld [vmem:[#allocation0 + $0x8] sm:$0x3] }
  0x9c   :  { %272 = vst [vmem:[%s542_s1] sm:$0x3] %v270_v29  ;;  %323 = vst [vmem:[%s542_s1 + $0x2] sm:$0x3] %v274_v30 }

// kernel: _lambda_.1
= control target key start
LH: loop header
LB: loop body
LE: loop exit
PB: predicated region body
PF: predicated region fallthrough
CT: control target
= control target key end

     0   :  { %s8482_s0 = inlined_call_operand.vmem [shape: f32[4,256], index: 0, kind: input, shape index: {}]   ;;  %s8483_s1 = inlined_call_operand.vmem [shape: f32[256,256], index: 1, kind: input, shape index: {}]   ;;  %s8484_s2 = inlined_call_operand.vmem [shape: f32[1,256], index: 2, kind: input, shape index: {}]   ;;  %s8485_s3 = inlined_call_operand.vmem [shape: f32[64,192], index: 3, kind: input, shape index: {}]   ;;  %s8486_s4 = inlined_call_operand.vmem [shape: f32[1,192], index: 4, kind: input, shape index: {}]   ;;  %s8487_s5 = inlined_call_operand.vmem [shape: f32[64,64], index: 5, kind: input, shape index: {}]   ;;  %s8488_s6 = inlined_call_operand.vmem [shape: f32[1,64], index: 6, kind: input, shape index: {}]   ;;  %s8489_s7 = inlined_call_operand.hbm [shape: f32[512,256], index: 7, kind: input, shape index: {}]   ;;  %s8490_s8 = inlined_call_operand.vmem [shape: f32[1,256], index: 8, kind: input, shape index: {}]   ;;  %s8491_s9 = inlined_call_operand.hbm [shape: f32[1,64], index: 9, kind: input, shape index: {}]   ;;  %s8492_s10 = inlined_call_operand.vmem [shape: f32[1,64], index: 10, kind: input, shape index: {}]   ;;  %s8493_s11 = inlined_call_operand.hbm [shape: f32[64,192], index: 11, kind: input, shape index: {}]   ;;  %s8494_s12 = inlined_call_operand.vmem [shape: f32[1,192], index: 12, kind: input, shape index: {}]   ;;  %s8495_s13 = inlined_call_operand.hbm [shape: f32[64,64], index: 13, kind: input, shape index: {}]   ;;  %s8496_s14 = inlined_call_operand.hbm [shape: f32[1,64], index: 14, kind: input, shape index: {}]   ;;  %s8497_s15 = inlined_call_operand.vmem [shape: f32[1,64], index: 15, kind: input, shape index: {}]   ;;  %s8498_s16 = inlined_call_operand.vmem [shape: f32[1,64], index: 16, kind: input, shape index: {}]   ;;  %s8499_s17 = inlined_call_operand.hbm [shape: f32[64,256], index: 17, kind: input, shape index: {}]   ;;  %s8500_s18 = inlined_call_operand.vmem [shape: f32[1,256], index: 18, kind: input, shape index: {}]   ;;  %s8501_s19 = inlined_call_operand.vmem [shape: f32[256,64], index: 19, kind: input, shape index: {}]   ;;  %s8502_s20 = inlined_call_operand.vmem [shape: f32[1,64], index: 20, kind: input, shape index: {}]   ;;  %s8503_s21 = inlined_call_operand.hbm [shape: f32[256,512], index: 21, kind: input, shape index: {}]   ;;  %s8504_s22 = inlined_call_operand.vmem [shape: f32[1,512], index: 22, kind: input, shape index: {}]   ;;  %s8505_s23 = inlined_call_operand.vmem [shape: f32[2,512], index: 23, kind: output, shape index: {}]  }
   0x1   :  { %8510 = sst [smem:[#allocation17_spill]] %s8482_s0 }
   0x2   :  { %8511 = sst [smem:[#allocation18_spill]] %s8483_s1 }
   0x3   :  { %8512 = sst [smem:[#allocation19_spill]] %s8484_s2 }
   0x4   :  { %8513 = sst [smem:[#allocation20_spill]] %s8485_s3 }
   0x5   :  { %8514 = sst [smem:[#allocation21_spill]] %s8486_s4 }
   0x6   :  { %8515 = sst [smem:[#allocation22_spill]] %s8487_s5 }
   0x7   :  { %8516 = sst [smem:[#allocation23_spill]] %s8488_s6 }
   0x8   :  { %8517 = sst [smem:[#allocation24_spill]] %s8489_s7 }
   0x9   :  { %28 = vsyncpa [#allocation3], 0 }
   0xa   :  { %29 = vsyncpa [#allocation5], 0 }
   0xb   :  { %30 = vsyncpa [#allocation8], 0 }
   0xc   :  { %31 = vsyncpa [#allocation11], 0  ;;  %s7147_s4 = smov [#allocation4]   ;;  %s7148_s24 = smov [#allocation7]  }
   0xd   :  { %s66_s30 = sshll.u32 %s7147_s4, 4  ;;  %s91_s25 = sshll.u32 %s7148_s24, 4  ;;  %s67_s30 = int_to_ptr.vmem [resolvable:$true] %s66_s30  ;;  %s7289_s25 = int_to_ptr.vmem [resolvable:$true] %s91_s25 }
   0xe   :  { %s6985_s26 = scalar_lea.hbm %s8491_s9, 16 }
   0xf   :  { %p6986_p0 = scmp.ne.s32.totalorder %s8491_s9, %s6985_s26  ;;  %p6989_p1 = scmp.lt.u32.totalorder %s6985_s26, %s8491_s9 }
  0x11   :  { %p6991_p2 = pnand %p6989_p1, %p6986_p0 }
  0x13   :  { %6994 = shalt.err (!%p6991_p2)
}
  0x14   :  { %s6995_s28 = scalar_lea.vmem %s67_s30, 16  ;;  %s6999_s29 = scalar_lea.vmem %s67_s30, 32 }
  0x15   :  { %p6996_p3 = scmp.ne.s32.totalorder %s67_s30, %s6995_s28  ;;  %p7000_p4 = scmp.lt.s32.totalorder %s67_s30, %s67_s30 }
  0x16   :  { %p7001_p5 = scmp.lt.s32.totalorder %s6999_s29, %s6995_s28 }
  0x18   :  { %p7002_p6 = por %p7001_p5, %p7000_p4 }
  0x1a   :  { %p7003_p7 = pnand %p7002_p6, %p6996_p3 }
  0x1c   :  { %7006 = shalt.err (!%p7003_p7)
}
  0x1d   :  { %69 = dma.hbm_to_vmem [thread:$0]  %s8491_s9, 16, %s67_s30, [#allocation5]  }
  0x1e   :  { %s7007_s5 = scalar_lea.hbm %s8495_s13, 1024 }
  0x1f   :  { %p7008_p8 = scmp.ne.s32.totalorder %s8495_s13, %s7007_s5  ;;  %p7011_p9 = scmp.lt.u32.totalorder %s7007_s5, %s8495_s13 }
  0x21   :  { %p7013_p10 = pnand %p7011_p9, %p7008_p8 }
  0x23   :  { %7016 = shalt.err (!%p7013_p10)
}
  0x24   :  { %s7017_s27 = scalar_lea.vmem %s7289_s25, 1024  ;;  %p7022_p12 = scmp.lt.s32.totalorder %s7289_s25, %s7289_s25 }
  0x25   :  { %p7018_p11 = scmp.ne.s32.totalorder %s7289_s25, %s7017_s27  ;;  %p7023_p13 = scmp.lt.s32.totalorder %s7017_s27, %s7017_s27 }
  0x27   :  { %p7024_p0 = por %p7023_p13, %p7022_p12 }
  0x29   :  { %p7025_p1 = pnand %p7024_p0, %p7018_p11 }
  0x2b   :  { %7028 = shalt.err (!%p7025_p1)
}
  0x2c   :  { %s7149_s9 = smov 128   ;;  %s7150_s30 = smov 8  }
  0x2d   :  { %97 = dma.hbm_to_vmem [thread:$0]  %s8495_s13, 1024, %s7289_s25, [#allocation8], %s7149_s9, %s7149_s9, %s7150_s30  }
  0x2e   :  { %s7151_s29 = smov [#allocation10]   ;;  %s7152_s0 = smov [#allocation2]  }
  0x2f   :  { %s117_s3 = sshll.u32 %s7151_s29, 4  ;;  %s51_s4 = sshll.u32 %s7152_s0, 4  ;;  %s118_s3 = int_to_ptr.vmem [resolvable:$true] %s117_s3  ;;  %s7320_s4 = int_to_ptr.vmem [resolvable:$true] %s51_s4 }
  0x30   :  { %s7029_s1 = scalar_lea.hbm %s8499_s17, 2048 }
  0x31   :  { %p7030_p2 = scmp.ne.s32.totalorder %s8499_s17, %s7029_s1  ;;  %p7033_p3 = scmp.lt.u32.totalorder %s7029_s1, %s8499_s17 }
  0x33   :  { %p7035_p4 = pnand %p7033_p3, %p7030_p2 }
  0x35   :  { %7038 = shalt.err (!%p7035_p4)
}
  0x36   :  { %s7039_s13 = scalar_lea.vmem %s118_s3, 2048  ;;  %p7044_p6 = scmp.lt.s32.totalorder %s118_s3, %s118_s3 }
  0x37   :  { %p7040_p5 = scmp.ne.s32.totalorder %s118_s3, %s7039_s13  ;;  %p7045_p7 = scmp.lt.s32.totalorder %s7039_s13, %s7039_s13 }
  0x39   :  { %p7046_p8 = por %p7045_p7, %p7044_p6 }
  0x3b   :  { %p7047_p9 = pnand %p7046_p8, %p7040_p5 }
  0x3d   :  { %7050 = shalt.err (!%p7047_p9)
}
  0x3e   :  { %s7153_s25 = smov 256   ;;  %s7154_s9 = smov 16  }
  0x3f   :  { %123 = dma.hbm_to_vmem [thread:$0]  %s8499_s17, 2048, %s118_s3, [#allocation11], %s7153_s25, %s7153_s25, %s7154_s9  }
  0x40   :  { %s8518_s0 = sld [smem:[#allocation24_spill]] }
  0x46   :  { %s7051_s24 = scalar_lea.hbm %s8518_s0, 16384 }
  0x47   :  { %p7052_p10 = scmp.ne.s32.totalorder %s8518_s0, %s7051_s24  ;;  %p7055_p11 = scmp.lt.u32.totalorder %s7051_s24, %s8518_s0 }
  0x49   :  { %p7057_p12 = pnand %p7055_p11, %p7052_p10 }
  0x4b   :  { %7060 = shalt.err (!%p7057_p12)
}
  0x4c   :  { %s7061_s6 = scalar_lea.vmem %s7320_s4, 16384  ;;  %p7066_p0 = scmp.lt.s32.totalorder %s7320_s4, %s7320_s4 }
  0x4d   :  { %p7062_p13 = scmp.ne.s32.totalorder %s7320_s4, %s7061_s6  ;;  %p7067_p1 = scmp.lt.s32.totalorder %s7061_s6, %s7061_s6 }
  0x4f   :  { %p7068_p2 = por %p7067_p1, %p7066_p0 }
  0x51   :  { %p7069_p3 = pnand %p7068_p2, %p7062_p13 }
  0x53   :  { %7072 = shalt.err (!%p7069_p3)
}
  0x54   :  { %57 = dma.hbm_to_vmem [thread:$0]  %s8518_s0, 16384, %s7320_s4, [#allocation3], %s7153_s25, %s7153_s25, %s7154_s9  }
  0x55   :  { %s7155_s27 = smov [#allocation6]   ;;  %s7156_s30 = smov [#allocation9]  }
  0x56   :  { %s77_s13 = sshll.u32 %s7155_s27, 4  ;;  %s104_s7 = sshll.u32 %s7156_s30, 4  ;;  %s78_s13 = int_to_ptr.vmem [resolvable:$true] %s77_s13  ;;  %s105_s7 = int_to_ptr.vmem [resolvable:$true] %s104_s7 }
  0x57   :  { %s7073_s24 = scalar_lea.hbm %s8493_s11, 2048 }
  0x58   :  { %p7074_p4 = scmp.ne.s32.totalorder %s8493_s11, %s7073_s24  ;;  %p7077_p5 = scmp.lt.u32.totalorder %s7073_s24, %s8493_s11 }
  0x5a   :  { %p7079_p6 = pnand %p7077_p5, %p7074_p4 }
  0x5c   :  { %7082 = shalt.err (!%p7079_p6)
}
  0x5d   :  { %s7083_s4 = scalar_lea.vmem %s78_s13, 2048  ;;  %p7088_p8 = scmp.lt.s32.totalorder %s78_s13, %s78_s13 }
  0x5e   :  { %p7084_p7 = scmp.ne.s32.totalorder %s78_s13, %s7083_s4  ;;  %p7089_p9 = scmp.lt.s32.totalorder %s7083_s4, %s7083_s4 }
  0x60   :  { %p7090_p10 = por %p7089_p9, %p7088_p8 }
  0x62   :  { %p7091_p11 = pnand %p7090_p10, %p7084_p7 }
  0x64   :  { %7094 = shalt.err (!%p7091_p11)
}
  0x65   :  { %83 = dma.hbm_to_vmem [thread:$0]  %s8493_s11, 2048, %s78_s13, [#allocation5], %s7153_s25, %s7153_s25, %s7154_s9  }
  0x66   :  { %s7095_s27 = scalar_lea.hbm %s8496_s14, 16 }
  0x67   :  { %p7096_p12 = scmp.ne.s32.totalorder %s8496_s14, %s7095_s27  ;;  %p7099_p13 = scmp.lt.u32.totalorder %s7095_s27, %s8496_s14 }
  0x69   :  { %p7101_p0 = pnand %p7099_p13, %p7096_p12 }
  0x6b   :  { %7104 = shalt.err (!%p7101_p0)
}
  0x6c   :  { %s7105_s5 = scalar_lea.vmem %s105_s7, 16  ;;  %s7109_s1 = scalar_lea.vmem %s105_s7, 32 }
  0x6d   :  { %p7106_p1 = scmp.ne.s32.totalorder %s105_s7, %s7105_s5  ;;  %p7110_p2 = scmp.lt.s32.totalorder %s105_s7, %s105_s7 }
  0x6e   :  { %p7111_p3 = scmp.lt.s32.totalorder %s7109_s1, %s7105_s5 }
  0x70   :  { %p7112_p4 = por %p7111_p3, %p7110_p2 }
  0x72   :  { %p7113_p5 = pnand %p7112_p4, %p7106_p1 }
  0x74   :  { %7116 = shalt.err (!%p7113_p5)
}
  0x75   :  { %107 = dma.hbm_to_vmem [thread:$0]  %s8496_s14, 16, %s105_s7, [#allocation8]  }
  0x76   :  { %s7157_s13 = smov [#allocation12]   ;;  %s7117_s0 = scalar_lea.hbm %s8503_s21, 16384 }
  0x77   :  { %s135_s26 = sshll.u32 %s7157_s13, 4  ;;  %p7118_p6 = scmp.ne.s32.totalorder %s8503_s21, %s7117_s0  ;;  %s136_s26 = int_to_ptr.vmem [resolvable:$true] %s135_s26 }
  0x78   :  { %p7121_p7 = scmp.lt.u32.totalorder %s7117_s0, %s8503_s21 }
  0x7a   :  { %p7123_p8 = pnand %p7121_p7, %p7118_p6 }
  0x7c   :  { %7126 = shalt.err (!%p7123_p8)
}
  0x7d   :  { %s7127_s30 = scalar_lea.vmem %s136_s26, 16384  ;;  %p7132_p10 = scmp.lt.s32.totalorder %s136_s26, %s136_s26 }
  0x7e   :  { %p7128_p9 = scmp.ne.s32.totalorder %s136_s26, %s7127_s30  ;;  %p7133_p11 = scmp.lt.s32.totalorder %s7127_s30, %s7127_s30 }
  0x80   :  { %p7134_p12 = por %p7133_p11, %p7132_p10 }
  0x82   :  { %p7135_p13 = pnand %p7134_p12, %p7128_p9 }
  0x84   :  { %7138 = shalt.err (!%p7135_p13)
}
  0x85   :  { %s7158_s14 = smov 512   ;;  %s7159_s7 = smov 32  }
  0x86   :  { %141 = dma.hbm_to_vmem [thread:$0]  %s8503_s21, 16384, %s136_s26, [#allocation11], %s7158_s14, %s7158_s14, %s7159_s7  }
  0x87   :  { %7139 = dma.done.wait [#allocation3], 16384  }
  0x88   :  { %7140 = vsyncadd [#allocation3], 4294950912 }
  0x89   :  { %7141 = dma.done.wait [#allocation5], 2064  }
  0x8a   :  { %7142 = vsyncadd [#allocation5], 4294965232 }
  0x8b   :  { %7143 = dma.done.wait [#allocation8], 1040  }
  0x8c   :  { %7144 = vsyncadd [#allocation8], 4294966256 }
  0x8d   :  { %7145 = dma.done.wait [#allocation11], 18432  }
  0x8e   :  { %7146 = vsyncadd [#allocation11], 4294948864  ;;  %s8519_s1 = sld [smem:[#allocation18_spill]]  ;;  %s8520_s13 = sld [smem:[#allocation17_spill]]  ;;  %vm360_vm0 = vcmask 1040384   ;;  %vm362_vm1 = vcmask 1041408  }
  0x8f   :  { %s8521_s26 = sld [smem:[#allocation20_spill]]  ;;  %s8522_s27 = sld [smem:[#allocation19_spill]]  ;;  %vm364_vm2 = vcmask 1042432   ;;  %vm366_vm3 = vcmask 1043456   ;;  %vm368_vm4 = vcmask 1044480   ;;  %vm370_vm5 = vcmask 1045504  }
  0x90   :  { %vm372_vm6 = vcmask 1046528   ;;  %vm418_vm7 = vcmask 523264   ;;  %vm7162_vm8 = vmmov 0   ;;  %s8523_s21 = sld [smem:[#allocation21_spill]]  ;;  %vm505_vm9 = vcmask 130048   ;;  %s7163_s4 = smov 112  }
  0x91   :  { %vm581_vm10 = vcmask 27648   ;;  %s7164_s0 = smov 48   ;;  %vm593_vm11 = vcmask 31744   ;;  %s7165_s6 = smov 96   ;;  %vm1184_vm12 = vcmask 261120   ;;  %vm1186_vm13 = vcmask 392192  }
  0x92   :  { %s7166_s17 = smov 80   ;;  %s8525_s28 = sld [smem:[#allocation23_spill]] }
  0x94   :  { %v167_v0 = vld [vmem:[%s8519_s1 + $0x8] sm:$0xff]  ;;  %v169_v1 = vld [vmem:[%s8519_s1 + $0x18] sm:$0xff]  ;;  %v166_v2 = vld [vmem:[%s8519_s1] sm:$0xff] }
  0x95   :  { %v6411_v3 = vpack.c.bf16 %v169_v1, %v167_v0  ;;  %v168_v4 = vld [vmem:[%s8519_s1 + $0x10] sm:$0xff]  ;;  %v171_v5 = vld [vmem:[%s8519_s1 + $0x28] sm:$0xff]  ;;  %v173_v6 = vld [vmem:[%s8519_s1 + $0x38] sm:$0xff] }
  0x96   :  { %v6413_v7 = vpack.c.bf16 %v168_v4, %v166_v2  ;;  %v6415_v8 = vpack.c.bf16 %v173_v6, %v171_v5  ;;  %v170_v9 = vld [vmem:[%s8519_s1 + $0x20] sm:$0xff]  ;;  %v172_v10 = vld [vmem:[%s8519_s1 + $0x30] sm:$0xff]  ;;  %v175_v11 = vld [vmem:[%s8519_s1 + $0x48] sm:$0xff] }
  0x97   :  { %6412 = vmatprep.subr.bf16.mxu0 %v6411_v3  ;;  %v177_v12 = vld [vmem:[%s8519_s1 + $0x58] sm:$0xff]  ;;  %v6417_v13 = vpack.c.bf16 %v172_v10, %v170_v9  ;;  %v174_v15 = vld [vmem:[%s8519_s1 + $0x40] sm:$0xff]  ;;  %v176_v16 = vld [vmem:[%s8519_s1 + $0x50] sm:$0xff] }
  0x98   :  { %6414 = vmatpush1.bf16.msra.mxu0 %v6413_v7  ;;  %v6419_v14 = vpack.c.bf16 %v177_v12, %v175_v11  ;;  %v179_v17 = vld [vmem:[%s8519_s1 + $0x68] sm:$0xff]  ;;  %v181_v18 = vld [vmem:[%s8519_s1 + $0x78] sm:$0xff]  ;;  %v6421_v19 = vpack.c.bf16 %v176_v16, %v174_v15  ;;  %v178_v21 = vld [vmem:[%s8519_s1 + $0x60] sm:$0xff] }
  0x99   :  { %6416 = vmatprep.subr.bf16.mxu0 %v6415_v8  ;;  %v6423_v20 = vpack.c.bf16 %v181_v18, %v179_v17  ;;  %v180_v22 = vld [vmem:[%s8519_s1 + $0x70] sm:$0xff]  ;;  %v183_v23 = vld [vmem:[%s8519_s1 + $0x88] sm:$0xff]  ;;  %v185_v24 = vld [vmem:[%s8519_s1 + $0x98] sm:$0xff] }
  0x9a   :  { %v6425_v25 = vpack.c.bf16 %v180_v22, %v178_v21  ;;  %v6427_v26 = vpack.c.bf16 %v185_v24, %v183_v23  ;;  %v182_v27 = vld [vmem:[%s8519_s1 + $0x80] sm:$0xff]  ;;  %v184_v28 = vld [vmem:[%s8519_s1 + $0x90] sm:$0xff]  ;;  %v187_v29 = vld [vmem:[%s8519_s1 + $0xa8] sm:$0xff] }
  0x9b   :  { %v189_v30 = vld [vmem:[%s8519_s1 + $0xb8] sm:$0xff]  ;;  %v6429_v31 = vpack.c.bf16 %v184_v28, %v182_v27  ;;  %v186_v33 = vld [vmem:[%s8519_s1 + $0xa0] sm:$0xff]  ;;  %v188_v34 = vld [vmem:[%s8519_s1 + $0xb0] sm:$0xff] }
  0x9c   :  { %6418 = vmatpush1.bf16.msra.mxu0 %v6417_v13  ;;  %v6431_v32 = vpack.c.bf16 %v189_v30, %v187_v29  ;;  %v191_v35 = vld [vmem:[%s8519_s1 + $0xc8] sm:$0xff]  ;;  %v193_v36 = vld [vmem:[%s8519_s1 + $0xd8] sm:$0xff]  ;;  %v6433_v37 = vpack.c.bf16 %v188_v34, %v186_v33  ;;  %v190_v39 = vld [vmem:[%s8519_s1 + $0xc0] sm:$0xff] }
  0x9d   :  { %6420 = vmatprep.subr.bf16.mxu0 %v6419_v14  ;;  %v6435_v38 = vpack.c.bf16 %v193_v36, %v191_v35  ;;  %v192_v40 = vld [vmem:[%s8519_s1 + $0xd0] sm:$0xff]  ;;  %v7484_v41 = vld [vmem:[%s8520_s13] sm:$0xff]  ;;  %v195_v42 = vld [vmem:[%s8519_s1 + $0xe8] sm:$0xff]  ;;  %s7161_s13 = smov 64  }
  0x9e   :  { %v197_v43 = vld [vmem:[%s8519_s1 + $0xf8] sm:$0xff]  ;;  %v243_v44 = vcombine.high %v7484_v41, %v7484_v41  ;;  %v6437_v45 = vpack.c.bf16 %v192_v40, %v190_v39  ;;  %v194_v47 = vld [vmem:[%s8519_s1 + $0xe0] sm:$0xff]  ;;  %v196_v48 = vld [vmem:[%s8519_s1 + $0xf0] sm:$0xff] }
  0x9f   :  { %v6439_v46 = vpack.c.bf16 %v197_v43, %v195_v42  ;;  %v199_v49 = vld [vmem:[%s8519_s1 + $0x108] sm:$0xff]  ;;  %v201_v50 = vld [vmem:[%s8519_s1 + $0x118] sm:$0xff]  ;;  %v6441_v51 = vpack.c.bf16 %v196_v48, %v194_v47  ;;  %v198_v53 = vld [vmem:[%s8519_s1 + $0x100] sm:$0xff] }
  0xa0   :  { %6422 = vmatpush1.bf16.msra.mxu0 %v6421_v19  ;;  %309 = vmatprep.mubr.f32.mxu0 %v243_v44  ;;  %v6443_v52 = vpack.c.bf16 %v201_v50, %v199_v49  ;;  %v200_v54 = vld [vmem:[%s8519_s1 + $0x110] sm:$0xff]  ;;  %v203_v55 = vld [vmem:[%s8519_s1 + $0x128] sm:$0xff]  ;;  %v205_v56 = vld [vmem:[%s8519_s1 + $0x138] sm:$0xff] }
  0xa1   :  { %6424 = vmatprep.subr.bf16.mxu0 %v6423_v20  ;;  %v6445_v57 = vpack.c.bf16 %v200_v54, %v198_v53  ;;  %v6447_v58 = vpack.c.bf16 %v205_v56, %v203_v55  ;;  %v202_v59 = vld [vmem:[%s8519_s1 + $0x120] sm:$0xff]  ;;  %v204_v60 = vld [vmem:[%s8519_s1 + $0x130] sm:$0xff]  ;;  %v207_v61 = vld [vmem:[%s8519_s1 + $0x148] sm:$0xff] }
  0xa2   :  { %v209_v62 = vld [vmem:[%s8519_s1 + $0x158] sm:$0xff]  ;;  %v6449_v63 = vpack.c.bf16 %v204_v60, %v202_v59  ;;  %v206_v1 = vld [vmem:[%s8519_s1 + $0x140] sm:$0xff]  ;;  %v208_v2 = vld [vmem:[%s8519_s1 + $0x150] sm:$0xff] }
  0xa3   :  { %v6451_v0 = vpack.c.bf16 %v209_v62, %v207_v61  ;;  %v211_v3 = vld [vmem:[%s8519_s1 + $0x168] sm:$0xff]  ;;  %v213_v4 = vld [vmem:[%s8519_s1 + $0x178] sm:$0xff]  ;;  %v6453_v5 = vpack.c.bf16 %v208_v2, %v206_v1  ;;  %v210_v7 = vld [vmem:[%s8519_s1 + $0x160] sm:$0xff] }
  0xa4   :  { %6426 = vmatpush1.bf16.msra.mxu0 %v6425_v25  ;;  %v6455_v6 = vpack.c.bf16 %v213_v4, %v211_v3  ;;  %v212_v8 = vld [vmem:[%s8519_s1 + $0x170] sm:$0xff]  ;;  %v215_v9 = vld [vmem:[%s8519_s1 + $0x188] sm:$0xff]  ;;  %v217_v10 = vld [vmem:[%s8519_s1 + $0x198] sm:$0xff]  ;;  %v7160_v4 = vmov 0.0  }
  0xa5   :  { %6428 = vmatprep.subr.bf16.mxu0 %v6427_v26  ;;  %v6457_v11 = vpack.c.bf16 %v212_v8, %v210_v7  ;;  %v6459_v12 = vpack.c.bf16 %v217_v10, %v215_v9  ;;  %v214_v13 = vld [vmem:[%s8519_s1 + $0x180] sm:$0xff]  ;;  %v216_v14 = vld [vmem:[%s8519_s1 + $0x190] sm:$0xff]  ;;  %v219_v15 = vld [vmem:[%s8519_s1 + $0x1a8] sm:$0xff]  ;;  %489 = vmatprep.mubr.f32.mxu1 %v7160_v4 }
  0xa6   :  { %v221_v16 = vld [vmem:[%s8519_s1 + $0x1b8] sm:$0xff]  ;;  %v6461_v17 = vpack.c.bf16 %v216_v14, %v214_v13  ;;  %v218_v19 = vld [vmem:[%s8519_s1 + $0x1a0] sm:$0xff]  ;;  %v220_v20 = vld [vmem:[%s8519_s1 + $0x1b0] sm:$0xff] }
  0xa7   :  { %v6463_v18 = vpack.c.bf16 %v221_v16, %v219_v15  ;;  %v223_v21 = vld [vmem:[%s8519_s1 + $0x1c8] sm:$0xff]  ;;  %v225_v22 = vld [vmem:[%s8519_s1 + $0x1d8] sm:$0xff]  ;;  %v6465_v23 = vpack.c.bf16 %v220_v20, %v218_v19  ;;  %v222_v25 = vld [vmem:[%s8519_s1 + $0x1c0] sm:$0xff] }
  0xa8   :  { %6430 = vmatpush1.bf16.msra.mxu0 %v6429_v31  ;;  %v6467_v24 = vpack.c.bf16 %v225_v22, %v223_v21  ;;  %v224_v26 = vld [vmem:[%s8519_s1 + $0x1d0] sm:$0xff]  ;;  %v227_v27 = vld [vmem:[%s8519_s1 + $0x1e8] sm:$0xff]  ;;  %v229_v28 = vld [vmem:[%s8519_s1 + $0x1f8] sm:$0xff] }
  0xa9   :  { %6432 = vmatprep.subr.bf16.mxu0 %v6431_v32  ;;  %v6469_v29 = vpack.c.bf16 %v224_v26, %v222_v25  ;;  %v6471_v30 = vpack.c.bf16 %v229_v28, %v227_v27  ;;  %v226_v31 = vld [vmem:[%s8519_s1 + $0x1e0] sm:$0xff]  ;;  %v228_v32 = vld [vmem:[%s8519_s1 + $0x1f0] sm:$0xff]  ;;  %v382_v34 = vld [vmem:[%s8521_s26 + $0x8] sm:$0xff] }
  0xaa   :  { %v6473_v33 = vpack.c.bf16 %v228_v32, %v226_v31  ;;  %v384_v35 = vld [vmem:[%s8521_s26 + $0x18] sm:$0xff]  ;;  %v381_v36 = vld [vmem:[%s8521_s26] sm:$0xff]  ;;  %v386_v39 = vld [vmem:[%s8521_s26 + $0x28] sm:$0xff] }
  0xab   :  { %v388_v40 = vld [vmem:[%s8521_s26 + $0x38] sm:$0xff]  ;;  %v385_v43 = vld [vmem:[%s8521_s26 + $0x20] sm:$0xff]  ;;  %v387_v44 = vld [vmem:[%s8521_s26 + $0x30] sm:$0xff] }
  0xac   :  { %6434 = vmatpush1.bf16.msra.mxu0 %v6433_v37  ;;  %v6475_v37 = vpack.c.bf16 %v384_v35, %v382_v34  ;;  %v6479_v42 = vpack.c.bf16 %v388_v40, %v386_v39  ;;  %v390_v48 = vld [vmem:[%s8521_s26 + $0x48] sm:$0xff]  ;;  %v392_v49 = vld [vmem:[%s8521_s26 + $0x58] sm:$0xff]  ;;  %v230_v55 = vld [vmem:[%s8522_s27] sm:$0x3]  ;;  %s8524_s27 = sld [smem:[#allocation22_spill]] }
  0xad   :  { %6436 = vmatprep.subr.bf16.mxu0 %v6435_v38  ;;  %v383_v38 = vld [vmem:[%s8521_s26 + $0x10] sm:$0xff]  ;;  %v6483_v50 = vpack.c.bf16 %v392_v49, %v390_v48  ;;  %v393_v61 = vld [vmem:[%s8521_s26 + $0x60] sm:$0xff] }
  0xae   :  { %6476 = vmatprep.subr.bf16.mxu1 %v6475_v37  ;;  %v395_v62 = vld [vmem:[%s8521_s26 + $0x70] sm:$0xff]  ;;  %v397_v40 = vld [vmem:[%s8523_s21] sm:$0x3] }
  0xb0   :  { %6438 = vmatpush1.bf16.msra.mxu0 %v6437_v45  ;;  %v6481_v45 = vpack.c.bf16 %v387_v44, %v385_v43 }
  0xb1   :  { %6440 = vmatprep.subr.bf16.mxu0 %v6439_v46  ;;  %v232_v46 = vlaneseq }
  0xb3   :  { %v7621_v47 = vshrl.u32 %v232_v46, 7 }
  0xb4   :  { %6442 = vmatpush1.bf16.msra.mxu0 %v6441_v51  ;;  %v389_v51 = vld [vmem:[%s8521_s26 + $0x40] sm:$0xff] }
  0xb5   :  { %6444 = vmatprep.subr.bf16.mxu0 %v6443_v52  ;;  %v391_v52 = vld [vmem:[%s8521_s26 + $0x50] sm:$0xff]  ;;  %v7636_v54 = vsub.s32 0, %v7621_v47  ;;  %v7642_v56 = vsub.s32 1, %v7621_v47 }
  0xb6   :  { %v6485_v53 = vpack.c.bf16 %v391_v52, %v389_v51 }
  0xb7   :  { %v235_v59 = vrot.slane %v230_v55, %v7636_v54 }
  0xb8   :  { %6446 = vmatpush1.bf16.msra.mxu0 %v6445_v57  ;;  %v394_v57 = vld [vmem:[%s8521_s26 + $0x68] sm:$0xff] }
  0xb9   :  { %6448 = vmatprep.subr.bf16.mxu0 %v6447_v58  ;;  %v396_v58 = vld [vmem:[%s8521_s26 + $0x78] sm:$0xff] }
  0xba   :  { %v6487_v60 = vpack.c.bf16 %v396_v58, %v394_v57 }
  0xbc   :  { %6450 = vmatpush1.bf16.msra.mxu0 %v6449_v63  ;;  %v6489_v63 = vpack.c.bf16 %v395_v62, %v393_v61 }
  0xbd   :  { %6452 = vmatprep.subr.bf16.mxu0 %v6451_v0  ;;  %v239_v0 = vrot.slane %v230_v55, %v7642_v56 }
  0xc0   :  { %6454 = vmatpush1.bf16.msra.mxu0 %v6453_v5 }
  0xc1   :  { %6456 = vmatprep.subr.bf16.mxu0 %v6455_v6 }
  0xc4   :  { %6458 = vmatpush1.bf16.msra.mxu0 %v6457_v11 }
  0xc5   :  { %6460 = vmatprep.subr.bf16.mxu0 %v6459_v12 }
  0xc8   :  { %6462 = vmatpush1.bf16.msra.mxu0 %v6461_v17 }
  0xc9   :  { %6464 = vmatprep.subr.bf16.mxu0 %v6463_v18 }
  0xcc   :  { %6466 = vmatpush1.bf16.msra.mxu0 %v6465_v23 }
  0xcd   :  { %6468 = vmatprep.subr.bf16.mxu0 %v6467_v24 }
  0xd0   :  { %6470 = vmatpush1.bf16.msra.mxu0 %v6469_v29 }
  0xd1   :  { %6472 = vmatprep.subr.bf16.mxu0 %v6471_v30 }
  0xd4   :  { %6474 = vmatpush1.bf16.msra.mxu0 %v6473_v33 }
  0xd5   :  { %6188 = vmatprep.subr.mxu0 %v7160_v4 }
  0xd7   :  { %310 = vmatmul.mubr.f32.vlgmr.msra.gmra.mrb[0].mxu0 %v7484_v41  ;;  %v6477_v41 = vpack.c.bf16 %v383_v38, %v381_v36 }
  0xd8   :  { %6190 = vmatprep.mubr.msk.f32.mxu0 %vm7162_vm8, %v7160_v4 }
  0xd9   :  { %6478 = vmatpush1.bf16.msra.mxu1 %v6477_v41  ;;  %v411_v41 = vrot.slane %v397_v40, %v7636_v54 }
  0xda   :  { %6480 = vmatprep.subr.bf16.mxu1 %v6479_v42 }
  0xdd   :  { %6482 = vmatpush1.bf16.msra.mxu1 %v6481_v45  ;;  %v415_v45 = vrot.slane %v397_v40, %v7642_v56 }
  0xde   :  { %6484 = vmatprep.subr.bf16.mxu1 %v6483_v50 }
  0xe1   :  { %6486 = vmatpush1.bf16.msra.mxu1 %v6485_v53 }
  0xe2   :  { %6488 = vmatprep.subr.bf16.mxu1 %v6487_v60 }
  0xe5   :  { %6490 = vmatpush1.bf16.msra.mxu1 %v6489_v63 }
  0xe6   :  { %6133 = vmatprep.subr.mxu1 %v7160_v4 }
 0x1aa   :  { %v311_v1 = vpop.f32.mrb[0].mxu0 }
 0x1ab   :  { %v312_v2 = vadd.f32 %v311_v1, %v235_v59  ;;  %v313_v3 = vpop.f32.mrb[1].mxu0 }
 0x1ac   :  { %v314_v5 = vadd.f32 %v313_v3, %v239_v0 }
 0x1ad   :  { %v330_v6 = vrot.slane %v312_v2, 4  ;;  %v317_v7 = vrot.slane %v312_v2, 7  ;;  %v342_v11 = vrot.slane %v312_v2, 1  ;;  %v351_v13 = vrot.slane %v312_v2, 6 }
 0x1ae   :  { %v336_v8 = vrot.slane %v314_v5, 2  ;;  %v324_v9 = vrot.slane %v314_v5, 5  ;;  %v346_v10 = vrot.slane %v314_v5, 7  ;;  %v356_v12 = vrot.slane %v314_v5, 4 }
 0x1af   :  { %331 = vrot.lane.b32.xlu1 %v330_v6, %s7161_s13  ;;  %318 = vrot.lane.b32.xlu0 %v317_v7, %s7161_s13  ;;  %v322_v17 = vrot.slane %v314_v5, 6  ;;  %v328_v19 = vrot.slane %v312_v2, 5  ;;  %v334_v24 = vrot.slane %v314_v5, 3  ;;  %v340_v26 = vrot.slane %v312_v2, 2 }
 0x1b3   :  { %337 = vrot.lane.b32.xlu1 %v336_v8, %s7161_s13  ;;  %325 = vrot.lane.b32.xlu0 %v324_v9, %s7161_s13 }
 0x1b7   :  { %347 = vrot.lane.b32.xlu1 %v346_v10, %s7161_s13  ;;  %343 = vrot.lane.b32.xlu0 %v342_v11, %s7161_s13 }
 0x1bb   :  { %357 = vrot.lane.b32.xlu1 %v356_v12, %s7161_s13  ;;  %352 = vrot.lane.b32.xlu0 %v351_v13, %s7161_s13 }
 0x221   :  { %v332_v14 = vpop.permute.xlu1 %331  ;;  %v319_v15 = vpop.permute.xlu0 %318 }
 0x222   :  { %v361_v16 = vsel %vm360_vm0, %v312_v2, %v319_v15 }
 0x223   :  { %v363_v20 = vsel %vm362_vm1, %v361_v16, %v322_v17 }
 0x225   :  { %v338_v18 = vpop.permute.xlu1 %337  ;;  %v326_v21 = vpop.permute.xlu0 %325 }
 0x226   :  { %v365_v22 = vsel %vm364_vm2, %v363_v20, %v326_v21 }
 0x227   :  { %v367_v23 = vsel %vm366_vm3, %v365_v22, %v328_v19 }
 0x228   :  { %v369_v25 = vsel %vm368_vm4, %v367_v23, %v332_v14 }
 0x229   :  { %v348_v27 = vpop.permute.xlu1 %347  ;;  %v344_v28 = vpop.permute.xlu0 %343  ;;  %v371_v29 = vsel %vm370_vm5, %v369_v25, %v334_v24 }
 0x22a   :  { %v374_v30 = vsel %vm360_vm0, %v340_v26, %v344_v28  ;;  %v373_v31 = vsel %vm372_vm6, %v371_v29, %v338_v18 }
 0x22b   :  { %v375_v32 = vsel %vm362_vm1, %v374_v30, %v314_v5  ;;  %5873 = vmatmul.mubr.msk.f32.vlgmr.msra.gmra.mrb[0].mxu1 %vm418_vm7, %v373_v31 }
 0x22c   :  { %v376_v33 = vsel %vm364_vm2, %v375_v32, %v348_v27  ;;  %495 = vmatprep.mubr.f32.mxu1 %v7160_v4 }
 0x22d   :  { %v377_v34 = vsel %vm366_vm3, %v376_v33, %v317_v7  ;;  %v353_v35 = vpop.permute.xlu0 %352  ;;  %v358_v37 = vpop.permute.xlu1 %357 }
 0x22e   :  { %v378_v36 = vsel %vm368_vm4, %v377_v34, %v353_v35 }
 0x22f   :  { %v379_v38 = vsel %vm370_vm5, %v378_v36, %v324_v9 }
 0x230   :  { %v380_v39 = vsel %vm372_vm6, %v379_v38, %v358_v37 }
 0x231   :  { %5874 = vmatmul.mubr.msk.f32.gmra.mrb[2].mxu1 %vm418_vm7, %v380_v39 }
 0x232   :  { %6135 = vmatprep.mubr.msk.f32.mxu1 %vm7162_vm8, %v7160_v4 }
 0x2fe   :  { %v491_v42 = vpop.f32.mrb[0].mxu1 }
 0x2ff   :  { %v7694_v43 = vadd.f32 %v491_v42, %v411_v41  ;;  %v493_v44 = vpop.f32.mrb[1].mxu1 }
 0x300   :  { %v7705_v52 = vadd.f32 %v493_v44, %v415_v45 }
 0x301   :  { %503 = vrot.lane.b32.xlu0 %v7694_v43, %s7161_s13 }
 0x304   :  { %v497_v46 = vpop.f32.mrb[2].mxu1 }
 0x305   :  { %v7699_v48 = vadd.f32 %v497_v46, %v411_v41  ;;  %v499_v49 = vpop.f32.mrb[3].mxu1 }
 0x306   :  { %v7701_v50 = vadd.f32 %v499_v49, %v415_v45  ;;  %v1188_v49 = vrot.slane %v7694_v43, 4 }
 0x373   :  { %v504_v51 = vpop.permute.xlu0 %503 }
 0x374   :  { %6134 = vmatpush3.xpose.msk.msra.mxu1 %vm505_vm9, %v504_v51 }
 0x375   :  { %6138 = vmatprep.subr.mxu1 %v7160_v4 }
 0x377   :  { %6136 = vmatmul.mubr.msk.f32.vlgmr.msra.gmra.mrb[4].mxu1 %vm505_vm9, %v7694_v43 }
 0x378   :  { %6139 = vmatpush3.msk.msra.mxu1 %vm366_vm3, %v7705_v52  ;;  %6140 = vmatprep.mubr.msk.f32.mxu1 %vm7162_vm8, %v7160_v4 }
 0x379   :  { %6143 = vmatprep.subr.mxu1 %v7160_v4 }
 0x44a   :  { %v576_v53 = vpop.f32.mrb[4].mxu1 }
 0x44b   :  { %v580_v55 = vmul.f32 0.25, %v576_v53  ;;  %v6137_v57 = vpop.f32.mrb[5].mxu1 }
 0x44d   :  { %v582_v58 = vsel %vm581_vm10, %v580_v55, -inf }
 0x44e   :  { %583 = vmax.xlane.f32.xlu1 %v582_v58 }
 0x45f   :  { %670 = vrot.lane.b32.xlu1 %v7694_v43, %s7163_s4 }
 0x4db   :  { %v584_v59 = vpop.xlane.xlu1 %583 }
 0x4dc   :  { %v585_v60 = vsub.f32 %v580_v55, %v584_v59 }
 0x4de   :  { %v586_v61 = vmul.f32 1.442695, %v585_v60 }
 0x4df   :  { %v671_v5 = vpop.permute.xlu1 %670 }
 0x4e0   :  { %6881 = vpow2.f32 %v586_v61 }
 0x4ea   :  { %v6882_v62 = vpop.eup %6881 }
 0x4eb   :  { %v588_v63 = vsel %vm581_vm10, %v6882_v62, 0.0 }
 0x4ec   :  { %589 = vadd.xlane.f32.xlu0 %v588_v63  ;;  %v1277_v63 = vrot.slane %v7705_v52, 4 }
 0x502   :  { %672 = vrot.lane.b32.xlu0 %v7694_v43, %s7164_s0 }
 0x579   :  { %v590_v0 = vpop.xlane.xlu0 %589 }
 0x57a   :  { %6883 = vrcp.f32 %v590_v0 }
 0x57d   :  { %v673_v3 = vpop.permute.xlu0 %672 }
 0x584   :  { %v6884_v1 = vpop.eup %6883 }
 0x585   :  { %v592_v2 = vmul.f32 %v6884_v1, %v6882_v62 }
 0x587   :  { %6141 = vmatmul.mubr.msk.f32.vlgmr.msra.gmra.mrb[6].mxu1 %vm593_vm11, %v592_v2 }
 0x588   :  { %6144 = vmatpush3.xpose.msk.msra.mxu1 %vm505_vm9, %v673_v3  ;;  %6145 = vmatprep.mubr.msk.f32.mxu1 %vm7162_vm8, %v7160_v4 }
 0x589   :  { %6148 = vmatprep.subr.mxu1 %v7160_v4 }
 0x58b   :  { %6146 = vmatmul.mubr.msk.f32.vlgmr.msra.gmra.mrb[8].mxu1 %vm505_vm9, %v671_v5 }
 0x58c   :  { %6150 = vmatprep.mubr.msk.f32.mxu1 %vm7162_vm8, %v7160_v4 }
 0x65a   :  { %v7728_v6 = vpop.f32.mrb[6].mxu1 }
 0x65b   :  { %v6142_v7 = vpop.f32.mrb[7].mxu1 }
 0x65e   :  { %v744_v8 = vpop.f32.mrb[8].mxu1 }
 0x65f   :  { %v748_v9 = vmul.f32 0.25, %v744_v8  ;;  %v6147_v10 = vpop.f32.mrb[9].mxu1 }
 0x661   :  { %v749_v11 = vsel %vm581_vm10, %v748_v9, -inf }
 0x662   :  { %750 = vmax.xlane.f32.xlu1 %v749_v11 }
 0x673   :  { %839 = vrot.lane.b32.xlu1 %v7694_v43, %s7159_s7 }
 0x677   :  { %837 = vrot.lane.b32.xlu1 %v7694_v43, %s7165_s6 }
 0x6ef   :  { %v751_v12 = vpop.xlane.xlu1 %750 }
 0x6f0   :  { %v752_v13 = vsub.f32 %v748_v9, %v751_v12 }
 0x6f2   :  { %v753_v14 = vmul.f32 1.442695, %v752_v13 }
 0x6f3   :  { %v840_v20 = vpop.permute.xlu1 %839 }
 0x6f4   :  { %6885 = vpow2.f32 %v753_v14 }
 0x6f7   :  { %v838_v22 = vpop.permute.xlu1 %837 }
 0x6fe   :  { %v6886_v15 = vpop.eup %6885 }
 0x6ff   :  { %v755_v16 = vsel %vm581_vm10, %v6886_v15, 0.0 }
 0x700   :  { %756 = vadd.xlane.f32.xlu0 %v755_v16 }
 0x716   :  { %760 = vrot.lane.b32.xlu0 %v7705_v52, %s7163_s4 }
 0x78d   :  { %v757_v17 = vpop.xlane.xlu0 %756 }
 0x78e   :  { %6887 = vrcp.f32 %v757_v17 }
 0x791   :  { %v761_v18 = vpop.permute.xlu0 %760 }
 0x792   :  { %6149 = vmatpush3.msk.msra.mxu1 %vm366_vm3, %v761_v18 }
 0x793   :  { %6153 = vmatprep.subr.mxu1 %v7160_v4 }
 0x798   :  { %v6888_v19 = vpop.eup %6887 }
 0x799   :  { %v759_v21 = vmul.f32 %v6888_v19, %v6886_v15 }
 0x79b   :  { %6151 = vmatmul.mubr.msk.f32.vlgmr.msra.gmra.mrb[10].mxu1 %vm593_vm11, %v759_v21 }
 0x79c   :  { %6154 = vmatpush3.xpose.msk.msra.mxu1 %vm505_vm9, %v840_v20  ;;  %6155 = vmatprep.mubr.msk.f32.mxu1 %vm7162_vm8, %v7160_v4 }
 0x79d   :  { %6158 = vmatprep.subr.mxu1 %v7160_v4 }
 0x79f   :  { %6156 = vmatmul.mubr.msk.f32.vlgmr.msra.gmra.mrb[12].mxu1 %vm505_vm9, %v838_v22 }
 0x7a0   :  { %6160 = vmatprep.mubr.msk.f32.mxu1 %vm7162_vm8, %v7160_v4 }
 0x86e   :  { %v7748_v23 = vpop.f32.mrb[10].mxu1 }
 0x86f   :  { %v6152_v24 = vpop.f32.mrb[11].mxu1 }
 0x872   :  { %v911_v25 = vpop.f32.mrb[12].mxu1 }
 0x873   :  { %v915_v26 = vmul.f32 0.25, %v911_v25  ;;  %v6157_v27 = vpop.f32.mrb[13].mxu1 }
 0x875   :  { %v916_v28 = vsel %vm581_vm10, %v915_v26, -inf }
 0x876   :  { %917 = vmax.xlane.f32.xlu0 %v916_v28 }
 0x88c   :  { %927 = vrot.lane.b32.xlu0 %v7705_v52, %s7165_s6 }
 0x890   :  { %1004 = vrot.lane.b32.xlu0 %v7694_v43, %s7166_s17 }
 0x903   :  { %v918_v29 = vpop.xlane.xlu0 %917 }
 0x904   :  { %v919_v30 = vsub.f32 %v915_v26, %v918_v29 }
 0x906   :  { %v920_v31 = vmul.f32 1.442695, %v919_v30 }
 0x907   :  { %v928_v32 = vpop.permute.xlu0 %927 }
 0x908   :  { %6889 = vpow2.f32 %v920_v31  ;;  %6159 = vmatpush3.msk.msra.mxu1 %vm366_vm3, %v928_v32 }
 0x909   :  { %6163 = vmatprep.subr.mxu1 %v7160_v4 }
 0x90b   :  { %v1005_v39 = vpop.permute.xlu0 %1004 }
 0x912   :  { %v6890_v33 = vpop.eup %6889 }
 0x913   :  { %v922_v34 = vsel %vm581_vm10, %v6890_v33, 0.0 }
 0x914   :  { %923 = vadd.xlane.f32.xlu1 %v922_v34 }
 0x925   :  { %1006 = vrot.lane.b32.xlu1 %v7694_v43, %s7154_s9 }
 0x9a1   :  { %v924_v35 = vpop.xlane.xlu1 %923 }
 0x9a2   :  { %6891 = vrcp.f32 %v924_v35 }
 0x9a5   :  { %v1007_v38 = vpop.permute.xlu1 %1006 }
 0x9ac   :  { %v6892_v36 = vpop.eup %6891 }
 0x9ad   :  { %v926_v37 = vmul.f32 %v6892_v36, %v6890_v33 }
 0x9af   :  { %6161 = vmatmul.mubr.msk.f32.vlgmr.msra.gmra.mrb[14].mxu1 %vm593_vm11, %v926_v37 }
 0x9b0   :  { %6164 = vmatpush3.xpose.msk.msra.mxu1 %vm505_vm9, %v1007_v38  ;;  %6165 = vmatprep.mubr.msk.f32.mxu1 %vm7162_vm8, %v7160_v4 }
 0x9b1   :  { %6168 = vmatprep.subr.mxu1 %v7160_v4 }
 0x9b3   :  { %6166 = vmatmul.mubr.msk.f32.vlgmr.msra.gmra.mrb[16].mxu1 %vm505_vm9, %v1005_v39 }
 0x9b4   :  { %6170 = vmatprep.mubr.msk.f32.mxu1 %vm7162_vm8, %v7160_v4 }
 0xa82   :  { %v7768_v40 = vpop.f32.mrb[14].mxu1 }
 0xa83   :  { %v6162_v41 = vpop.f32.mrb[15].mxu1 }
 0xa86   :  { %v1078_v42 = vpop.f32.mrb[16].mxu1 }
 0xa87   :  { %v1082_v44 = vmul.f32 0.25, %v1078_v42  ;;  %v6167_v45 = vpop.f32.mrb[17].mxu1 }
 0xa89   :  { %v1083_v46 = vsel %vm581_vm10, %v1082_v44, -inf }
 0xa8a   :  { %1084 = vmax.xlane.f32.xlu1 %v1083_v46 }
 0xa9b   :  { %1189 = vrot.lane.b32.xlu1 %v1188_v49, %s7161_s13 }
 0xb17   :  { %v1085_v51 = vpop.xlane.xlu1 %1084 }
 0xb18   :  { %v1086_v53 = vsub.f32 %v1082_v44, %v1085_v51 }
 0xb1a   :  { %v1087_v55 = vmul.f32 1.442695, %v1086_v53 }
 0xb1b   :  { %v1190_v62 = vpop.permute.xlu1 %1189 }
 0xb1c   :  { %6893 = vpow2.f32 %v1087_v55 }
 0xb26   :  { %v6894_v57 = vpop.eup %6893 }
 0xb27   :  { %v1089_v58 = vsel %vm581_vm10, %v6894_v57, 0.0 }
 0xb28   :  { %1090 = vadd.xlane.f32.xlu0 %v1089_v58 }
 0xb3e   :  { %1094 = vrot.lane.b32.xlu0 %v7705_v52, %s7166_s17  ;;  %v7804_v52 = vrot.slane %v7699_v48, 4 }
 0xbb5   :  { %v1091_v59 = vpop.xlane.xlu0 %1090 }
 0xbb6   :  { %6895 = vrcp.f32 %v1091_v59 }
 0xbb9   :  { %v1095_v60 = vpop.permute.xlu0 %1094 }
 0xbba   :  { %6169 = vmatpush3.msk.msra.mxu1 %vm366_vm3, %v1095_v60 }
 0xbbb   :  { %6173 = vmatprep.subr.mxu1 %v7160_v4 }
 0xbc0   :  { %v6896_v43 = vpop.eup %6895 }
 0xbc1   :  { %v1093_v61 = vmul.f32 %v6896_v43, %v6894_v57 }
 0xbc3   :  { %6171 = vmatmul.mubr.msk.f32.vlgmr.msra.gmra.mrb[18].mxu1 %vm593_vm11, %v1093_v61 }
 0xbc4   :  { %6174 = vmatpush3.xpose.msk.msra.mxu1 %vm505_vm9, %v1190_v62  ;;  %6175 = vmatprep.mubr.msk.f32.mxu1 %vm7162_vm8, %v7160_v4 }
 0xbc5   :  { %6178 = vmatprep.subr.mxu1 %v7160_v4 }
 0xbc7   :  { %6176 = vmatmul.mubr.msk.f32.vlgmr.msra.gmra.mrb[20].mxu1 %vm505_vm9, %v1188_v49 }
 0xbc8   :  { %6179 = vmatpush3.msk.msra.mxu1 %vm366_vm3, %v1277_v63  ;;  %6180 = vmatprep.mubr.msk.f32.mxu1 %vm7162_vm8, %v7160_v4 }
 0xbc9   :  { %6183 = vmatprep.subr.mxu1 %v7160_v4 }
 0xc96   :  { %v7789_v0 = vpop.f32.mrb[18].mxu1 }
 0xc97   :  { %v6172_v1 = vpop.f32.mrb[19].mxu1 }
 0xc9a   :  { %v1261_v2 = vpop.f32.mrb[20].mxu1 }
 0xc9b   :  { %v1265_v3 = vmul.f32 0.25, %v1261_v2  ;;  %v6177_v5 = vpop.f32.mrb[21].mxu1 }
 0xc9d   :  { %v1266_v7 = vsel %vm581_vm10, %v1265_v3, -inf }
 0xc9e   :  { %1267 = vmax.xlane.f32.xlu1 %v1266_v7 }
 0xcaf   :  { %1353 = vrot.lane.b32.xlu1 %v1188_v49, %s7163_s4 }
 0xcb3   :  { %1522 = vrot.lane.b32.xlu1 %v1188_v49, %s7159_s7 }
 0xcb7   :  { %1689 = vrot.lane.b32.xlu1 %v1188_v49, %s7154_s9 }
 0xcbb   :  { %1870 = vrot.lane.b32.xlu1 %v7699_v48, %s7161_s13 }
 0xcbf   :  { %2034 = vrot.lane.b32.xlu1 %v7699_v48, %s7163_s4 }
 0xcc3   :  { %2201 = vrot.lane.b32.xlu1 %v7699_v48, %s7165_s6 }
 0xcc7   :  { %2368 = vrot.lane.b32.xlu1 %v7699_v48, %s7166_s17 }
 0xccb   :  { %2717 = vrot.lane.b32.xlu1 %v7804_v52, %s7164_s0 }
 0xccf   :  { %2884 = vrot.lane.b32.xlu1 %v7804_v52, %s7159_s7 }
 0xcd3   :  { %3051 = vrot.lane.b32.xlu1 %v7804_v52, %s7154_s9 }
 0xcd7   :  { %1610 = vrot.lane.b32.xlu1 %v1277_v63, %s7165_s6 }
 0xcdb   :  { %1777 = vrot.lane.b32.xlu1 %v1277_v63, %s7166_s17 }
 0xd2b   :  { %v1268_v8 = vpop.xlane.xlu1 %1267 }
 0xd2c   :  { %v1269_v9 = vsub.f32 %v1265_v3, %v1268_v8 }
 0xd2e   :  { %v1270_v10 = vmul.f32 1.442695, %v1269_v9 }
 0xd2f   :  { %v1354_v13 = vpop.permute.xlu1 %1353 }
 0xd30   :  { %6897 = vpow2.f32 %v1270_v10 }
 0xd33   :  { %v1523_v16 = vpop.permute.xlu1 %1522 }
 0xd37   :  { %v1690_v19 = vpop.permute.xlu1 %1689 }
 0xd3a   :  { %v6898_v11 = vpop.eup %6897 }
 0xd3b   :  { %v1272_v12 = vsel %vm581_vm10, %v6898_v11, 0.0  ;;  %v1871_v24 = vpop.permute.xlu1 %1870 }
 0xd3c   :  { %1273 = vadd.xlane.f32.xlu0 %v1272_v12 }
 0xd3f   :  { %v2035_v26 = vpop.permute.xlu1 %2034 }
 0xd43   :  { %v2202_v29 = vpop.permute.xlu1 %2201 }
 0xd47   :  { %v2369_v31 = vpop.permute.xlu1 %2368 }
 0xd4b   :  { %v2718_v33 = vpop.permute.xlu1 %2717 }
 0xd4f   :  { %v2885_v35 = vpop.permute.xlu1 %2884 }
 0xd52   :  { %1355 = vrot.lane.b32.xlu0 %v1188_v49, %s7164_s0 }
 0xd53   :  { %v3052_v36 = vpop.permute.xlu1 %3051 }
 0xd56   :  { %1520 = vrot.lane.b32.xlu0 %v1188_v49, %s7165_s6 }
 0xd5a   :  { %1687 = vrot.lane.b32.xlu0 %v1188_v49, %s7166_s17 }
 0xd5e   :  { %2036 = vrot.lane.b32.xlu0 %v7699_v48, %s7164_s0 }
 0xd62   :  { %2203 = vrot.lane.b32.xlu0 %v7699_v48, %s7159_s7 }
 0xd66   :  { %2370 = vrot.lane.b32.xlu0 %v7699_v48, %s7154_s9 }
 0xd6a   :  { %2551 = vrot.lane.b32.xlu0 %v7804_v52, %s7161_s13 }
 0xd6e   :  { %2715 = vrot.lane.b32.xlu0 %v7804_v52, %s7163_s4 }
 0xd72   :  { %2882 = vrot.lane.b32.xlu0 %v7804_v52, %s7165_s6 }
 0xd76   :  { %3049 = vrot.lane.b32.xlu0 %v7804_v52, %s7166_s17 }
 0xd7a   :  { %1443 = vrot.lane.b32.xlu0 %v1277_v63, %s7163_s4 }
 0xdc9   :  { %v1274_v14 = vpop.xlane.xlu0 %1273 }
 0xdca   :  { %6899 = vrcp.f32 %v1274_v14 }
 0xdcd   :  { %v1356_v15 = vpop.permute.xlu0 %1355 }
 0xdd1   :  { %v1521_v17 = vpop.permute.xlu0 %1520 }
 0xdd4   :  { %v6900_v18 = vpop.eup %6899 }
 0xdd5   :  { %v1688_v20 = vpop.permute.xlu0 %1687  ;;  %v1276_v21 = vmul.f32 %v6900_v18, %v6898_v11 }
 0xdd7   :  { %6181 = vmatmul.mubr.msk.f32.vlgmr.msra.gmra.mrb[22].mxu1 %vm593_vm11, %v1276_v21 }
 0xdd8   :  { %6184 = vmatpush3.xpose.msk.msra.mxu1 %vm505_vm9, %v1356_v15  ;;  %6185 = vmatprep.mubr.msk.f32.mxu1 %vm7162_vm8, %v7160_v4 }
 0xdd9   :  { %v2037_v22 = vpop.permute.xlu0 %2036  ;;  %6193 = vmatprep.subr.mxu1 %v7160_v4 }
 0xddb   :  { %6186 = vmatmul.mubr.msk.f32.vlgmr.msra.gmra.mrb[24].mxu1 %vm505_vm9, %v1354_v13 }
 0xddc   :  { %6194 = vmatpush3.xpose.msk.msra.mxu1 %vm505_vm9, %v1523_v16  ;;  %6195 = vmatprep.mubr.msk.f32.mxu1 %vm7162_vm8, %v7160_v4 }
 0xddd   :  { %v2204_v25 = vpop.permute.xlu0 %2203  ;;  %6203 = vmatprep.subr.mxu1 %v7160_v4 }
 0xddf   :  { %6196 = vmatmul.mubr.msk.f32.vlgmr.msra.gmra.mrb[26].mxu1 %vm505_vm9, %v1521_v17 }
 0xde0   :  { %6204 = vmatpush3.xpose.msk.msra.mxu1 %vm505_vm9, %v1690_v19  ;;  %6205 = vmatprep.mubr.msk.f32.mxu1 %vm7162_vm8, %v7160_v4 }
 0xde1   :  { %v2371_v27 = vpop.permute.xlu0 %2370  ;;  %6213 = vmatprep.subr.mxu1 %v7160_v4 }
 0xde3   :  { %6206 = vmatmul.mubr.msk.f32.vlgmr.msra.gmra.mrb[28].mxu1 %vm505_vm9, %v1688_v20 }
 0xde4   :  { %6214 = vmatpush3.xpose.msk.msra.mxu1 %vm505_vm9, %v1871_v24  ;;  %6215 = vmatprep.mubr.msk.f32.mxu1 %vm7162_vm8, %v7160_v4 }
 0xde5   :  { %v2552_v28 = vpop.permute.xlu0 %2551  ;;  %6223 = vmatprep.subr.mxu1 %v7160_v4 }
 0xde7   :  { %6216 = vmatmul.mubr.msk.f32.vlgmr.msra.gmra.mrb[30].mxu1 %vm505_vm9, %v7699_v48 }
 0xde8   :  { %6224 = vmatpush3.xpose.msk.msra.mxu1 %vm505_vm9, %v2037_v22  ;;  %6225 = vmatprep.mubr.msk.f32.mxu1 %vm7162_vm8, %v7160_v4 }
 0xde9   :  { %v2716_v30 = vpop.permute.xlu0 %2715  ;;  %6233 = vmatprep.subr.mxu1 %v7160_v4 }
 0xdeb   :  { %6226 = vmatmul.mubr.msk.f32.vlgmr.msra.gmra.mrb[32].mxu1 %vm505_vm9, %v2035_v26 }
 0xdec   :  { %6234 = vmatpush3.xpose.msk.msra.mxu1 %vm505_vm9, %v2204_v25  ;;  %6235 = vmatprep.mubr.msk.f32.mxu1 %vm7162_vm8, %v7160_v4 }
 0xded   :  { %v2883_v32 = vpop.permute.xlu0 %2882  ;;  %6243 = vmatprep.subr.mxu1 %v7160_v4 }
 0xdef   :  { %6236 = vmatmul.mubr.msk.f32.vlgmr.msra.gmra.mrb[34].mxu1 %vm505_vm9, %v2202_v29  ;;  %v7925_v29 = vpop.permute.xlu1 %1610 }
 0xdf0   :  { %6244 = vmatpush3.xpose.msk.msra.mxu1 %vm505_vm9, %v2371_v27  ;;  %6245 = vmatprep.mubr.msk.f32.mxu1 %vm7162_vm8, %v7160_v4 }
 0xdf1   :  { %v3050_v48 = vpop.permute.xlu0 %3049  ;;  %6253 = vmatprep.subr.mxu1 %v7160_v4 }
 0xdf3   :  { %6246 = vmatmul.mubr.msk.f32.vlgmr.msra.gmra.mrb[36].mxu1 %vm505_vm9, %v2369_v31 }
 0xdf4   :  { %6254 = vmatpush3.xpose.msk.msra.mxu1 %vm505_vm9, %v2552_v28  ;;  %6255 = vmatprep.mubr.msk.f32.mxu1 %vm7162_vm8, %v7160_v4 }
 0xdf5   :  { %v1444_v34 = vpop.permute.xlu0 %1443  ;;  %6263 = vmatprep.subr.mxu1 %v7160_v4 }
 0xdf6   :  { %6189 = vmatpush3.msk.msra.mxu0 %vm366_vm3, %v1444_v34 }
 0xdf7   :  { %6256 = vmatmul.mubr.msk.f32.vlgmr.msra.gmra.mrb[38].mxu1 %vm505_vm9, %v7804_v52  ;;  %6198 = vmatprep.subr.mxu0 %v7160_v4 }
 0xdf8   :  { %6264 = vmatpush3.xpose.msk.msra.mxu1 %vm505_vm9, %v2718_v33  ;;  %6265 = vmatprep.mubr.msk.f32.mxu1 %vm7162_vm8, %v7160_v4 }
 0xdf9   :  { %6273 = vmatprep.subr.mxu1 %v7160_v4 }
 0xdfb   :  { %6266 = vmatmul.mubr.msk.f32.vlgmr.msra.gmra.mrb[40].mxu1 %vm505_vm9, %v2716_v30  ;;  %v7927_v30 = vpop.permute.xlu1 %1777 }
 0xdfc   :  { %6274 = vmatpush3.xpose.msk.msra.mxu1 %vm505_vm9, %v2885_v35  ;;  %6275 = vmatprep.mubr.msk.f32.mxu1 %vm7162_vm8, %v7160_v4 }
 0xdfd   :  { %6283 = vmatprep.subr.mxu1 %v7160_v4 }
 0xdff   :  { %6276 = vmatmul.mubr.msk.f32.vlgmr.msra.gmra.mrb[42].mxu1 %vm505_vm9, %v2883_v32 }
 0xe00   :  { %6284 = vmatpush3.xpose.msk.msra.mxu1 %vm505_vm9, %v3052_v36  ;;  %6285 = vmatprep.mubr.msk.f32.mxu1 %vm7162_vm8, %v7160_v4 }
 0xe03   :  { %6286 = vmatmul.mubr.msk.f32.vlgmr.msra.gmra.mrb[44].mxu1 %vm505_vm9, %v3050_v48 }
 0xe04   :  { %3816 = vmatprep.mubr.f32.mxu1 %v7160_v4 }
 0xeaa   :  { %v7893_v37 = vpop.f32.mrb[22].mxu1 }
 0xeab   :  { %v6182_v38 = vpop.f32.mrb[23].mxu1 }
 0xeae   :  { %v1427_v39 = vpop.f32.mrb[24].mxu1 }
 0xeaf   :  { %v1431_v41 = vmul.f32 0.25, %v1427_v39  ;;  %v6187_v42 = vpop.f32.mrb[25].mxu1 }
 0xeb1   :  { %v1432_v44 = vsel %vm581_vm10, %v1431_v41, -inf }
 0xeb2   :  { %1433 = vmax.xlane.f32.xlu1 %v1432_v44  ;;  %v1594_v45 = vpop.f32.mrb[26].mxu1 }
 0xeb3   :  { %v1598_v46 = vmul.f32 0.25, %v1594_v45  ;;  %v6197_v49 = vpop.f32.mrb[27].mxu1 }
 0xeb5   :  { %v1599_v51 = vsel %vm581_vm10, %v1598_v46, -inf }
 0xeb6   :  { %1600 = vmax.xlane.f32.xlu0 %v1599_v51  ;;  %v1761_v53 = vpop.f32.mrb[28].mxu1 }
 0xeb7   :  { %v1765_v55 = vmul.f32 0.25, %v1761_v53  ;;  %v6207_v57 = vpop.f32.mrb[29].mxu1 }
 0xeb9   :  { %v1766_v58 = vsel %vm581_vm10, %v1765_v55, -inf }
 0xeba   :  { %1767 = vmax.xlane.f32.xlu0 %v1766_v58  ;;  %v1942_v59 = vpop.f32.mrb[30].mxu1 }
 0xebb   :  { %v1946_v60 = vmul.f32 0.25, %v1942_v59  ;;  %v6217_v43 = vpop.f32.mrb[31].mxu1 }
 0xebd   :  { %v1947_v61 = vsel %vm581_vm10, %v1946_v60, -inf }
 0xebe   :  { %1948 = vmax.xlane.f32.xlu1 %v1947_v61  ;;  %v2108_v62 = vpop.f32.mrb[32].mxu1 }
 0xebf   :  { %v2112_v63 = vmul.f32 0.25, %v2108_v62  ;;  %v6227_v1 = vpop.f32.mrb[33].mxu1 }
 0xec1   :  { %v2113_v2 = vsel %vm581_vm10, %v2112_v63, -inf }
 0xec2   :  { %2114 = vmax.xlane.f32.xlu0 %v2113_v2  ;;  %v2275_v3 = vpop.f32.mrb[34].mxu1 }
 0xec3   :  { %v2279_v5 = vmul.f32 0.25, %v2275_v3  ;;  %v6237_v7 = vpop.f32.mrb[35].mxu1 }
 0xec4   :  { %v7954_v7 = vrot.slane %v7701_v50, 4 }
 0xec5   :  { %v2280_v52 = vsel %vm581_vm10, %v2279_v5, -inf }
 0xec6   :  { %2281 = vmax.xlane.f32.xlu1 %v2280_v52  ;;  %v2442_v8 = vpop.f32.mrb[36].mxu1 }
 0xec7   :  { %v7901_v9 = vmul.f32 0.25, %v2442_v8  ;;  %v6247_v10 = vpop.f32.mrb[37].mxu1 }
 0xec9   :  { %v2447_v11 = vsel %vm581_vm10, %v7901_v9, -inf }
 0xeca   :  { %2448 = vmax.xlane.f32.xlu0 %v2447_v11  ;;  %v2623_v12 = vpop.f32.mrb[38].mxu1 }
 0xecb   :  { %v7905_v13 = vmul.f32 0.25, %v2623_v12  ;;  %v6257_v14 = vpop.f32.mrb[39].mxu1 }
 0xecd   :  { %v2628_v15 = vsel %vm581_vm10, %v7905_v13, -inf }
 0xece   :  { %2629 = vmax.xlane.f32.xlu1 %v2628_v15  ;;  %v2789_v16 = vpop.f32.mrb[40].mxu1 }
 0xecf   :  { %v7909_v17 = vmul.f32 0.25, %v2789_v16  ;;  %v6267_v18 = vpop.f32.mrb[41].mxu1 }
 0xed1   :  { %v2794_v19 = vsel %vm581_vm10, %v7909_v17, -inf }
 0xed2   :  { %2795 = vmax.xlane.f32.xlu0 %v2794_v19  ;;  %v2956_v20 = vpop.f32.mrb[42].mxu1 }
 0xed3   :  { %v7913_v21 = vmul.f32 0.25, %v2956_v20  ;;  %v6277_v22 = vpop.f32.mrb[43].mxu1 }
 0xed5   :  { %v2961_v24 = vsel %vm581_vm10, %v7913_v21, -inf }
 0xed6   :  { %2962 = vmax.xlane.f32.xlu1 %v2961_v24  ;;  %v3123_v25 = vpop.f32.mrb[44].mxu1 }
 0xed7   :  { %v7917_v26 = vmul.f32 0.25, %v3123_v25  ;;  %v6287_v27 = vpop.f32.mrb[45].mxu1 }
 0xed9   :  { %v3128_v28 = vsel %vm581_vm10, %v7917_v26, -inf }
 0xeda   :  { %3129 = vmax.xlane.f32.xlu0 %v3128_v28 }
 0xee7   :  { %2291 = vrot.lane.b32.xlu1 %v7701_v50, %s7165_s6 }
 0xef0   :  { %2124 = vrot.lane.b32.xlu0 %v7701_v50, %s7163_s4 }
 0xf3f   :  { %v1434_v31 = vpop.xlane.xlu1 %1433 }
 0xf40   :  { %v1435_v32 = vsub.f32 %v1431_v41, %v1434_v31 }
 0xf42   :  { %v1436_v48 = vmul.f32 1.442695, %v1435_v32 }
 0xf43   :  { %v1601_v33 = vpop.xlane.xlu0 %1600 }
 0xf44   :  { %6901 = vpow2.f32 %v1436_v48  ;;  %v1602_v34 = vsub.f32 %v1598_v46, %v1601_v33 }
 0xf46   :  { %v1603_v35 = vmul.f32 1.442695, %v1602_v34 }
 0xf47   :  { %v1768_v36 = vpop.xlane.xlu0 %1767 }
 0xf48   :  { %6903 = vpow2.f32 %v1603_v35  ;;  %v1769_v38 = vsub.f32 %v1765_v55, %v1768_v36 }
 0xf4a   :  { %v1770_v39 = vmul.f32 1.442695, %v1769_v38 }
 0xf4b   :  { %v1949_v42 = vpop.xlane.xlu1 %1948 }
 0xf4c   :  { %6905 = vpow2.f32 %v1770_v39  ;;  %v1950_v44 = vsub.f32 %v1946_v60, %v1949_v42 }
 0xf4e   :  { %v7929_v45 = vpop.eup %6901  ;;  %v1951_v49 = vmul.f32 1.442695, %v1950_v44 }
 0xf4f   :  { %v2115_v51 = vpop.xlane.xlu0 %2114  ;;  %v1438_v53 = vsel %vm581_vm10, %v7929_v45, 0.0 }
 0xf50   :  { %6907 = vpow2.f32 %v1951_v49  ;;  %v2116_v41 = vsub.f32 %v2112_v63, %v2115_v51  ;;  %1439 = vadd.xlane.f32.xlu1 %v1438_v53 }
 0xf52   :  { %v7933_v57 = vpop.eup %6903  ;;  %v2117_v46 = vmul.f32 1.442695, %v2116_v41 }
 0xf53   :  { %v2282_v58 = vpop.xlane.xlu1 %2281  ;;  %v1605_v55 = vsel %vm581_vm10, %v7933_v57, 0.0 }
 0xf54   :  { %6909 = vpow2.f32 %v2117_v46  ;;  %v2283_v59 = vsub.f32 %v2279_v5, %v2282_v58  ;;  %1606 = vadd.xlane.f32.xlu0 %v1605_v55 }
 0xf56   :  { %v7937_v60 = vpop.eup %6905  ;;  %v2284_v43 = vmul.f32 1.442695, %v2283_v59 }
 0xf57   :  { %v1772_v61 = vsel %vm581_vm10, %v7937_v60, 0.0  ;;  %v2449_v52 = vpop.xlane.xlu0 %2448 }
 0xf58   :  { %6911 = vpow2.f32 %v2284_v43  ;;  %1773 = vadd.xlane.f32.xlu1 %v1772_v61  ;;  %v2450_v8 = vsub.f32 %v7901_v9, %v2449_v52 }
 0xf5a   :  { %v7941_v62 = vpop.eup %6907  ;;  %v2451_v14 = vmul.f32 1.442695, %v2450_v8 }
 0xf5b   :  { %v1953_v63 = vsel %vm581_vm10, %v7941_v62, 0.0  ;;  %v2630_v10 = vpop.xlane.xlu1 %2629 }
 0xf5c   :  { %1954 = vadd.xlane.f32.xlu0 %v1953_v63  ;;  %v2631_v12 = vsub.f32 %v7905_v13, %v2630_v10  ;;  %6913 = vpow2.f32 %v2451_v14 }
 0xf5e   :  { %v7945_v1 = vpop.eup %6909  ;;  %v2632_v19 = vmul.f32 1.442695, %v2631_v12 }
 0xf5f   :  { %v2119_v2 = vsel %vm581_vm10, %v7945_v1, 0.0  ;;  %v2796_v11 = vpop.xlane.xlu0 %2795 }
 0xf60   :  { %2120 = vadd.xlane.f32.xlu1 %v2119_v2  ;;  %v2797_v15 = vsub.f32 %v7909_v17, %v2796_v11  ;;  %6915 = vpow2.f32 %v2632_v19  ;;  %v398_v19 = vld [vmem:[%s8524_s27] sm:$0xff] }
 0xf62   :  { %v7949_v3 = vpop.eup %6911  ;;  %v2798_v22 = vmul.f32 1.442695, %v2797_v15 }
 0xf63   :  { %v2286_v5 = vsel %vm581_vm10, %v7949_v3, 0.0  ;;  %v2963_v16 = vpop.xlane.xlu1 %2962 }
 0xf64   :  { %2287 = vadd.xlane.f32.xlu0 %v2286_v5  ;;  %v2964_v20 = vsub.f32 %v7913_v21, %v2963_v16  ;;  %6917 = vpow2.f32 %v2798_v22 }
 0xf66   :  { %v2965_v25 = vmul.f32 1.442695, %v2964_v20  ;;  %v7965_v27 = vpop.eup %6913  ;;  %v399_v20 = vld [vmem:[%s8524_s27 + $0x8] sm:$0xff] }
 0xf67   :  { %v3130_v18 = vpop.xlane.xlu0 %3129  ;;  %v2453_v17 = vsel %vm581_vm10, %v7965_v27, 0.0  ;;  %v2292_v34 = vpop.permute.xlu1 %2291 }
 0xf68   :  { %v3131_v24 = vsub.f32 %v7917_v26, %v3130_v18  ;;  %6919 = vpow2.f32 %v2965_v25 }
 0xf6a   :  { %v3132_v9 = vmul.f32 1.442695, %v3131_v24  ;;  %v7967_v13 = vpop.eup %6915  ;;  %v6491_v24 = vpack.c.bf16 %v399_v20, %v398_v19  ;;  %v3372_v19 = vld [vmem:[#allocation2 + $0x18] sm:$0xff]  ;;  %v3369_v20 = vld [vmem:[#allocation2] sm:$0xff] }
 0xf6b   :  { %v2634_v26 = vsel %vm581_vm10, %v7967_v13, 0.0  ;;  %v2125_v35 = vpop.permute.xlu0 %2124 }
 0xf6c   :  { %6921 = vpow2.f32 %v3132_v9 }
 0xf6e   :  { %v7971_v28 = vpop.eup %6917 }
 0xf6f   :  { %v2800_v31 = vsel %vm581_vm10, %v7971_v28, 0.0 }
 0xf71   :  { %2805 = vrot.lane.b32.xlu1 %v7954_v7, %s7163_s4 }
 0xf72   :  { %v7973_v21 = vpop.eup %6919 }
 0xf73   :  { %v2967_v48 = vsel %vm581_vm10, %v7973_v21, 0.0 }
 0xf76   :  { %v7979_v32 = vpop.eup %6921 }
 0xf77   :  { %v3134_v33 = vsel %vm581_vm10, %v7979_v32, 0.0 }
 0xf7a   :  { %2458 = vrot.lane.b32.xlu0 %v7701_v50, %s7166_s17 }
 0xf95   :  { %2454 = vadd.xlane.f32.xlu1 %v2453_v17 }
 0xf99   :  { %2635 = vadd.xlane.f32.xlu1 %v2634_v26  ;;  %2801 = vadd.xlane.f32.xlu0 %v2800_v31  ;;  %v400_v31 = vld [vmem:[%s8524_s27 + $0x10] sm:$0xff] }
 0xf9d   :  { %2968 = vadd.xlane.f32.xlu1 %v2967_v48  ;;  %3135 = vadd.xlane.f32.xlu0 %v3134_v33 }
 0xfae   :  { %3139 = vrot.lane.b32.xlu1 %v7954_v7, %s7166_s17 }
 0xfb2   :  { %1172 = vrot.lane.b32.xlu1 %v7748_v23, %s7154_s9 }
 0xfb3   :  { %2972 = vrot.lane.b32.xlu0 %v7954_v7, %s7165_s6 }
 0xfb6   :  { %1180 = vrot.lane.b32.xlu1 %v7789_v0, %s7164_s0 }
 0xfb7   :  { %1176 = vrot.lane.b32.xlu0 %v7768_v40, %s7159_s7 }
 0xfdd   :  { %v1440_v36 = vpop.xlane.xlu1 %1439 }
 0xfde   :  { %6923 = vrcp.f32 %v1440_v36 }
 0xfe1   :  { %v1607_v38 = vpop.xlane.xlu0 %1606 }
 0xfe2   :  { %6925 = vrcp.f32 %v1607_v38 }
 0xfe5   :  { %v1774_v39 = vpop.xlane.xlu1 %1773 }
 0xfe6   :  { %6927 = vrcp.f32 %v1774_v39 }
 0xfe8   :  { %v6924_v42 = vpop.eup %6923 }
 0xfe9   :  { %v1442_v23 = vmul.f32 %v6924_v42, %v7929_v45  ;;  %v1955_v44 = vpop.xlane.xlu0 %1954 }
 0xfea   :  { %6929 = vrcp.f32 %v1955_v44  ;;  %v405_v44 = vld [vmem:[%s8524_s27 + $0x38] sm:$0xff] }
 0xfeb   :  { %6191 = vmatmul.mubr.msk.f32.vlgmr.msra.gmra.mrb[2].mxu0 %vm593_vm11, %v1442_v23  ;;  %v404_v23 = vld [vmem:[%s8524_s27 + $0x30] sm:$0xff] }
 0xfec   :  { %v6926_v49 = vpop.eup %6925  ;;  %6199 = vmatpush3.msk.msra.mxu0 %vm366_vm3, %v7925_v29  ;;  %6200 = vmatprep.mubr.msk.f32.mxu0 %vm7162_vm8, %v7160_v4 }
 0xfed   :  { %v1609_v40 = vmul.f32 %v6926_v49, %v7933_v57  ;;  %v2121_v0 = vpop.xlane.xlu1 %2120  ;;  %6208 = vmatprep.subr.mxu0 %v7160_v4  ;;  %v6503_v49 = vpack.c.bf16 %v405_v44, %v404_v23  ;;  %v3386_v23 = vld [vmem:[#allocation2 + $0x88] sm:$0xff]  ;;  %v3388_v44 = vld [vmem:[#allocation2 + $0x98] sm:$0xff] }
 0xfee   :  { %6931 = vrcp.f32 %v2121_v0 }
 0xfef   :  { %6201 = vmatmul.mubr.msk.f32.vlgmr.msra.gmra.mrb[4].mxu0 %vm593_vm11, %v1609_v40 }
 0xff0   :  { %v6928_v45 = vpop.eup %6927  ;;  %6209 = vmatpush3.msk.msra.mxu0 %vm366_vm3, %v7927_v30  ;;  %6210 = vmatprep.mubr.msk.f32.mxu0 %vm7162_vm8, %v7160_v4 }
 0xff1   :  { %v1776_v29 = vmul.f32 %v6928_v45, %v7937_v60  ;;  %v2288_v51 = vpop.xlane.xlu0 %2287  ;;  %6218 = vmatprep.subr.mxu0 %v7160_v4  ;;  %v2806_v55 = vpop.permute.xlu1 %2805 }
 0xff2   :  { %6933 = vrcp.f32 %v2288_v51 }
 0xff3   :  { %6211 = vmatmul.mubr.msk.f32.vlgmr.msra.gmra.mrb[6].mxu0 %vm593_vm11, %v1776_v29 }
 0xff4   :  { %v6930_v53 = vpop.eup %6929  ;;  %6219 = vmatpush3.msk.msra.mxu0 %vm366_vm3, %v7701_v50  ;;  %6220 = vmatprep.mubr.msk.f32.mxu0 %vm7162_vm8, %v7160_v4 }
 0xff5   :  { %v1957_v30 = vmul.f32 %v6930_v53, %v7941_v62  ;;  %6228 = vmatprep.subr.mxu0 %v7160_v4  ;;  %v2459_v58 = vpop.permute.xlu0 %2458 }
 0xff7   :  { %6221 = vmatmul.mubr.msk.f32.vlgmr.msra.gmra.mrb[8].mxu0 %vm593_vm11, %v1957_v30 }
 0xff8   :  { %v6932_v41 = vpop.eup %6931  ;;  %6229 = vmatpush3.msk.msra.mxu0 %vm366_vm3, %v2125_v35  ;;  %6230 = vmatprep.mubr.msk.f32.mxu0 %vm7162_vm8, %v7160_v4  ;;  %v403_v35 = vld [vmem:[%s8524_s27 + $0x28] sm:$0xff] }
 0xff9   :  { %v2123_v57 = vmul.f32 %v6932_v41, %v7945_v1  ;;  %6238 = vmatprep.subr.mxu0 %v7160_v4 }
 0xffb   :  { %6231 = vmatmul.mubr.msk.f32.vlgmr.msra.gmra.mrb[10].mxu0 %vm593_vm11, %v2123_v57 }
 0xffc   :  { %v6934_v50 = vpop.eup %6933  ;;  %6239 = vmatpush3.msk.msra.mxu0 %vm366_vm3, %v2292_v34  ;;  %6240 = vmatprep.mubr.msk.f32.mxu0 %vm7162_vm8, %v7160_v4  ;;  %v402_v34 = vld [vmem:[%s8524_s27 + $0x20] sm:$0xff] }
 0xffd   :  { %v2290_v46 = vmul.f32 %v6934_v50, %v7949_v3  ;;  %6248 = vmatprep.subr.mxu0 %v7160_v4  ;;  %v6499_v38 = vpack.c.bf16 %v403_v35, %v402_v34  ;;  %v3382_v34 = vld [vmem:[#allocation2 + $0x68] sm:$0xff]  ;;  %v3384_v35 = vld [vmem:[#allocation2 + $0x78] sm:$0xff] }
 0xfff   :  { %6241 = vmatmul.mubr.msk.f32.vlgmr.msra.gmra.mrb[12].mxu0 %vm593_vm11, %v2290_v46 }
0x1000   :  { %6249 = vmatpush3.msk.msra.mxu0 %vm366_vm3, %v2459_v58  ;;  %6250 = vmatprep.mubr.msk.f32.mxu0 %vm7162_vm8, %v7160_v4 }
0x1001   :  { %6258 = vmatprep.subr.mxu0 %v7160_v4 }
0x1022   :  { %v2455_v59 = vpop.xlane.xlu1 %2454 }
0x1023   :  { %6935 = vrcp.f32 %v2455_v59 }
0x1026   :  { %v2636_v60 = vpop.xlane.xlu1 %2635  ;;  %v2802_v43 = vpop.xlane.xlu0 %2801 }
0x1027   :  { %6937 = vrcp.f32 %v2636_v60 }
0x1028   :  { %6939 = vrcp.f32 %v2802_v43 }
0x102a   :  { %v2969_v61 = vpop.xlane.xlu1 %2968  ;;  %v3136_v1 = vpop.xlane.xlu0 %3135 }
0x102b   :  { %6941 = vrcp.f32 %v2969_v61 }
0x102c   :  { %6943 = vrcp.f32 %v3136_v1 }
0x102d   :  { %v6936_v62 = vpop.eup %6935 }
0x102e   :  { %v2457_v63 = vmul.f32 %v6936_v62, %v7965_v27  ;;  %v2973_v8 = vpop.permute.xlu0 %2972  ;;  %v3140_v12 = vpop.permute.xlu1 %3139 }
0x1030   :  { %6251 = vmatmul.mubr.msk.f32.vlgmr.msra.gmra.mrb[14].mxu0 %vm593_vm11, %v2457_v63 }
0x1031   :  { %v6938_v2 = vpop.eup %6937  ;;  %6259 = vmatpush3.msk.msra.mxu0 %vm366_vm3, %v7954_v7  ;;  %6260 = vmatprep.mubr.msk.f32.mxu0 %vm7162_vm8, %v7160_v4 }
0x1032   :  { %v2638_v3 = vmul.f32 %v6938_v2, %v7967_v13  ;;  %6268 = vmatprep.subr.mxu0 %v7160_v4  ;;  %v6940_v5 = vpop.eup %6939  ;;  %v1173_v30 = vpop.permute.xlu1 %1172 }
0x1033   :  { %v2804_v52 = vmul.f32 %v6940_v5, %v7971_v28  ;;  %v1177_v41 = vpop.permute.xlu0 %1176  ;;  %v1183_v58 = vsel %vm505_vm9, %v7728_v6, %v1173_v30 }
0x1034   :  { %6261 = vmatmul.mubr.msk.f32.vlgmr.msra.gmra.mrb[16].mxu0 %vm593_vm11, %v2638_v3  ;;  %v1185_v61 = vsel %vm1184_vm12, %v1183_v58, %v1177_v41  ;;  %v3389_v41 = vld [vmem:[#allocation2 + $0xa0] sm:$0xff] }
0x1035   :  { %6269 = vmatpush3.msk.msra.mxu0 %vm366_vm3, %v2806_v55  ;;  %6270 = vmatprep.mubr.msk.f32.mxu0 %vm7162_vm8, %v7160_v4  ;;  %v6942_v7 = vpop.eup %6941 }
0x1036   :  { %6278 = vmatprep.subr.mxu0 %v7160_v4  ;;  %v2971_v10 = vmul.f32 %v6942_v7, %v7973_v21  ;;  %v6944_v11 = vpop.eup %6943  ;;  %v1181_v57 = vpop.permute.xlu1 %1180 }
0x1037   :  { %v3138_v14 = vmul.f32 %v6944_v11, %v7979_v32  ;;  %v401_v32 = vld [vmem:[%s8524_s27 + $0x18] sm:$0xff]  ;;  %v1187_v63 = vsel %vm1186_vm13, %v1185_v61, %v1181_v57  ;;  %v3391_v57 = vld [vmem:[#allocation2 + $0xb0] sm:$0xff] }
0x1038   :  { %6271 = vmatmul.mubr.msk.f32.vlgmr.msra.gmra.mrb[18].mxu0 %vm593_vm11, %v2804_v52  ;;  %v6495_v48 = vpack.c.bf16 %v401_v32, %v400_v31  ;;  %v6529_v58 = vpack.c.bf16 %v3391_v57, %v3389_v41  ;;  %v3400_v61 = vld [vmem:[#allocation2 + $0xf8] sm:$0xff]  ;;  %v3431_v57 = vld [vmem:[#allocation2 + $0x1f0] sm:$0xff] }
0x1039   :  { %6279 = vmatpush3.msk.msra.mxu0 %vm366_vm3, %v2973_v8  ;;  %6280 = vmatprep.mubr.msk.f32.mxu0 %vm7162_vm8, %v7160_v4 }
0x103a   :  { %6288 = vmatprep.subr.mxu0 %v7160_v4 }
0x103c   :  { %6281 = vmatmul.mubr.msk.f32.vlgmr.msra.gmra.mrb[20].mxu0 %vm593_vm11, %v2971_v10 }
0x103d   :  { %6289 = vmatpush3.msk.msra.mxu0 %vm366_vm3, %v3140_v12  ;;  %6290 = vmatprep.mubr.msk.f32.mxu0 %vm7162_vm8, %v7160_v4 }
0x103e   :  { %6492 = vmatprep.subr.bf16.mxu0 %v6491_v24 }
0x1040   :  { %6291 = vmatmul.mubr.msk.f32.vlgmr.msra.gmra.mrb[22].mxu0 %vm593_vm11, %v3138_v14 }
0x1041   :  { %6494 = vmatpush3.bf16.msra.mxu0 %v6491_v24  ;;  %v3371_v24 = vld [vmem:[#allocation2 + $0x10] sm:$0xff] }
0x1042   :  { %6496 = vmatprep.subr.bf16.mxu0 %v6495_v48 }
0x1045   :  { %6498 = vmatpush3.bf16.msra.mxu0 %v6495_v48  ;;  %v3377_v48 = vld [vmem:[#allocation2 + $0x40] sm:$0xff] }
0x1046   :  { %6500 = vmatprep.subr.bf16.mxu0 %v6499_v38 }
0x1049   :  { %6502 = vmatpush3.bf16.msra.mxu0 %v6499_v38  ;;  %v6519_v38 = vpack.c.bf16 %v3384_v35, %v3382_v34  ;;  %v3422_v34 = vld [vmem:[#allocation2 + $0x1a8] sm:$0xff]  ;;  %v3424_v35 = vld [vmem:[#allocation2 + $0x1b8] sm:$0xff] }
0x104a   :  { %6504 = vmatprep.subr.bf16.mxu0 %v6503_v49 }
0x104d   :  { %6506 = vmatpush3.bf16.msra.mxu0 %v6503_v49 }
0x10be   :  { %v1516_v15 = vpop.f32.mrb[2].mxu0 }
0x10bf   :  { %v6192_v16 = vpop.f32.mrb[3].mxu0  ;;  %1855 = vrot.lane.b32.xlu0 %v1516_v15, %s7154_s9 }
0x10c2   :  { %v1683_v18 = vpop.f32.mrb[4].mxu0 }
0x10c3   :  { %1859 = vrot.lane.b32.xlu1 %v1683_v18, %s7159_s7  ;;  %v6202_v22 = vpop.f32.mrb[5].mxu0  ;;  %v3370_v18 = vld [vmem:[#allocation2 + $0x8] sm:$0xff] }
0x10c4   :  { %v6507_v22 = vpack.c.bf16 %v3372_v19, %v3370_v18  ;;  %v3412_v18 = vld [vmem:[#allocation2 + $0x158] sm:$0xff] }
0x10c6   :  { %v1850_v25 = vpop.f32.mrb[6].mxu0  ;;  %6508 = vmatprep.subr.bf16.mxu0 %v6507_v22  ;;  %v3409_v22 = vld [vmem:[#allocation2 + $0x140] sm:$0xff] }
0x10c7   :  { %1863 = vrot.lane.b32.xlu0 %v1850_v25, %s7164_s0  ;;  %v6212_v9 = vpop.f32.mrb[7].mxu0  ;;  %v3374_v25 = vld [vmem:[#allocation2 + $0x28] sm:$0xff] }
0x10c8   :  { %v3376_v9 = vld [vmem:[#allocation2 + $0x38] sm:$0xff] }
0x10ca   :  { %v2030_v27 = vpop.f32.mrb[8].mxu0 }
0x10cb   :  { %v6222_v13 = vpop.f32.mrb[9].mxu0 }
0x10cc   :  { %v6509_v13 = vpack.c.bf16 %v3371_v24, %v3369_v20  ;;  %v3411_v24 = vld [vmem:[#allocation2 + $0x150] sm:$0xff] }
0x10ce   :  { %v2197_v17 = vpop.f32.mrb[10].mxu0 }
0x10cf   :  { %2536 = vrot.lane.b32.xlu1 %v2197_v17, %s7154_s9  ;;  %v6232_v28 = vpop.f32.mrb[11].mxu0  ;;  %v3373_v17 = vld [vmem:[#allocation2 + $0x20] sm:$0xff] }
0x10d0   :  { %v3375_v28 = vld [vmem:[#allocation2 + $0x30] sm:$0xff] }
0x10d1   :  { %v6513_v31 = vpack.c.bf16 %v3375_v28, %v3373_v17  ;;  %v3413_v17 = vld [vmem:[#allocation2 + $0x160] sm:$0xff]  ;;  %v3415_v28 = vld [vmem:[#allocation2 + $0x170] sm:$0xff] }
0x10d2   :  { %v2364_v21 = vpop.f32.mrb[12].mxu0 }
0x10d3   :  { %v6242_v26 = vpop.f32.mrb[13].mxu0 }
0x10d4   :  { %v3380_v26 = vld [vmem:[#allocation2 + $0x58] sm:$0xff] }
0x1103   :  { %v2531_v33 = vpop.f32.mrb[14].mxu0 }
0x1104   :  { %v6252_v36 = vpop.f32.mrb[15].mxu0 }
0x1107   :  { %v2711_v39 = vpop.f32.mrb[16].mxu0 }
0x1108   :  { %v6262_v42 = vpop.f32.mrb[17].mxu0 }
0x1109   :  { %v3383_v42 = vld [vmem:[#allocation2 + $0x70] sm:$0xff] }
0x110b   :  { %v2878_v40 = vpop.f32.mrb[18].mxu0 }
0x110c   :  { %3217 = vrot.lane.b32.xlu0 %v2878_v40, %s7154_s9  ;;  %v6272_v0 = vpop.f32.mrb[19].mxu0  ;;  %v6523_v40 = vpack.c.bf16 %v3388_v44, %v3386_v23  ;;  %v3426_v23 = vld [vmem:[#allocation2 + $0x1c8] sm:$0xff]  ;;  %v3428_v44 = vld [vmem:[#allocation2 + $0x1d8] sm:$0xff] }
0x110d   :  { %v3385_v0 = vld [vmem:[#allocation2 + $0x80] sm:$0xff] }
0x110f   :  { %v3045_v45 = vpop.f32.mrb[20].mxu0 }
0x1110   :  { %3221 = vrot.lane.b32.xlu1 %v3045_v45, %s7159_s7  ;;  %v6282_v29 = vpop.f32.mrb[21].mxu0  ;;  %v3387_v45 = vld [vmem:[#allocation2 + $0x90] sm:$0xff] }
0x1111   :  { %v3390_v29 = vld [vmem:[#allocation2 + $0xa8] sm:$0xff] }
0x1113   :  { %v3212_v51 = vpop.f32.mrb[22].mxu0 }
0x1114   :  { %2544 = vrot.lane.b32.xlu1 %v2531_v33, %s7164_s0  ;;  %3225 = vrot.lane.b32.xlu0 %v3212_v51, %s7164_s0  ;;  %v6292_v53 = vpop.f32.mrb[23].mxu0  ;;  %v3379_v33 = vld [vmem:[#allocation2 + $0x50] sm:$0xff]  ;;  %v3392_v51 = vld [vmem:[#allocation2 + $0xb8] sm:$0xff] }
0x1115   :  { %v6517_v36 = vpack.c.bf16 %v3379_v33, %v3377_v48  ;;  %v6525_v53 = vpack.c.bf16 %v3387_v45, %v3385_v0  ;;  %v6527_v30 = vpack.c.bf16 %v3392_v51, %v3390_v29  ;;  %v3417_v48 = vld [vmem:[#allocation2 + $0x180] sm:$0xff]  ;;  %v3419_v33 = vld [vmem:[#allocation2 + $0x190] sm:$0xff]  ;;  %v3430_v51 = vld [vmem:[#allocation2 + $0x1e8] sm:$0xff] }
0x1116   :  { %v3425_v0 = vld [vmem:[#allocation2 + $0x1c0] sm:$0xff]  ;;  %v3427_v45 = vld [vmem:[#allocation2 + $0x1d0] sm:$0xff] }
0x1117   :  { %v6565_v29 = vpack.c.bf16 %v3427_v45, %v3425_v0 }
0x1118   :  { %2540 = vrot.lane.b32.xlu0 %v2364_v21, %s7159_s7  ;;  %v3378_v21 = vld [vmem:[#allocation2 + $0x48] sm:$0xff] }
0x1119   :  { %v6515_v32 = vpack.c.bf16 %v3380_v26, %v3378_v21  ;;  %v3418_v21 = vld [vmem:[#allocation2 + $0x188] sm:$0xff]  ;;  %v3420_v26 = vld [vmem:[#allocation2 + $0x198] sm:$0xff] }
0x1131   :  { %v1856_v50 = vpop.permute.xlu0 %1855 }
0x1132   :  { %v1866_v55 = vsel %vm505_vm9, %v7893_v37, %v1856_v50  ;;  %v3394_v50 = vld [vmem:[#allocation2 + $0xc8] sm:$0xff] }
0x1135   :  { %v1860_v46 = vpop.permute.xlu1 %1859 }
0x1136   :  { %v1867_v59 = vsel %vm1184_vm12, %v1866_v55, %v1860_v46  ;;  %v3396_v46 = vld [vmem:[#allocation2 + $0xd8] sm:$0xff] }
0x1137   :  { %v6531_v55 = vpack.c.bf16 %v3396_v46, %v3394_v50  ;;  %v5939_v46 = vld [vmem:[%s8525_s28] ss:$0 sm:$0xff] }
0x1139   :  { %v1864_v60 = vpop.permute.xlu0 %1863 }
0x113a   :  { %v1868_v43 = vsel %vm1186_vm13, %v1867_v59, %v1864_v60  ;;  %v3393_v59 = vld [vmem:[#allocation2 + $0xc0] sm:$0xff]  ;;  %v3395_v60 = vld [vmem:[#allocation2 + $0xd0] sm:$0xff] }
0x113b   :  { %v3232_v62 = vrot.slane %v1868_v43, 4  ;;  %v3398_v43 = vld [vmem:[#allocation2 + $0xe8] sm:$0xff] }
0x113d   :  { %v3237_v1 = vsel %vm366_vm3, %v1187_v63, %v3232_v62  ;;  %v6533_v62 = vpack.c.bf16 %v3395_v60, %v3393_v59  ;;  %v6535_v63 = vpack.c.bf16 %v3400_v61, %v3398_v43 }
0x113e   :  { %6309 = vmatprep.mubr.msk.f32.mxu0 %vm418_vm7, %v3237_v1  ;;  %v3397_v1 = vld [vmem:[#allocation2 + $0xe0] sm:$0xff] }
0x1141   :  { %v2537_v6 = vpop.permute.xlu1 %2536 }
0x1142   :  { %v2547_v8 = vsel %vm505_vm9, %v2030_v27, %v2537_v6  ;;  %v6511_v27 = vpack.c.bf16 %v3376_v9, %v3374_v25  ;;  %v3399_v6 = vld [vmem:[#allocation2 + $0xf0] sm:$0xff]  ;;  %v3414_v25 = vld [vmem:[#allocation2 + $0x168] sm:$0xff]  ;;  %v3416_v9 = vld [vmem:[#allocation2 + $0x178] sm:$0xff] }
0x117e   :  { %v3218_v2 = vpop.permute.xlu0 %3217 }
0x117f   :  { %v3228_v37 = vsel %vm505_vm9, %v2711_v39, %v3218_v2  ;;  %v3381_v39 = vld [vmem:[#allocation2 + $0x60] sm:$0xff]  ;;  %v3402_v2 = vld [vmem:[#allocation2 + $0x108] sm:$0xff] }
0x1180   :  { %v6521_v49 = vpack.c.bf16 %v3383_v42, %v3381_v39  ;;  %v3421_v39 = vld [vmem:[#allocation2 + $0x1a0] sm:$0xff]  ;;  %v3423_v42 = vld [vmem:[#allocation2 + $0x1b0] sm:$0xff] }
0x1182   :  { %v3222_v3 = vpop.permute.xlu1 %3221 }
0x1183   :  { %v3229_v52 = vsel %vm1184_vm12, %v3228_v37, %v3222_v3  ;;  %v3404_v3 = vld [vmem:[#allocation2 + $0x118] sm:$0xff]  ;;  %v6537_v37 = vpack.c.bf16 %v3399_v6, %v3397_v1 }
0x1186   :  { %v3226_v5 = vpop.permute.xlu0 %3225  ;;  %v2545_v11 = vpop.permute.xlu1 %2544 }
0x1187   :  { %v3230_v7 = vsel %vm1186_vm13, %v3229_v52, %v3226_v5  ;;  %v6539_v5 = vpack.c.bf16 %v3404_v3, %v3402_v2  ;;  %v3401_v52 = vld [vmem:[#allocation2 + $0x100] sm:$0xff] }
0x1188   :  { %v3235_v12 = vrot.slane %v3230_v7, 4  ;;  %v3403_v7 = vld [vmem:[#allocation2 + $0x110] sm:$0xff] }
0x118a   :  { %v2541_v10 = vpop.permute.xlu0 %2540 }
0x118b   :  { %v2548_v14 = vsel %vm1184_vm12, %v2547_v8, %v2541_v10  ;;  %v3406_v8 = vld [vmem:[#allocation2 + $0x128] sm:$0xff]  ;;  %v3408_v10 = vld [vmem:[#allocation2 + $0x138] sm:$0xff] }
0x118c   :  { %v2549_v15 = vsel %vm1186_vm13, %v2548_v14, %v2545_v11  ;;  %v6541_v11 = vpack.c.bf16 %v3403_v7, %v3401_v52  ;;  %v3405_v14 = vld [vmem:[#allocation2 + $0x120] sm:$0xff] }
0x118d   :  { %v3238_v16 = vsel %vm366_vm3, %v2549_v15, %v3235_v12  ;;  %v6543_v12 = vpack.c.bf16 %v3408_v10, %v3406_v8  ;;  %v3407_v15 = vld [vmem:[#allocation2 + $0x130] sm:$0xff] }
0x118e   :  { %6310 = vmatmul.mubr.msk.f32.vlgmr.msra.gmra.mrb[24].mxu0 %vm418_vm7, %v3238_v16  ;;  %v3410_v16 = vld [vmem:[#allocation2 + $0x148] sm:$0xff]  ;;  %v6545_v19 = vpack.c.bf16 %v3407_v15, %v3405_v14  ;;  %v3435_v14 = vld [vmem:[#allocation2 + $0x210] sm:$0xff] }
0x118f   :  { %6510 = vmatpush1.bf16.msra.mxu0 %v6509_v13  ;;  %v6547_v20 = vpack.c.bf16 %v3412_v18, %v3410_v16  ;;  %v6549_v13 = vpack.c.bf16 %v3411_v24, %v3409_v22 }
0x1190   :  { %6512 = vmatprep.subr.bf16.mxu0 %v6511_v27  ;;  %v6551_v27 = vpack.c.bf16 %v3416_v9, %v3414_v25 }
0x1193   :  { %6514 = vmatpush1.bf16.msra.mxu0 %v6513_v31  ;;  %v6553_v31 = vpack.c.bf16 %v3415_v28, %v3413_v17  ;;  %v3437_v28 = vld [vmem:[#allocation2 + $0x220] sm:$0xff] }
0x1194   :  { %6516 = vmatprep.subr.bf16.mxu0 %v6515_v32  ;;  %v6555_v32 = vpack.c.bf16 %v3420_v26, %v3418_v21  ;;  %v3439_v21 = vld [vmem:[#allocation2 + $0x230] sm:$0xff]  ;;  %v3442_v26 = vld [vmem:[#allocation2 + $0x248] sm:$0xff] }
0x1197   :  { %6518 = vmatpush1.bf16.msra.mxu0 %v6517_v36  ;;  %v6557_v36 = vpack.c.bf16 %v3419_v33, %v3417_v48  ;;  %v6577_v48 = vpack.c.bf16 %v3439_v21, %v3437_v28  ;;  %v3480_v28 = vld [vmem:[#allocation2 + $0x378] sm:$0xff] }
0x1198   :  { %6520 = vmatprep.subr.bf16.mxu0 %v6519_v38  ;;  %v6559_v38 = vpack.c.bf16 %v3424_v35, %v3422_v34  ;;  %v3441_v34 = vld [vmem:[#allocation2 + $0x240] sm:$0xff]  ;;  %v3443_v35 = vld [vmem:[#allocation2 + $0x250] sm:$0xff] }
0x119b   :  { %6522 = vmatpush1.bf16.msra.mxu0 %v6521_v49  ;;  %v6561_v49 = vpack.c.bf16 %v3423_v42, %v3421_v39  ;;  %v6581_v39 = vpack.c.bf16 %v3443_v35, %v3441_v34 }
0x119c   :  { %6524 = vmatprep.subr.bf16.mxu0 %v6523_v40  ;;  %v6563_v40 = vpack.c.bf16 %v3428_v44, %v3426_v23  ;;  %v3445_v23 = vld [vmem:[#allocation2 + $0x260] sm:$0xff]  ;;  %v3447_v44 = vld [vmem:[#allocation2 + $0x270] sm:$0xff] }
0x119d   :  { %v6585_v0 = vpack.c.bf16 %v3447_v44, %v3445_v23 }
0x119f   :  { %6526 = vmatpush1.bf16.msra.mxu0 %v6525_v53  ;;  %v3432_v53 = vld [vmem:[#allocation2 + $0x1f8] sm:$0xff] }
0x11a0   :  { %6528 = vmatprep.subr.bf16.mxu0 %v6527_v30  ;;  %v3429_v30 = vld [vmem:[#allocation2 + $0x1e0] sm:$0xff]  ;;  %v6567_v41 = vpack.c.bf16 %v3432_v53, %v3430_v51  ;;  %v3451_v51 = vld [vmem:[#allocation2 + $0x290] sm:$0xff]  ;;  %v3454_v53 = vld [vmem:[#allocation2 + $0x2a8] sm:$0xff] }
0x11a1   :  { %v6569_v50 = vpack.c.bf16 %v3431_v57, %v3429_v30  ;;  %v3456_v30 = vld [vmem:[#allocation2 + $0x2b8] sm:$0xff] }
0x11a2   :  { %v6591_v57 = vpack.c.bf16 %v3456_v30, %v3454_v53  ;;  %v3489_v53 = vld [vmem:[#allocation2 + $0x3c0] sm:$0xff]  ;;  %v3491_v30 = vld [vmem:[#allocation2 + $0x3d0] sm:$0xff] }
0x11a3   :  { %6530 = vmatpush1.bf16.msra.mxu0 %v6529_v58  ;;  %v3434_v58 = vld [vmem:[#allocation2 + $0x208] sm:$0xff] }
0x11a4   :  { %6532 = vmatprep.subr.bf16.mxu0 %v6531_v55  ;;  %v3436_v55 = vld [vmem:[#allocation2 + $0x218] sm:$0xff] }
0x11a5   :  { %v6571_v60 = vpack.c.bf16 %v3436_v55, %v3434_v58  ;;  %v3458_v58 = vld [vmem:[#allocation2 + $0x2c8] sm:$0xff]  ;;  %v3460_v55 = vld [vmem:[#allocation2 + $0x2d8] sm:$0xff] }
0x11a7   :  { %6534 = vmatpush1.bf16.msra.mxu0 %v6533_v62 }
0x11a8   :  { %6536 = vmatprep.subr.bf16.mxu0 %v6535_v63 }
0x11ab   :  { %6538 = vmatpush1.bf16.msra.mxu0 %v6537_v37 }
0x11ac   :  { %6540 = vmatprep.subr.bf16.mxu0 %v6539_v5 }
0x11af   :  { %6542 = vmatpush1.bf16.msra.mxu0 %v6541_v11 }
0x11b0   :  { %6544 = vmatprep.subr.bf16.mxu0 %v6543_v12  ;;  %v3433_v12 = vld [vmem:[#allocation2 + $0x200] sm:$0xff] }
0x11b1   :  { %v6573_v9 = vpack.c.bf16 %v3435_v14, %v3433_v12  ;;  %v3467_v12 = vld [vmem:[#allocation2 + $0x310] sm:$0xff]  ;;  %v3470_v14 = vld [vmem:[#allocation2 + $0x328] sm:$0xff] }
0x11b3   :  { %6546 = vmatpush1.bf16.msra.mxu0 %v6545_v19  ;;  %v3438_v19 = vld [vmem:[#allocation2 + $0x228] sm:$0xff] }
0x11b4   :  { %6548 = vmatprep.subr.bf16.mxu0 %v6547_v20  ;;  %v3440_v20 = vld [vmem:[#allocation2 + $0x238] sm:$0xff] }
0x11b5   :  { %v6575_v17 = vpack.c.bf16 %v3440_v20, %v3438_v19  ;;  %v3469_v19 = vld [vmem:[#allocation2 + $0x320] sm:$0xff]  ;;  %v3471_v20 = vld [vmem:[#allocation2 + $0x330] sm:$0xff] }
0x11b7   :  { %6550 = vmatpush1.bf16.msra.mxu0 %v6549_v13 }
0x11b8   :  { %6552 = vmatprep.subr.bf16.mxu0 %v6551_v27 }
0x11bb   :  { %6554 = vmatpush1.bf16.msra.mxu0 %v6553_v31  ;;  %v3444_v31 = vld [vmem:[#allocation2 + $0x258] sm:$0xff] }
0x11bc   :  { %6556 = vmatprep.subr.bf16.mxu0 %v6555_v32  ;;  %v6579_v33 = vpack.c.bf16 %v3444_v31, %v3442_v26  ;;  %v3477_v31 = vld [vmem:[#allocation2 + $0x360] sm:$0xff] }
0x11bf   :  { %6558 = vmatpush1.bf16.msra.mxu0 %v6557_v36  ;;  %v3446_v36 = vld [vmem:[#allocation2 + $0x268] sm:$0xff] }
0x11c0   :  { %6560 = vmatprep.subr.bf16.mxu0 %v6559_v38  ;;  %v3448_v38 = vld [vmem:[#allocation2 + $0x278] sm:$0xff] }
0x11c1   :  { %v6583_v42 = vpack.c.bf16 %v3448_v38, %v3446_v36  ;;  %v3481_v36 = vld [vmem:[#allocation2 + $0x380] sm:$0xff]  ;;  %v3483_v38 = vld [vmem:[#allocation2 + $0x390] sm:$0xff] }
0x11c2   :  { %v6621_v23 = vpack.c.bf16 %v3483_v38, %v3481_v36  ;;  %v3712_v36 = vld [vmem:[#allocation6] sm:$0xff]  ;;  %v3714_v38 = vld [vmem:[#allocation6 + $0x10] sm:$0xff] }
0x11c3   :  { %6562 = vmatpush1.bf16.msra.mxu0 %v6561_v49  ;;  %v3450_v49 = vld [vmem:[#allocation2 + $0x288] sm:$0xff] }
0x11c4   :  { %6564 = vmatprep.subr.bf16.mxu0 %v6563_v40  ;;  %v3452_v40 = vld [vmem:[#allocation2 + $0x298] sm:$0xff] }
0x11c5   :  { %v6587_v45 = vpack.c.bf16 %v3452_v40, %v3450_v49  ;;  %v3485_v49 = vld [vmem:[#allocation2 + $0x3a0] sm:$0xff]  ;;  %v3487_v40 = vld [vmem:[#allocation2 + $0x3b0] sm:$0xff] }
0x11c7   :  { %6566 = vmatpush1.bf16.msra.mxu0 %v6565_v29  ;;  %v3449_v29 = vld [vmem:[#allocation2 + $0x280] sm:$0xff] }
0x11c8   :  { %6568 = vmatprep.subr.bf16.mxu0 %v6567_v41  ;;  %v6589_v41 = vpack.c.bf16 %v3451_v51, %v3449_v29  ;;  %v6625_v29 = vpack.c.bf16 %v3487_v40, %v3485_v49  ;;  %v3716_v49 = vld [vmem:[#allocation6 + $0x20] sm:$0xff]  ;;  %v3718_v40 = vld [vmem:[#allocation6 + $0x30] sm:$0xff] }
0x11cb   :  { %6570 = vmatpush1.bf16.msra.mxu0 %v6569_v50  ;;  %v3453_v50 = vld [vmem:[#allocation2 + $0x2a0] sm:$0xff] }
0x11cc   :  { %6572 = vmatprep.subr.bf16.mxu0 %v6571_v60  ;;  %v6595_v60 = vpack.c.bf16 %v3460_v55, %v3458_v58 }
0x1261   :  { %v6311_v59 = vpop.f32.mrb[24].mxu0 }
0x1262   :  { %v3323_v43 = vadd.f32 %v6311_v59, %v5939_v46  ;;  %v3317_v61 = vpop.f32.mrb[25].mxu0 }
0x1263   :  { %v8114_v62 = vadd.f32 %v5939_v46, %v3317_v61  ;;  %v3455_v46 = vld [vmem:[#allocation2 + $0x2b0] sm:$0xff] }
0x1264   :  { %v3339_v63 = vrot.slane %v3323_v43, 2  ;;  %v3345_v1 = vrot.slane %v3323_v43, 3  ;;  %v3333_v6 = vrot.slane %v3323_v43, 1  ;;  %v6593_v59 = vpack.c.bf16 %v3455_v46, %v3453_v50  ;;  %v3459_v61 = vld [vmem:[#allocation2 + $0x2d0] sm:$0xff] }
0x1265   :  { %v3331_v52 = vrot.slane %v8114_v62, 1  ;;  %v3343_v11 = vrot.slane %v8114_v62, 3  ;;  %v6629_v46 = vpack.c.bf16 %v3491_v30, %v3489_v53  ;;  %v3337_v58 = vrot.slane %v8114_v62, 2  ;;  %v3720_v53 = vld [vmem:[#allocation6 + $0x40] sm:$0xff]  ;;  %v3722_v30 = vld [vmem:[#allocation6 + $0x50] sm:$0xff] }
0x1266   :  { %v6870_v2 = vpack.i.bf16 %v3339_v63, %v3345_v1  ;;  %v6865_v3 = vpack.i.bf16 %v3323_v43, %v3333_v6  ;;  %v3457_v43 = vld [vmem:[#allocation2 + $0x2c0] sm:$0xff]  ;;  %v3462_v63 = vld [vmem:[#allocation2 + $0x2e8] sm:$0xff]  ;;  %v3464_v1 = vld [vmem:[#allocation2 + $0x2f8] sm:$0xff] }
0x1267   :  { %v6597_v6 = vpack.c.bf16 %v3459_v61, %v3457_v43 }
0x1268   :  { %6871 = vrot.lane.b32.xlu1 %v6870_v2, %s7161_s13  ;;  %6866 = vrot.lane.b32.xlu0 %v6865_v3, %s7161_s13  ;;  %v6599_v2 = vpack.c.bf16 %v3464_v1, %v3462_v63  ;;  %v3461_v3 = vld [vmem:[#allocation2 + $0x2e0] sm:$0xff] }
0x12da   :  { %v8118_v37 = vpop.permute.xlu1 %6871  ;;  %v6867_v5 = vpop.permute.xlu0 %6866 }
0x12db   :  { %v6873_v7 = vunpack.i.l.bf16 %v8118_v37  ;;  %v6869_v8 = vunpack.i.h.bf16 %v6867_v5  ;;  %v6868_v10 = vunpack.i.l.bf16 %v6867_v5  ;;  %v3463_v5 = vld [vmem:[#allocation2 + $0x2f0] sm:$0xff]  ;;  %v6874_v50 = vunpack.i.h.bf16 %v8118_v37  ;;  %v3497_v37 = vld [vmem:[%s8490_s8] sm:$0x3] }
0x12dd   :  { %v3350_v15 = vsel %vm418_vm7, %v3331_v52, %v6868_v10  ;;  %v3349_v16 = vsel %vm418_vm7, %v8114_v62, %v6869_v8  ;;  %v3352_v18 = vsel %vm418_vm7, %v3343_v11, %v6873_v7  ;;  %v3466_v52 = vld [vmem:[#allocation2 + $0x308] sm:$0xff]  ;;  %v3468_v7 = vld [vmem:[#allocation2 + $0x318] sm:$0xff]  ;;  %v6601_v8 = vpack.c.bf16 %v3463_v5, %v3461_v3  ;;  %v3465_v11 = vld [vmem:[#allocation2 + $0x300] sm:$0xff] }
0x12de   :  { %v3358_v22 = vrot.slane %v3350_v15, 3  ;;  %v3357_v24 = vrot.slane %v3349_v16, 3  ;;  %v3360_v25 = vrot.slane %v3352_v18, 3  ;;  %v6603_v10 = vpack.c.bf16 %v3468_v7, %v3466_v52 }
0x12df   :  { %v3351_v43 = vsel %vm418_vm7, %v3337_v58, %v6874_v50  ;;  %v3502_v62 = vrot.slane %v3497_v37, %v7636_v54  ;;  %v3727_v50 = vld [vmem:[#allocation6 + $0x78] sm:$0xff] }
0x12e0   :  { %v3366_v13 = vsel %vm360_vm0, %v3350_v15, %v3358_v22  ;;  %v3365_v27 = vsel %vm360_vm0, %v3349_v16, %v3357_v24  ;;  %v3368_v32 = vsel %vm360_vm0, %v3352_v18, %v3360_v25  ;;  %v3472_v15 = vld [vmem:[#allocation2 + $0x338] sm:$0xff]  ;;  %v6605_v16 = vpack.c.bf16 %v3467_v12, %v3465_v11  ;;  %v3474_v22 = vld [vmem:[#allocation2 + $0x348] sm:$0xff] }
0x12e1   :  { %3573 = vmatprep.mubr.f32.mxu0 %v3366_v13  ;;  %v6607_v18 = vpack.c.bf16 %v3472_v15, %v3470_v14  ;;  %v3476_v24 = vld [vmem:[#allocation2 + $0x358] sm:$0xff]  ;;  %v6609_v25 = vpack.c.bf16 %v3471_v20, %v3469_v19  ;;  %v3473_v13 = vld [vmem:[#allocation2 + $0x340] sm:$0xff]  ;;  %v3359_v63 = vrot.slane %v3351_v43, 3 }
0x12e2   :  { %3574 = vmatmul.mubr.f32.vlgmr.msra.gmra.mrb[26].mxu0 %v3365_v27  ;;  %v3475_v27 = vld [vmem:[#allocation2 + $0x350] sm:$0xff] }
0x12e3   :  { %6574 = vmatpush1.bf16.msra.mxu0 %v6573_v9  ;;  %3644 = vmatprep.mubr.f32.mxu0 %v3368_v32  ;;  %v6611_v9 = vpack.c.bf16 %v3476_v24, %v3474_v22  ;;  %v6613_v21 = vpack.c.bf16 %v3475_v27, %v3473_v13  ;;  %v3479_v32 = vld [vmem:[#allocation2 + $0x370] sm:$0xff]  ;;  %v3367_v1 = vsel %vm360_vm0, %v3351_v43, %v3359_v63 }
0x12e4   :  { %6576 = vmatprep.subr.bf16.mxu0 %v6575_v17  ;;  %v3478_v17 = vld [vmem:[#allocation2 + $0x368] sm:$0xff]  ;;  %v6617_v34 = vpack.c.bf16 %v3479_v32, %v3477_v31 }
0x12e5   :  { %v6615_v26 = vpack.c.bf16 %v3480_v28, %v3478_v17 }
0x12e7   :  { %6578 = vmatpush1.bf16.msra.mxu0 %v6577_v48  ;;  %v3482_v48 = vld [vmem:[#allocation2 + $0x388] sm:$0xff] }
0x12e8   :  { %6580 = vmatprep.subr.bf16.mxu0 %v6579_v33  ;;  %v3484_v33 = vld [vmem:[#allocation2 + $0x398] sm:$0xff] }
0x12e9   :  { %v6619_v35 = vpack.c.bf16 %v3484_v33, %v3482_v48  ;;  %v3713_v33 = vld [vmem:[#allocation6 + $0x8] sm:$0xff] }
0x12eb   :  { %6582 = vmatpush1.bf16.msra.mxu0 %v6581_v39  ;;  %v3486_v39 = vld [vmem:[#allocation2 + $0x3a8] sm:$0xff] }
0x12ec   :  { %6584 = vmatprep.subr.bf16.mxu0 %v6583_v42  ;;  %v3488_v42 = vld [vmem:[#allocation2 + $0x3b8] sm:$0xff] }
0x12ed   :  { %v6623_v44 = vpack.c.bf16 %v3488_v42, %v3486_v39  ;;  %v6637_v39 = vpack.c.bf16 %v3714_v38, %v3712_v36  ;;  %v3717_v42 = vld [vmem:[#allocation6 + $0x28] sm:$0xff] }
0x12ef   :  { %6586 = vmatpush1.bf16.msra.mxu0 %v6585_v0  ;;  %v3490_v0 = vld [vmem:[#allocation2 + $0x3c8] sm:$0xff] }
0x12f0   :  { %6588 = vmatprep.subr.bf16.mxu0 %v6587_v45  ;;  %v3492_v45 = vld [vmem:[#allocation2 + $0x3d8] sm:$0xff] }
0x12f1   :  { %v6627_v51 = vpack.c.bf16 %v3492_v45, %v3490_v0  ;;  %v6641_v0 = vpack.c.bf16 %v3718_v40, %v3716_v49  ;;  %v3721_v45 = vld [vmem:[#allocation6 + $0x48] sm:$0xff] }
0x12f3   :  { %6590 = vmatpush1.bf16.msra.mxu0 %v6589_v41  ;;  %v3494_v41 = vld [vmem:[#allocation2 + $0x3e8] sm:$0xff] }
0x12f4   :  { %6592 = vmatprep.subr.bf16.mxu0 %v6591_v57  ;;  %v3496_v57 = vld [vmem:[#allocation2 + $0x3f8] sm:$0xff] }
0x12f5   :  { %v6631_v55 = vpack.c.bf16 %v3496_v57, %v3494_v41  ;;  %v6645_v41 = vpack.c.bf16 %v3722_v30, %v3720_v53  ;;  %v3725_v57 = vld [vmem:[#allocation6 + $0x68] sm:$0xff] }
0x12f6   :  { %v6647_v58 = vpack.c.bf16 %v3727_v50, %v3725_v57 }
0x12f7   :  { %6594 = vmatpush1.bf16.msra.mxu0 %v6593_v59  ;;  %v3493_v59 = vld [vmem:[#allocation2 + $0x3e0] sm:$0xff] }
0x12f8   :  { %6596 = vmatprep.subr.bf16.mxu0 %v6595_v60  ;;  %v3495_v60 = vld [vmem:[#allocation2 + $0x3f0] sm:$0xff] }
0x12f9   :  { %v6633_v61 = vpack.c.bf16 %v3495_v60, %v3493_v59 }
0x12fb   :  { %6598 = vmatpush1.bf16.msra.mxu0 %v6597_v6  ;;  %v3506_v6 = vrot.slane %v3497_v37, %v7642_v56 }
0x12fc   :  { %6600 = vmatprep.subr.bf16.mxu0 %v6599_v2 }
0x12ff   :  { %6602 = vmatpush1.bf16.msra.mxu0 %v6601_v8 }
0x1300   :  { %6604 = vmatprep.subr.bf16.mxu0 %v6603_v10 }
0x1303   :  { %6606 = vmatpush1.bf16.msra.mxu0 %v6605_v16 }
0x1304   :  { %6608 = vmatprep.subr.bf16.mxu0 %v6607_v18 }
0x1307   :  { %6610 = vmatpush1.bf16.msra.mxu0 %v6609_v25 }
0x1308   :  { %6612 = vmatprep.subr.bf16.mxu0 %v6611_v9 }
0x130b   :  { %6614 = vmatpush1.bf16.msra.mxu0 %v6613_v21 }
0x130c   :  { %6616 = vmatprep.subr.bf16.mxu0 %v6615_v26 }
0x130f   :  { %6618 = vmatpush1.bf16.msra.mxu0 %v6617_v34  ;;  %v3715_v34 = vld [vmem:[#allocation6 + $0x18] sm:$0xff] }
0x1310   :  { %6620 = vmatprep.subr.bf16.mxu0 %v6619_v35  ;;  %v6635_v35 = vpack.c.bf16 %v3715_v34, %v3713_v33 }
0x1312   :  { %6636 = vmatprep.subr.bf16.mxu1 %v6635_v35 }
0x1313   :  { %6622 = vmatpush1.bf16.msra.mxu0 %v6621_v23  ;;  %6638 = vmatpush1.bf16.msra.mxu1 %v6637_v39  ;;  %v3719_v23 = vld [vmem:[#allocation6 + $0x38] sm:$0xff] }
0x1314   :  { %6624 = vmatprep.subr.bf16.mxu0 %v6623_v44  ;;  %v6639_v44 = vpack.c.bf16 %v3719_v23, %v3717_v42 }
0x1316   :  { %6640 = vmatprep.subr.bf16.mxu1 %v6639_v44 }
0x1317   :  { %6626 = vmatpush1.bf16.msra.mxu0 %v6625_v29  ;;  %6642 = vmatpush1.bf16.msra.mxu1 %v6641_v0  ;;  %v3723_v29 = vld [vmem:[#allocation6 + $0x58] sm:$0xff] }
0x1318   :  { %6628 = vmatprep.subr.bf16.mxu0 %v6627_v51  ;;  %v6643_v51 = vpack.c.bf16 %v3723_v29, %v3721_v45 }
0x131a   :  { %6644 = vmatprep.subr.bf16.mxu1 %v6643_v51 }
0x131b   :  { %6630 = vmatpush1.bf16.msra.mxu0 %v6629_v46  ;;  %6646 = vmatpush1.bf16.msra.mxu1 %v6645_v41  ;;  %v3724_v46 = vld [vmem:[#allocation6 + $0x60] sm:$0xff] }
0x131c   :  { %6632 = vmatprep.subr.bf16.mxu0 %v6631_v55  ;;  %v3726_v55 = vld [vmem:[#allocation6 + $0x70] sm:$0xff]  ;;  %6648 = vmatprep.subr.bf16.mxu1 %v6647_v58 }
0x131d   :  { %v6649_v59 = vpack.c.bf16 %v3726_v55, %v3724_v46 }
0x131f   :  { %6634 = vmatpush1.bf16.msra.mxu0 %v6633_v61  ;;  %6650 = vmatpush1.bf16.msra.mxu1 %v6649_v59 }
0x1320   :  { %6312 = vmatprep.subr.mxu1 %v7160_v4 }
0x1322   :  { %3645 = vmatmul.mubr.f32.vlgmr.msra.gmra.mrb[26].mxu0 %v3367_v1  ;;  %v5942_v1 = vld [vmem:[#allocation4] ss:$0 sm:$0xff] }
0x13f5   :  { %v3646_v2 = vpop.f32.mrb[26].mxu0 }
0x13f6   :  { %v6839_v3 = vadd.f32 %v3646_v2, %v3502_v62  ;;  %v3648_v5 = vpop.f32.mrb[27].mxu0  ;;  %v5943_v62 = vld [vmem:[%s8492_s10] ss:$0 sm:$0xff] }
0x13f7   :  { %v6840_v52 = vadd.f32 %v3648_v5, %v3506_v6 }
0x13f8   :  { %v3652_v7 = vrot.slane %v6839_v3, 7  ;;  %v3665_v10 = vrot.slane %v6839_v3, 4  ;;  %v3663_v19 = vrot.slane %v6839_v3, 5 }
0x13f9   :  { %v3659_v8 = vrot.slane %v6840_v52, 5  ;;  %v3671_v11 = vrot.slane %v6840_v52, 2  ;;  %v3657_v14 = vrot.slane %v6840_v52, 6  ;;  %v3669_v25 = vrot.slane %v6840_v52, 3 }
0x13fa   :  { %3653 = vrot.lane.b32.xlu0 %v3652_v7, %s7161_s13 }
0x13fb   :  { %3660 = vrot.lane.b32.xlu1 %v3659_v8, %s7161_s13 }
0x13fe   :  { %3666 = vrot.lane.b32.xlu0 %v3665_v10, %s7161_s13 }
0x13ff   :  { %3672 = vrot.lane.b32.xlu1 %v3671_v11, %s7161_s13 }
0x146c   :  { %v3654_v12 = vpop.permute.xlu0 %3653 }
0x146d   :  { %v3675_v15 = vsel %vm360_vm0, %v6839_v3, %v3654_v12  ;;  %v3661_v16 = vpop.permute.xlu1 %3660  ;;  %v3728_v3 = vld [vmem:[%s8494_s12] sm:$0x3] }
0x146e   :  { %v3676_v18 = vsel %vm362_vm1, %v3675_v15, %v3657_v14  ;;  %v3742_v5 = vrot.slane %v3728_v3, %v7636_v54  ;;  %v3746_v10 = vrot.slane %v3728_v3, %v7642_v56 }
0x146f   :  { %v3677_v20 = vsel %vm364_vm2, %v3676_v18, %v3661_v16 }
0x1470   :  { %v3678_v22 = vsel %vm366_vm3, %v3677_v20, %v3663_v19  ;;  %v3667_v24 = vpop.permute.xlu0 %3666 }
0x1471   :  { %v3679_v9 = vsel %vm368_vm4, %v3678_v22, %v3667_v24  ;;  %v3673_v13 = vpop.permute.xlu1 %3672 }
0x1472   :  { %v3680_v27 = vsel %vm370_vm5, %v3679_v9, %v3669_v25 }
0x1473   :  { %v8150_v17 = vsel %vm372_vm6, %v3680_v27, %v3673_v13 }
0x1474   :  { %v3684_v28 = vsel %vm418_vm7, %v8150_v17, 0.0 }
0x1475   :  { %3685 = vadd.xlane.f32.xlu0 %v3684_v28 }
0x1502   :  { %v3686_v21 = vpop.xlane.xlu0 %3685 }
0x1503   :  { %v3688_v26 = vmul.f32 0.015625, %v3686_v21 }
0x1505   :  { %v3689_v31 = vsub.f32 %v8150_v17, %v3688_v26 }
0x1507   :  { %v3690_v32 = vmul.f32 %v3689_v31, %v3689_v31 }
0x1509   :  { %v3691_v48 = vsel %vm418_vm7, %v3690_v32, 0.0 }
0x150a   :  { %3692 = vadd.xlane.f32.xlu1 %v3691_v48 }
0x1597   :  { %v3693_v60 = vpop.xlane.xlu1 %3692 }
0x1598   :  { %v3694_v43 = vmul.f32 0.015625, %v3693_v60 }
0x159a   :  { %v3695_v61 = vadd.f32 1e-05, %v3694_v43 }
0x159c   :  { %6945 = vrsqrt.f32 %v3695_v61 }
0x15a6   :  { %v6946_v63 = vpop.eup %6945 }
0x15a7   :  { %v3697_v37 = vmul.f32 %v6946_v63, %v3689_v31 }
0x15a9   :  { %v3704_v6 = vmul.f32 %v5942_v1, %v3697_v37 }
0x15ab   :  { %v3711_v2 = vadd.f32 %v5943_v62, %v3704_v6 }
0x15ad   :  { %5944 = vmatmul.mubr.msk.f32.vlgmr.msra.gmra.mrb[46].mxu1 %vm418_vm7, %v3711_v2 }
0x15ae   :  { %6314 = vmatprep.mubr.msk.f32.mxu1 %vm7162_vm8, %v7160_v4 }
0x1680   :  { %v3818_v52 = vpop.f32.mrb[46].mxu1 }
0x1681   :  { %v8167_v7 = vadd.f32 %v3818_v52, %v3742_v5  ;;  %v3820_v8 = vpop.f32.mrb[47].mxu1 }
0x1682   :  { %v8176_v12 = vadd.f32 %v3820_v8, %v3746_v10 }
0x1683   :  { %3824 = vrot.lane.b32.xlu0 %v8167_v7, %s7161_s13  ;;  %v8241_v8 = vrot.slane %v8167_v7, 4 }
0x1687   :  { %3988 = vrot.lane.b32.xlu0 %v8167_v7, %s7163_s4 }
0x16f5   :  { %v3825_v11 = vpop.permute.xlu0 %3824 }
0x16f6   :  { %6313 = vmatpush3.xpose.msk.msra.mxu1 %vm505_vm9, %v3825_v11 }
0x16f7   :  { %6317 = vmatprep.subr.mxu1 %v7160_v4 }
0x16f9   :  { %6315 = vmatmul.mubr.msk.f32.vlgmr.msra.gmra.mrb[48].mxu1 %vm505_vm9, %v8167_v7  ;;  %v3989_v21 = vpop.permute.xlu0 %3988 }
0x16fa   :  { %6318 = vmatpush3.msk.msra.mxu1 %vm366_vm3, %v8176_v12  ;;  %6319 = vmatprep.mubr.msk.f32.mxu1 %vm7162_vm8, %v7160_v4 }
0x16fb   :  { %6322 = vmatprep.subr.mxu1 %v7160_v4 }
0x17cc   :  { %v3896_v14 = vpop.f32.mrb[48].mxu1 }
0x17cd   :  { %v3900_v15 = vmul.f32 0.25, %v3896_v14  ;;  %v6316_v16 = vpop.f32.mrb[49].mxu1 }
0x17cf   :  { %v3901_v18 = vsel %vm581_vm10, %v3900_v15, -inf }
0x17d0   :  { %3902 = vmax.xlane.f32.xlu1 %v3901_v18 }
0x185d   :  { %v3903_v19 = vpop.xlane.xlu1 %3902 }
0x185e   :  { %v3904_v20 = vsub.f32 %v3900_v15, %v3903_v19 }
0x1860   :  { %v3905_v22 = vmul.f32 1.442695, %v3904_v20 }
0x1862   :  { %6947 = vpow2.f32 %v3905_v22 }
0x186c   :  { %v6948_v24 = vpop.eup %6947 }
0x186d   :  { %v3907_v25 = vsel %vm581_vm10, %v6948_v24, 0.0 }
0x186e   :  { %3908 = vadd.xlane.f32.xlu1 %v3907_v25 }
0x187f   :  { %3990 = vrot.lane.b32.xlu1 %v8167_v7, %s7164_s0 }
0x18fb   :  { %v3909_v9 = vpop.xlane.xlu1 %3908 }
0x18fc   :  { %6949 = vrcp.f32 %v3909_v9 }
0x18ff   :  { %v3991_v28 = vpop.permute.xlu1 %3990 }
0x1906   :  { %v6950_v13 = vpop.eup %6949 }
0x1907   :  { %v3911_v27 = vmul.f32 %v6950_v13, %v6948_v24  ;;  %v8256_v24 = vrot.slane %v8176_v12, 4 }
0x1909   :  { %6320 = vmatmul.mubr.msk.f32.vlgmr.msra.gmra.mrb[50].mxu1 %vm593_vm11, %v3911_v27 }
0x190a   :  { %6323 = vmatpush3.xpose.msk.msra.mxu1 %vm505_vm9, %v3991_v28  ;;  %6324 = vmatprep.mubr.msk.f32.mxu1 %vm7162_vm8, %v7160_v4 }
0x190b   :  { %6327 = vmatprep.subr.mxu1 %v7160_v4 }
0x190d   :  { %6325 = vmatmul.mubr.msk.f32.vlgmr.msra.gmra.mrb[52].mxu1 %vm505_vm9, %v3989_v21 }
0x190e   :  { %6329 = vmatprep.mubr.msk.f32.mxu1 %vm7162_vm8, %v7160_v4 }
0x19dc   :  { %v8197_v26 = vpop.f32.mrb[50].mxu1 }
0x19dd   :  { %v6321_v31 = vpop.f32.mrb[51].mxu1 }
0x19e0   :  { %v4062_v32 = vpop.f32.mrb[52].mxu1 }
0x19e1   :  { %v4066_v48 = vmul.f32 0.25, %v4062_v32  ;;  %v6326_v33 = vpop.f32.mrb[53].mxu1 }
0x19e3   :  { %v4067_v34 = vsel %vm581_vm10, %v4066_v48, -inf }
0x19e4   :  { %4068 = vmax.xlane.f32.xlu0 %v4067_v34 }
0x19fa   :  { %4078 = vrot.lane.b32.xlu0 %v8176_v12, %s7163_s4 }
0x19fe   :  { %4155 = vrot.lane.b32.xlu0 %v8167_v7, %s7165_s6 }
0x1a71   :  { %v4069_v35 = vpop.xlane.xlu0 %4068 }
0x1a72   :  { %v4070_v36 = vsub.f32 %v4066_v48, %v4069_v35 }
0x1a74   :  { %v4071_v38 = vmul.f32 1.442695, %v4070_v36 }
0x1a75   :  { %v4079_v39 = vpop.permute.xlu0 %4078 }
0x1a76   :  { %6951 = vpow2.f32 %v4071_v38  ;;  %6328 = vmatpush3.msk.msra.mxu1 %vm366_vm3, %v4079_v39 }
0x1a77   :  { %6332 = vmatprep.subr.mxu1 %v7160_v4 }
0x1a79   :  { %v4156_v45 = vpop.permute.xlu0 %4155 }
0x1a80   :  { %v6952_v42 = vpop.eup %6951 }
0x1a81   :  { %v4073_v23 = vsel %vm581_vm10, %v6952_v42, 0.0 }
0x1a82   :  { %4074 = vadd.xlane.f32.xlu1 %v4073_v23 }
0x1a93   :  { %4157 = vrot.lane.b32.xlu1 %v8167_v7, %s7159_s7 }
0x1b0f   :  { %v4075_v44 = vpop.xlane.xlu1 %4074 }
0x1b10   :  { %6953 = vrcp.f32 %v4075_v44 }
0x1b13   :  { %v4158_v0 = vpop.permute.xlu1 %4157 }
0x1b1a   :  { %v6954_v49 = vpop.eup %6953 }
0x1b1b   :  { %v4077_v40 = vmul.f32 %v6954_v49, %v6952_v42 }
0x1b1d   :  { %6330 = vmatmul.mubr.msk.f32.vlgmr.msra.gmra.mrb[54].mxu1 %vm593_vm11, %v4077_v40 }
0x1b1e   :  { %6333 = vmatpush3.xpose.msk.msra.mxu1 %vm505_vm9, %v4158_v0  ;;  %6334 = vmatprep.mubr.msk.f32.mxu1 %vm7162_vm8, %v7160_v4 }
0x1b1f   :  { %6337 = vmatprep.subr.mxu1 %v7160_v4 }
0x1b21   :  { %6335 = vmatmul.mubr.msk.f32.vlgmr.msra.gmra.mrb[56].mxu1 %vm505_vm9, %v4156_v45 }
0x1b22   :  { %6339 = vmatprep.mubr.msk.f32.mxu1 %vm7162_vm8, %v7160_v4 }
0x1bf0   :  { %v8217_v29 = vpop.f32.mrb[54].mxu1 }
0x1bf1   :  { %v6331_v51 = vpop.f32.mrb[55].mxu1 }
0x1bf4   :  { %v4229_v53 = vpop.f32.mrb[56].mxu1 }
0x1bf5   :  { %v4233_v30 = vmul.f32 0.25, %v4229_v53  ;;  %v6336_v41 = vpop.f32.mrb[57].mxu1 }
0x1bf7   :  { %v4234_v57 = vsel %vm581_vm10, %v4233_v30, -inf }
0x1bf8   :  { %4235 = vmax.xlane.f32.xlu0 %v4234_v57 }
0x1c0e   :  { %4245 = vrot.lane.b32.xlu0 %v8176_v12, %s7165_s6 }
0x1c12   :  { %4322 = vrot.lane.b32.xlu0 %v8167_v7, %s7166_s17 }
0x1c85   :  { %v4236_v50 = vpop.xlane.xlu0 %4235 }
0x1c86   :  { %v4237_v46 = vsub.f32 %v4233_v30, %v4236_v50 }
0x1c88   :  { %v4238_v58 = vmul.f32 1.442695, %v4237_v46 }
0x1c89   :  { %v4246_v55 = vpop.permute.xlu0 %4245 }
0x1c8a   :  { %6955 = vpow2.f32 %v4238_v58  ;;  %6338 = vmatpush3.msk.msra.mxu1 %vm366_vm3, %v4246_v55 }
0x1c8b   :  { %6342 = vmatprep.subr.mxu1 %v7160_v4 }
0x1c8d   :  { %v4323_v37 = vpop.permute.xlu0 %4322 }
0x1c94   :  { %v6956_v59 = vpop.eup %6955 }
0x1c95   :  { %v4240_v60 = vsel %vm581_vm10, %v6956_v59, 0.0 }
0x1c96   :  { %4241 = vadd.xlane.f32.xlu1 %v4240_v60 }
0x1ca7   :  { %4324 = vrot.lane.b32.xlu1 %v8167_v7, %s7154_s9 }
0x1d23   :  { %v4242_v43 = vpop.xlane.xlu1 %4241 }
0x1d24   :  { %6957 = vrcp.f32 %v4242_v43 }
0x1d27   :  { %v4325_v1 = vpop.permute.xlu1 %4324 }
0x1d2e   :  { %v6958_v61 = vpop.eup %6957 }
0x1d2f   :  { %v4244_v63 = vmul.f32 %v6958_v61, %v6956_v59 }
0x1d31   :  { %6340 = vmatmul.mubr.msk.f32.vlgmr.msra.gmra.mrb[58].mxu1 %vm593_vm11, %v4244_v63 }
0x1d32   :  { %6343 = vmatpush3.xpose.msk.msra.mxu1 %vm505_vm9, %v4325_v1  ;;  %6344 = vmatprep.mubr.msk.f32.mxu1 %vm7162_vm8, %v7160_v4 }
0x1d33   :  { %6347 = vmatprep.subr.mxu1 %v7160_v4 }
0x1d35   :  { %6345 = vmatmul.mubr.msk.f32.vlgmr.msra.gmra.mrb[60].mxu1 %vm505_vm9, %v4323_v37 }
0x1d36   :  { %6349 = vmatprep.mubr.msk.f32.mxu1 %vm7162_vm8, %v7160_v4 }
0x1e04   :  { %v8237_v62 = vpop.f32.mrb[58].mxu1 }
0x1e05   :  { %v6341_v6 = vpop.f32.mrb[59].mxu1 }
0x1e08   :  { %v4396_v2 = vpop.f32.mrb[60].mxu1 }
0x1e09   :  { %v4400_v3 = vmul.f32 0.25, %v4396_v2  ;;  %v6346_v5 = vpop.f32.mrb[61].mxu1 }
0x1e0b   :  { %v4401_v52 = vsel %vm581_vm10, %v4400_v3, -inf }
0x1e0c   :  { %4402 = vmax.xlane.f32.xlu1 %v4401_v52 }
0x1e1d   :  { %4505 = vrot.lane.b32.xlu1 %v8241_v8, %s7161_s13 }
0x1e99   :  { %v4403_v10 = vpop.xlane.xlu1 %4402 }
0x1e9a   :  { %v4404_v11 = vsub.f32 %v4400_v3, %v4403_v10 }
0x1e9c   :  { %v4405_v14 = vmul.f32 1.442695, %v4404_v11 }
0x1e9d   :  { %v4506_v22 = vpop.permute.xlu1 %4505 }
0x1e9e   :  { %6959 = vpow2.f32 %v4405_v14 }
0x1ea8   :  { %v6960_v15 = vpop.eup %6959 }
0x1ea9   :  { %v4407_v16 = vsel %vm581_vm10, %v6960_v15, 0.0 }
0x1eaa   :  { %4408 = vadd.xlane.f32.xlu0 %v4407_v16 }
0x1ec0   :  { %4412 = vrot.lane.b32.xlu0 %v8176_v12, %s7166_s17 }
0x1f37   :  { %v4409_v18 = vpop.xlane.xlu0 %4408 }
0x1f38   :  { %6961 = vrcp.f32 %v4409_v18 }
0x1f3b   :  { %v4413_v19 = vpop.permute.xlu0 %4412 }
0x1f3c   :  { %6348 = vmatpush3.msk.msra.mxu1 %vm366_vm3, %v4413_v19 }
0x1f3d   :  { %6352 = vmatprep.subr.mxu1 %v7160_v4 }
0x1f42   :  { %v6962_v7 = vpop.eup %6961 }
0x1f43   :  { %v4411_v20 = vmul.f32 %v6962_v7, %v6960_v15 }
0x1f45   :  { %6350 = vmatmul.mubr.msk.f32.vlgmr.msra.gmra.mrb[62].mxu1 %vm593_vm11, %v4411_v20 }
0x1f46   :  { %6353 = vmatpush3.xpose.msk.msra.mxu1 %vm505_vm9, %v4506_v22  ;;  %6354 = vmatprep.mubr.msk.f32.mxu1 %vm7162_vm8, %v7160_v4 }
0x1f47   :  { %6357 = vmatprep.subr.mxu1 %v7160_v4 }
0x1f49   :  { %6355 = vmatmul.mubr.msk.f32.vlgmr.msra.gmra.mrb[64].mxu1 %vm505_vm9, %v8241_v8 }
0x1f4a   :  { %6358 = vmatpush3.msk.msra.mxu1 %vm366_vm3, %v8256_v24  ;;  %6359 = vmatprep.mubr.msk.f32.mxu1 %vm7162_vm8, %v7160_v4 }
0x1f4b   :  { %6362 = vmatprep.subr.mxu1 %v7160_v4 }
0x2018   :  { %v8265_v25 = vpop.f32.mrb[62].mxu1 }
0x2019   :  { %v6351_v9 = vpop.f32.mrb[63].mxu1 }
0x201c   :  { %v4577_v13 = vpop.f32.mrb[64].mxu1 }
0x201d   :  { %v4581_v27 = vmul.f32 0.25, %v4577_v13  ;;  %v6356_v28 = vpop.f32.mrb[65].mxu1 }
0x201f   :  { %v4582_v12 = vsel %vm581_vm10, %v4581_v27, -inf }
0x2020   :  { %4583 = vmax.xlane.f32.xlu1 %v4582_v12 }
0x2031   :  { %4669 = vrot.lane.b32.xlu1 %v8241_v8, %s7163_s4 }
0x20ad   :  { %v4584_v21 = vpop.xlane.xlu1 %4583 }
0x20ae   :  { %v4585_v31 = vsub.f32 %v4581_v27, %v4584_v21 }
0x20b0   :  { %v4586_v32 = vmul.f32 1.442695, %v4585_v31 }
0x20b1   :  { %v4670_v39 = vpop.permute.xlu1 %4669 }
0x20b2   :  { %6963 = vpow2.f32 %v4586_v32 }
0x20bc   :  { %v6964_v48 = vpop.eup %6963 }
0x20bd   :  { %v4588_v33 = vsel %vm581_vm10, %v6964_v48, 0.0 }
0x20be   :  { %4589 = vadd.xlane.f32.xlu0 %v4588_v33 }
0x20d4   :  { %4671 = vrot.lane.b32.xlu0 %v8241_v8, %s7164_s0 }
0x214b   :  { %v4590_v34 = vpop.xlane.xlu0 %4589 }
0x214c   :  { %6965 = vrcp.f32 %v4590_v34  ;;  %v3729_v34 = vld [vmem:[#allocation7] sm:$0xff] }
0x214f   :  { %v4672_v38 = vpop.permute.xlu0 %4671 }
0x2156   :  { %v6966_v35 = vpop.eup %6965 }
0x2157   :  { %v4592_v36 = vmul.f32 %v6966_v35, %v6964_v48  ;;  %v3731_v35 = vld [vmem:[#allocation7 + $0x10] sm:$0xff] }
0x2159   :  { %6360 = vmatmul.mubr.msk.f32.vlgmr.msra.gmra.mrb[66].mxu1 %vm593_vm11, %v4592_v36  ;;  %v7167_v36 = vmov 0.0|0.0  }
0x215a   :  { %6363 = vmatpush3.xpose.msk.msra.mxu1 %vm505_vm9, %v4672_v38  ;;  %6364 = vmatprep.mubr.msk.f32.mxu1 %vm7162_vm8, %v7160_v4  ;;  %v3732_v38 = vld [vmem:[#allocation7 + $0x18] sm:$0xff] }
0x215b   :  { %6367 = vmatprep.subr.mxu1 %v7160_v4 }
0x215d   :  { %6365 = vmatmul.mubr.msk.f32.vlgmr.msra.gmra.mrb[68].mxu1 %vm505_vm9, %v4670_v39  ;;  %v3733_v39 = vld [vmem:[#allocation7 + $0x20] sm:$0xff] }
0x215e   :  { %6369 = vmatprep.mubr.msk.f32.mxu1 %vm7162_vm8, %v7160_v4 }
0x222c   :  { %v8281_v42 = vpop.f32.mrb[66].mxu1 }
0x222d   :  { %v6361_v23 = vpop.f32.mrb[67].mxu1 }
0x222e   :  { %v3734_v23 = vld [vmem:[#allocation7 + $0x28] sm:$0xff] }
0x2230   :  { %v4743_v44 = vpop.f32.mrb[68].mxu1 }
0x2231   :  { %v4747_v49 = vmul.f32 0.25, %v4743_v44  ;;  %v6366_v40 = vpop.f32.mrb[69].mxu1  ;;  %v6658_v44 = vpack.c.bf16 %v3734_v23, %v3733_v39  ;;  %v5979_v39 = vld [vmem:[%s8497_s15] ss:$0 sm:$0xff] }
0x2232   :  { %v3736_v40 = vld [vmem:[#allocation7 + $0x38] sm:$0xff] }
0x2233   :  { %v4748_v0 = vsel %vm581_vm10, %v4747_v49, -inf }
0x2234   :  { %4749 = vmax.xlane.f32.xlu1 %v4748_v0 }
0x2245   :  { %4838 = vrot.lane.b32.xlu1 %v8241_v8, %s7159_s7 }
0x2249   :  { %4836 = vrot.lane.b32.xlu1 %v8241_v8, %s7165_s6 }
0x22c1   :  { %v4750_v45 = vpop.xlane.xlu1 %4749 }
0x22c2   :  { %v4751_v51 = vsub.f32 %v4747_v49, %v4750_v45  ;;  %v3735_v49 = vld [vmem:[#allocation7 + $0x30] sm:$0xff] }
0x22c3   :  { %v6661_v0 = vpack.c.bf16 %v3736_v40, %v3735_v49 }
0x22c4   :  { %v4752_v53 = vmul.f32 1.442695, %v4751_v51 }
0x22c5   :  { %v4839_v58 = vpop.permute.xlu1 %4838 }
0x22c6   :  { %6967 = vpow2.f32 %v4752_v53 }
0x22c9   :  { %v4837_v59 = vpop.permute.xlu1 %4836 }
0x22d0   :  { %v6968_v30 = vpop.eup %6967 }
0x22d1   :  { %v4754_v41 = vsel %vm581_vm10, %v6968_v30, 0.0 }
0x22d2   :  { %4755 = vadd.xlane.f32.xlu0 %v4754_v41 }
0x22e8   :  { %4759 = vrot.lane.b32.xlu0 %v8256_v24, %s7163_s4 }
0x235f   :  { %v4756_v57 = vpop.xlane.xlu0 %4755 }
0x2360   :  { %6969 = vrcp.f32 %v4756_v57 }
0x2363   :  { %v4760_v50 = vpop.permute.xlu0 %4759 }
0x2364   :  { %6368 = vmatpush3.msk.msra.mxu1 %vm366_vm3, %v4760_v50 }
0x2365   :  { %6372 = vmatprep.subr.mxu1 %v7160_v4 }
0x236a   :  { %v6970_v46 = vpop.eup %6969 }
0x236b   :  { %v4758_v55 = vmul.f32 %v6970_v46, %v6968_v30 }
0x236d   :  { %6370 = vmatmul.mubr.msk.f32.vlgmr.msra.gmra.mrb[70].mxu1 %vm593_vm11, %v4758_v55 }
0x236e   :  { %6373 = vmatpush3.xpose.msk.msra.mxu1 %vm505_vm9, %v4839_v58  ;;  %6374 = vmatprep.mubr.msk.f32.mxu1 %vm7162_vm8, %v7160_v4 }
0x236f   :  { %6377 = vmatprep.subr.mxu1 %v7160_v4 }
0x2371   :  { %6375 = vmatmul.mubr.msk.f32.vlgmr.msra.gmra.mrb[72].mxu1 %vm505_vm9, %v4837_v59 }
0x2372   :  { %6379 = vmatprep.mubr.msk.f32.mxu1 %vm7162_vm8, %v7160_v4 }
0x2440   :  { %v4832_v60 = vpop.f32.mrb[70].mxu1 }
0x2441   :  { %v6371_v43 = vpop.f32.mrb[71].mxu1 }
0x2444   :  { %v4910_v61 = vpop.f32.mrb[72].mxu1 }
0x2445   :  { %v4914_v63 = vmul.f32 0.25, %v4910_v61  ;;  %v6376_v1 = vpop.f32.mrb[73].mxu1 }
0x2447   :  { %v4915_v37 = vsel %vm581_vm10, %v4914_v63, -inf }
0x2448   :  { %4916 = vmax.xlane.f32.xlu0 %v4915_v37 }
0x245e   :  { %4926 = vrot.lane.b32.xlu0 %v8256_v24, %s7165_s6 }
0x2462   :  { %5003 = vrot.lane.b32.xlu0 %v8241_v8, %s7166_s17 }
0x24d5   :  { %v4917_v6 = vpop.xlane.xlu0 %4916 }
0x24d6   :  { %v4918_v2 = vsub.f32 %v4914_v63, %v4917_v6 }
0x24d8   :  { %v4919_v3 = vmul.f32 1.442695, %v4918_v2 }
0x24d9   :  { %v4927_v5 = vpop.permute.xlu0 %4926 }
0x24da   :  { %6971 = vpow2.f32 %v4919_v3  ;;  %6378 = vmatpush3.msk.msra.mxu1 %vm366_vm3, %v4927_v5 }
0x24db   :  { %6382 = vmatprep.subr.mxu1 %v7160_v4 }
0x24dd   :  { %v5004_v18 = vpop.permute.xlu0 %5003 }
0x24e4   :  { %v6972_v52 = vpop.eup %6971 }
0x24e5   :  { %v4921_v10 = vsel %vm581_vm10, %v6972_v52, 0.0 }
0x24e6   :  { %4922 = vadd.xlane.f32.xlu1 %v4921_v10 }
0x24f7   :  { %5005 = vrot.lane.b32.xlu1 %v8241_v8, %s7154_s9 }
0x2573   :  { %v4923_v11 = vpop.xlane.xlu1 %4922 }
0x2574   :  { %6973 = vrcp.f32 %v4923_v11 }
0x2577   :  { %v5006_v16 = vpop.permute.xlu1 %5005 }
0x257e   :  { %v6974_v14 = vpop.eup %6973 }
0x257f   :  { %v4925_v15 = vmul.f32 %v6974_v14, %v6972_v52  ;;  %v5301_v14 = vld [vmem:[#allocation10 + $0x18] sm:$0xff] }
0x2581   :  { %6380 = vmatmul.mubr.msk.f32.vlgmr.msra.gmra.mrb[74].mxu1 %vm593_vm11, %v4925_v15 }
0x2582   :  { %6383 = vmatpush3.xpose.msk.msra.mxu1 %vm505_vm9, %v5006_v16  ;;  %6384 = vmatprep.mubr.msk.f32.mxu1 %vm7162_vm8, %v7160_v4  ;;  %v5298_v16 = vld [vmem:[#allocation10] sm:$0xff] }
0x2583   :  { %6387 = vmatprep.subr.mxu1 %v7160_v4 }
0x2585   :  { %6385 = vmatmul.mubr.msk.f32.vlgmr.msra.gmra.mrb[76].mxu1 %vm505_vm9, %v5004_v18  ;;  %v5300_v18 = vld [vmem:[#allocation10 + $0x10] sm:$0xff] }
0x2586   :  { %6389 = vmatprep.mubr.msk.f32.mxu1 %vm7162_vm8, %v7160_v4 }
0x2654   :  { %v4999_v8 = vpop.f32.mrb[74].mxu1 }
0x2655   :  { %v6381_v19 = vpop.f32.mrb[75].mxu1 }
0x2656   :  { %v5305_v19 = vld [vmem:[#allocation10 + $0x38] sm:$0xff] }
0x2658   :  { %v5077_v7 = vpop.f32.mrb[76].mxu1 }
0x2659   :  { %v5081_v20 = vmul.f32 0.25, %v5077_v7  ;;  %v6386_v22 = vpop.f32.mrb[77].mxu1 }
0x265a   :  { %v5304_v22 = vld [vmem:[#allocation10 + $0x30] sm:$0xff] }
0x265b   :  { %v5082_v9 = vsel %vm581_vm10, %v5081_v20, -inf }
0x265c   :  { %5083 = vmax.xlane.f32.xlu1 %v5082_v9 }
0x266d   :  { %5171 = vrot.lane.b32.xlu1 %v4832_v60, %s7154_s9 }
0x2671   :  { %5175 = vrot.lane.b32.xlu1 %v4999_v8, %s7159_s7  ;;  %v6665_v8 = vpack.c.bf16 %v5300_v18, %v5298_v16  ;;  %v5445_v16 = vld [vmem:[%s8501_s19 + $0xd8] sm:$0xff] }
0x26e9   :  { %v5084_v13 = vpop.xlane.xlu1 %5083 }
0x26ea   :  { %v5085_v27 = vsub.f32 %v5081_v20, %v5084_v13  ;;  %v5302_v20 = vld [vmem:[#allocation10 + $0x20] sm:$0xff]  ;;  %v5307_v13 = vld [vmem:[#allocation10 + $0x48] sm:$0xff] }
0x26eb   :  { %v6669_v9 = vpack.c.bf16 %v5304_v22, %v5302_v20  ;;  %v5447_v20 = vld [vmem:[%s8501_s19 + $0xe8] sm:$0xff] }
0x26ec   :  { %v5086_v28 = vmul.f32 1.442695, %v5085_v27  ;;  %v5309_v27 = vld [vmem:[#allocation10 + $0x58] sm:$0xff] }
0x26ed   :  { %v5172_v53 = vpop.permute.xlu1 %5171 }
0x26ee   :  { %6975 = vpow2.f32 %v5086_v28  ;;  %v5182_v57 = vsel %vm505_vm9, %v8281_v42, %v5172_v53  ;;  %v5977_v42 = vld [vmem:[#allocation9] ss:$0 sm:$0xff]  ;;  %v6671_v28 = vpack.c.bf16 %v5309_v27, %v5307_v13  ;;  %v5431_v27 = vld [vmem:[%s8501_s19 + $0x68] sm:$0xff] }
0x26ef   :  { %v5418_v53 = vld [vmem:[%s8501_s19] sm:$0xff] }
0x26f0   :  { %v5430_v13 = vld [vmem:[%s8501_s19 + $0x60] sm:$0xff] }
0x26f1   :  { %v5176_v41 = vpop.permute.xlu1 %5175 }
0x26f2   :  { %v5183_v50 = vsel %vm1184_vm12, %v5182_v57, %v5176_v41  ;;  %v5436_v57 = vld [vmem:[%s8501_s19 + $0x90] sm:$0xff] }
0x26f8   :  { %v6976_v12 = vpop.eup %6975 }
0x26f9   :  { %v5088_v21 = vsel %vm581_vm10, %v6976_v12, 0.0 }
0x26fa   :  { %5089 = vadd.xlane.f32.xlu0 %v5088_v21  ;;  %v5308_v21 = vld [vmem:[#allocation10 + $0x50] sm:$0xff] }
0x2710   :  { %5093 = vrot.lane.b32.xlu0 %v8256_v24, %s7166_s17  ;;  %v3730_v24 = vld [vmem:[#allocation7 + $0x8] sm:$0xff] }
0x2714   :  { %4490 = vrot.lane.b32.xlu0 %v8217_v29, %s7154_s9  ;;  %v6652_v29 = vpack.c.bf16 %v3730_v24, %v3729_v34  ;;  %v5310_v34 = vld [vmem:[#allocation10 + $0x60] sm:$0xff]  ;;  %v5312_v24 = vld [vmem:[#allocation10 + $0x70] sm:$0xff] }
0x2718   :  { %4494 = vrot.lane.b32.xlu0 %v8237_v62, %s7159_s7  ;;  %v6655_v62 = vpack.c.bf16 %v3732_v38, %v3731_v35  ;;  %v6677_v35 = vpack.c.bf16 %v5312_v24, %v5310_v34  ;;  %v5314_v34 = vld [vmem:[%s8500_s18] sm:$0x3] }
0x2719   :  { %v5319_v24 = vrot.slane %v5314_v34, %v7636_v54 }
0x2787   :  { %v5090_v31 = vpop.xlane.xlu0 %5089 }
0x2788   :  { %6977 = vrcp.f32 %v5090_v31 }
0x278b   :  { %v5094_v32 = vpop.permute.xlu0 %5093 }
0x278c   :  { %6388 = vmatpush3.msk.msra.mxu1 %vm366_vm3, %v5094_v32  ;;  %v5311_v32 = vld [vmem:[#allocation10 + $0x68] sm:$0xff] }
0x278d   :  { %6651 = vmatprep.subr.bf16.mxu1 %v7167_v36 }
0x278f   :  { %v4491_v30 = vpop.permute.xlu0 %4490 }
0x2790   :  { %v4501_v59 = vsel %vm505_vm9, %v8197_v26, %v4491_v30  ;;  %v5419_v30 = vld [vmem:[%s8501_s19 + $0x8] sm:$0xff] }
0x2791   :  { %v6681_v41 = vpack.c.bf16 %v5419_v30, %v5418_v53 }
0x2792   :  { %v6978_v48 = vpop.eup %6977 }
0x2793   :  { %v5092_v33 = vmul.f32 %v6978_v48, %v6976_v12  ;;  %v4495_v58 = vpop.permute.xlu0 %4494  ;;  %v5306_v12 = vld [vmem:[#allocation10 + $0x40] sm:$0xff]  ;;  %v5313_v48 = vld [vmem:[#allocation10 + $0x78] sm:$0xff] }
0x2794   :  { %v4502_v60 = vsel %vm1184_vm12, %v4501_v59, %v4495_v58  ;;  %v6673_v31 = vpack.c.bf16 %v5308_v21, %v5306_v12  ;;  %v5420_v58 = vld [vmem:[%s8501_s19 + $0x10] sm:$0xff]  ;;  %v5449_v12 = vld [vmem:[%s8501_s19 + $0xf8] sm:$0xff]  ;;  %v6705_v21 = vpack.c.bf16 %v5431_v27, %v5430_v13 }
0x2795   :  { %6390 = vmatmul.mubr.msk.f32.vlgmr.msra.gmra.mrb[78].mxu1 %vm593_vm11, %v5092_v33  ;;  %v6675_v33 = vpack.c.bf16 %v5313_v48, %v5311_v32  ;;  %v5432_v32 = vld [vmem:[%s8501_s19 + $0x70] sm:$0xff]  ;;  %v5433_v48 = vld [vmem:[%s8501_s19 + $0x78] sm:$0xff] }
0x2796   :  { %6408 = vmatprep.mubr.msk.f32.mxu1 %vm7162_vm8, %v7160_v4  ;;  %6653 = vmatpush3.bf16.msra.mxu1 %v6652_v29  ;;  %v5569_v27 = vld [vmem:[#allocation12 + $0x98] sm:$0xff] }
0x2797   :  { %6654 = vmatprep.subr.bf16.mxu1 %v7167_v36 }
0x279a   :  { %6656 = vmatpush3.bf16.msra.mxu1 %v6655_v62 }
0x279b   :  { %6657 = vmatprep.subr.bf16.mxu1 %v7167_v36 }
0x279e   :  { %6659 = vmatpush3.bf16.msra.mxu1 %v6658_v44  ;;  %v5980_v44 = vld [vmem:[%s8498_s16] ss:$0 sm:$0xff] }
0x279f   :  { %6660 = vmatprep.subr.bf16.mxu1 %v7167_v36 }
0x27a2   :  { %6662 = vmatpush3.bf16.msra.mxu1 %v6661_v0  ;;  %v5434_v0 = vld [vmem:[%s8501_s19 + $0x80] sm:$0xff] }
0x2868   :  { %v5166_v45 = vpop.f32.mrb[78].mxu1 }
0x2869   :  { %5179 = vrot.lane.b32.xlu1 %v5166_v45, %s7164_s0  ;;  %v6391_v51 = vpop.f32.mrb[79].mxu1  ;;  %v5435_v45 = vld [vmem:[%s8501_s19 + $0x88] sm:$0xff] }
0x286a   :  { %v6679_v51 = vpack.c.bf16 %v5435_v45, %v5434_v0 }
0x286d   :  { %4498 = vrot.lane.b32.xlu1 %v8265_v25, %s7164_s0 }
0x28db   :  { %v5180_v46 = vpop.permute.xlu1 %5179 }
0x28dc   :  { %v5184_v55 = vsel %vm1186_vm13, %v5183_v50, %v5180_v46  ;;  %v5437_v50 = vld [vmem:[%s8501_s19 + $0x98] sm:$0xff] }
0x28dd   :  { %v5186_v43 = vrot.slane %v5184_v55, 4  ;;  %v6683_v46 = vpack.c.bf16 %v5437_v50, %v5436_v57  ;;  %v5421_v55 = vld [vmem:[%s8501_s19 + $0x18] sm:$0xff] }
0x28de   :  { %v6685_v59 = vpack.c.bf16 %v5421_v55, %v5420_v58 }
0x28df   :  { %v4499_v61 = vpop.permute.xlu1 %4498 }
0x28e0   :  { %v4503_v25 = vsel %vm1186_vm13, %v4502_v60, %v4499_v61  ;;  %v5438_v60 = vld [vmem:[%s8501_s19 + $0xa0] sm:$0xff] }
0x28e1   :  { %v5188_v63 = vsel %vm366_vm3, %v4503_v25, %v5186_v43  ;;  %v5439_v43 = vld [vmem:[%s8501_s19 + $0xa8] sm:$0xff]  ;;  %v5422_v25 = vld [vmem:[%s8501_s19 + $0x20] sm:$0xff] }
0x28e2   :  { %6409 = vmatmul.mubr.msk.f32.vlgmr.msra.gmra.mrb[80].mxu1 %vm418_vm7, %v5188_v63  ;;  %v6687_v61 = vpack.c.bf16 %v5439_v43, %v5438_v60  ;;  %v5423_v63 = vld [vmem:[%s8501_s19 + $0x28] sm:$0xff] }
0x28e3   :  { %5393 = vmatprep.mubr.f32.mxu1 %v7160_v4  ;;  %v5299_v4 = vld [vmem:[#allocation10 + $0x8] sm:$0xff] }
0x28e4   :  { %v6663_v15 = vpack.c.bf16 %v5301_v14, %v5299_v4  ;;  %v5427_v14 = vld [vmem:[%s8501_s19 + $0x48] sm:$0xff] }
0x28e5   :  { %v5551_v43 = vld [vmem:[#allocation12 + $0x8] sm:$0xff] }
0x28e6   :  { %6664 = vmatprep.subr.bf16.mxu1 %v6663_v15  ;;  %v5444_v15 = vld [vmem:[%s8501_s19 + $0xd0] sm:$0xff] }
0x28e7   :  { %6666 = vmatpush1.bf16.msra.mxu1 %v6665_v8  ;;  %v6699_v8 = vpack.c.bf16 %v5445_v16, %v5444_v15 }
0x29b5   :  { %v5264_v1 = vpop.f32.mrb[80].mxu1 }
0x29b6   :  { %v5265_v37 = vadd.f32 %v5977_v42, %v5264_v1  ;;  %v6410_v6 = vpop.f32.mrb[81].mxu1  ;;  %v6689_v42 = vpack.c.bf16 %v5423_v63, %v5422_v25  ;;  %v5440_v1 = vld [vmem:[%s8501_s19 + $0xb0] sm:$0xff]  ;;  %v5553_v25 = vld [vmem:[#allocation12 + $0x18] sm:$0xff] }
0x29b8   :  { %v8348_v2 = vadd.f32 %v5265_v37, %v8150_v17  ;;  %v5303_v17 = vld [vmem:[#allocation10 + $0x28] sm:$0xff]  ;;  %v5441_v37 = vld [vmem:[%s8501_s19 + $0xb8] sm:$0xff] }
0x29b9   :  { %v6667_v7 = vpack.c.bf16 %v5305_v19, %v5303_v17  ;;  %v6691_v6 = vpack.c.bf16 %v5441_v37, %v5440_v1  ;;  %v5428_v17 = vld [vmem:[%s8501_s19 + $0x50] sm:$0xff]  ;;  %v5429_v19 = vld [vmem:[%s8501_s19 + $0x58] sm:$0xff]  ;;  %v5550_v1 = vld [vmem:[#allocation12] sm:$0xff] }
0x29ba   :  { %v5271_v26 = vsel %vm418_vm7, %v8348_v2, 0.0  ;;  %v6701_v22 = vpack.c.bf16 %v5429_v19, %v5428_v17  ;;  %v5554_v37 = vld [vmem:[#allocation12 + $0x20] sm:$0xff]  ;;  %v5560_v17 = vld [vmem:[#allocation12 + $0x50] sm:$0xff] }
0x29bb   :  { %5272 = vadd.xlane.f32.xlu0 %v5271_v26  ;;  %6668 = vmatprep.subr.bf16.mxu1 %v6667_v7  ;;  %v5424_v26 = vld [vmem:[%s8501_s19 + $0x30] sm:$0xff]  ;;  %v5446_v7 = vld [vmem:[%s8501_s19 + $0xe0] sm:$0xff] }
0x29bc   :  { %6670 = vmatpush1.bf16.msra.mxu1 %v6669_v9  ;;  %v6703_v9 = vpack.c.bf16 %v5447_v20, %v5446_v7  ;;  %v5564_v7 = vld [vmem:[#allocation12 + $0x70] sm:$0xff]  ;;  %v5567_v20 = vld [vmem:[#allocation12 + $0x88] sm:$0xff] }
0x29bd   :  { %6672 = vmatprep.subr.bf16.mxu1 %v6671_v28  ;;  %v5448_v28 = vld [vmem:[%s8501_s19 + $0xf0] sm:$0xff] }
0x29c0   :  { %6674 = vmatpush1.bf16.msra.mxu1 %v6673_v31  ;;  %v6707_v31 = vpack.c.bf16 %v5449_v12, %v5448_v28  ;;  %v5573_v28 = vld [vmem:[#allocation12 + $0xb8] sm:$0xff]  ;;  %v5566_v12 = vld [vmem:[#allocation12 + $0x80] sm:$0xff] }
0x29c1   :  { %6676 = vmatprep.subr.bf16.mxu1 %v6675_v33  ;;  %v6709_v33 = vpack.c.bf16 %v5433_v48, %v5432_v32  ;;  %v5568_v32 = vld [vmem:[#allocation12 + $0x90] sm:$0xff] }
0x29c2   :  { %v5572_v48 = vld [vmem:[#allocation12 + $0xb0] sm:$0xff] }
0x29c4   :  { %6678 = vmatpush1.bf16.msra.mxu1 %v6677_v35  ;;  %v5323_v35 = vrot.slane %v5314_v34, %v7642_v56  ;;  %v5575_v34 = vld [vmem:[#allocation12 + $0xc8] sm:$0xff] }
0x29c5   :  { %6680 = vmatprep.subr.bf16.mxu1 %v6679_v51 }
0x2a48   :  { %v5273_v3 = vpop.xlane.xlu0 %5272 }
0x2a49   :  { %v5274_v5 = vmul.f32 0.015625, %v5273_v3  ;;  %v5425_v3 = vld [vmem:[%s8501_s19 + $0x38] sm:$0xff] }
0x2a4b   :  { %v5275_v52 = vsub.f32 %v8348_v2, %v5274_v5  ;;  %v6693_v5 = vpack.c.bf16 %v5425_v3, %v5424_v26  ;;  %v6713_v26 = vpack.c.bf16 %v5554_v37, %v5550_v1  ;;  %v5552_v3 = vld [vmem:[#allocation12 + $0x10] sm:$0xff]  ;;  %v5590_v1 = vld [vmem:[#allocation12 + $0x140] sm:$0xff] }
0x2a4c   :  { %v5594_v37 = vld [vmem:[#allocation12 + $0x160] sm:$0xff] }
0x2a4d   :  { %v5276_v10 = vmul.f32 %v5275_v52, %v5275_v52 }
0x2a4f   :  { %v5277_v11 = vsel %vm418_vm7, %v5276_v10, 0.0  ;;  %v5443_v10 = vld [vmem:[%s8501_s19 + $0xc8] sm:$0xff] }
0x2a50   :  { %5278 = vadd.xlane.f32.xlu1 %v5277_v11  ;;  %v5426_v11 = vld [vmem:[%s8501_s19 + $0x40] sm:$0xff] }
0x2a51   :  { %v6697_v18 = vpack.c.bf16 %v5427_v14, %v5426_v11  ;;  %v5563_v11 = vld [vmem:[#allocation12 + $0x68] sm:$0xff]  ;;  %v5565_v14 = vld [vmem:[#allocation12 + $0x78] sm:$0xff] }
0x2add   :  { %v5279_v36 = vpop.xlane.xlu1 %5278 }
0x2ade   :  { %v5280_v29 = vmul.f32 0.015625, %v5279_v36 }
0x2ae0   :  { %v5281_v38 = vadd.f32 1e-05, %v5280_v29 }
0x2ae2   :  { %6979 = vrsqrt.f32 %v5281_v38 }
0x2aec   :  { %v6980_v62 = vpop.eup %6979 }
0x2aed   :  { %v5283_v23 = vmul.f32 %v6980_v62, %v5275_v52  ;;  %v5442_v52 = vld [vmem:[%s8501_s19 + $0xc0] sm:$0xff] }
0x2aee   :  { %v6695_v4 = vpack.c.bf16 %v5443_v10, %v5442_v52  ;;  %v5559_v52 = vld [vmem:[#allocation12 + $0x48] sm:$0xff] }
0x2aef   :  { %v5290_v49 = vmul.f32 %v5979_v39, %v5283_v23  ;;  %v6715_v15 = vpack.c.bf16 %v5563_v11, %v5559_v52  ;;  %v5603_v52 = vld [vmem:[#allocation12 + $0x1a8] sm:$0xff]  ;;  %v5605_v11 = vld [vmem:[#allocation12 + $0x1b8] sm:$0xff] }
0x2af1   :  { %v5297_v40 = vadd.f32 %v5980_v44, %v5290_v49 }
0x2af3   :  { %5981 = vmatmul.mubr.msk.f32.vlgmr.msra.gmra.mrb[82].mxu1 %vm418_vm7, %v5297_v40 }
0x2af4   :  { %6682 = vmatpush3.bf16.msra.mxu1 %v6681_v41 }
0x2af5   :  { %6684 = vmatprep.subr.bf16.mxu1 %v6683_v46 }
0x2af8   :  { %6686 = vmatpush3.bf16.msra.mxu1 %v6685_v59 }
0x2af9   :  { %6688 = vmatprep.subr.bf16.mxu1 %v6687_v61  ;;  %v5555_v61 = vld [vmem:[#allocation12 + $0x28] sm:$0xff] }
0x2afa   :  { %v6711_v63 = vpack.c.bf16 %v5555_v61, %v5551_v43  ;;  %v5593_v43 = vld [vmem:[#allocation12 + $0x158] sm:$0xff] }
0x2afb   :  { %v5597_v61 = vld [vmem:[#allocation12 + $0x178] sm:$0xff] }
0x2afc   :  { %6690 = vmatpush3.bf16.msra.mxu1 %v6689_v42  ;;  %v5557_v42 = vld [vmem:[#allocation12 + $0x38] sm:$0xff]  ;;  %6712 = vmatprep.subr.bf16.mxu0 %v6711_v63 }
0x2afd   :  { %6692 = vmatprep.subr.bf16.mxu1 %v6691_v6  ;;  %v6775_v6 = vpack.c.bf16 %v5557_v42, %v5553_v25  ;;  %6714 = vmatpush1.bf16.msra.mxu0 %v6713_v26  ;;  %v6795_v26 = vpack.c.bf16 %v5597_v61, %v5593_v43  ;;  %v5633_v43 = vld [vmem:[#allocation12 + $0x298] sm:$0xff] }
0x2afe   :  { %6716 = vmatprep.subr.bf16.mxu0 %v6715_v15  ;;  %v5637_v61 = vld [vmem:[#allocation12 + $0x2b8] sm:$0xff] }
0x2b00   :  { %6694 = vmatpush3.bf16.msra.mxu1 %v6693_v5  ;;  %v5556_v5 = vld [vmem:[#allocation12 + $0x30] sm:$0xff] }
0x2b01   :  { %6696 = vmatprep.subr.bf16.mxu1 %v6695_v4  ;;  %v6777_v10 = vpack.c.bf16 %v5556_v5, %v5552_v3  ;;  %v5561_v4 = vld [vmem:[#allocation12 + $0x58] sm:$0xff]  ;;  %v5596_v3 = vld [vmem:[#allocation12 + $0x170] sm:$0xff]  ;;  %v5599_v5 = vld [vmem:[#allocation12 + $0x188] sm:$0xff] }
0x2b02   :  { %v6779_v16 = vpack.c.bf16 %v5565_v14, %v5561_v4  ;;  %v6733_v4 = vpack.c.bf16 %v5594_v37, %v5590_v1  ;;  %v6735_v15 = vpack.c.bf16 %v5603_v52, %v5599_v5  ;;  %v5630_v1 = vld [vmem:[#allocation12 + $0x280] sm:$0xff]  ;;  %v5639_v5 = vld [vmem:[#allocation12 + $0x2c8] sm:$0xff] }
0x2b03   :  { %v5634_v37 = vld [vmem:[#allocation12 + $0x2a0] sm:$0xff]  ;;  %v5643_v52 = vld [vmem:[#allocation12 + $0x2e8] sm:$0xff] }
0x2b04   :  { %6698 = vmatpush3.bf16.msra.mxu1 %v6697_v18  ;;  %v5558_v18 = vld [vmem:[#allocation12 + $0x40] sm:$0xff] }
0x2b05   :  { %6700 = vmatprep.subr.bf16.mxu1 %v6699_v8  ;;  %v5562_v8 = vld [vmem:[#allocation12 + $0x60] sm:$0xff] }
0x2b06   :  { %v6717_v19 = vpack.c.bf16 %v5562_v8, %v5558_v18  ;;  %v5602_v18 = vld [vmem:[#allocation12 + $0x1a0] sm:$0xff]  ;;  %v5600_v8 = vld [vmem:[#allocation12 + $0x190] sm:$0xff] }
0x2b08   :  { %6702 = vmatpush3.bf16.msra.mxu1 %v6701_v22  ;;  %v5571_v22 = vld [vmem:[#allocation12 + $0xa8] sm:$0xff]  ;;  %6718 = vmatpush1.bf16.msra.mxu0 %v6717_v19  ;;  %v5604_v19 = vld [vmem:[#allocation12 + $0x1b0] sm:$0xff] }
0x2b09   :  { %6704 = vmatprep.subr.bf16.mxu1 %v6703_v9  ;;  %v6781_v9 = vpack.c.bf16 %v5564_v7, %v5560_v17  ;;  %v6719_v13 = vpack.c.bf16 %v5571_v22, %v5567_v20  ;;  %v5607_v7 = vld [vmem:[#allocation12 + $0x1c8] sm:$0xff]  ;;  %v5609_v22 = vld [vmem:[#allocation12 + $0x1d8] sm:$0xff] }
0x2b0a   :  { %v5611_v20 = vld [vmem:[#allocation12 + $0x1e8] sm:$0xff] }
0x2b0b   :  { %6720 = vmatprep.subr.bf16.mxu0 %v6719_v13 }
0x2b0c   :  { %6706 = vmatpush3.bf16.msra.mxu1 %v6705_v21  ;;  %v6783_v21 = vpack.c.bf16 %v5573_v28, %v5569_v27  ;;  %v6801_v27 = vpack.c.bf16 %v5604_v19, %v5600_v8  ;;  %v6739_v28 = vpack.c.bf16 %v5611_v20, %v5607_v7  ;;  %v5640_v8 = vld [vmem:[#allocation12 + $0x2d0] sm:$0xff]  ;;  %v5647_v7 = vld [vmem:[#allocation12 + $0x308] sm:$0xff] }
0x2b0d   :  { %6708 = vmatprep.subr.bf16.mxu1 %v6707_v31  ;;  %v5570_v31 = vld [vmem:[#allocation12 + $0xa0] sm:$0xff]  ;;  %v5644_v19 = vld [vmem:[#allocation12 + $0x2f0] sm:$0xff]  ;;  %v5651_v20 = vld [vmem:[#allocation12 + $0x328] sm:$0xff] }
0x2b10   :  { %6710 = vmatpush3.bf16.msra.mxu1 %v6709_v33  ;;  %v6721_v33 = vpack.c.bf16 %v5570_v31, %v5566_v12  ;;  %v5606_v12 = vld [vmem:[#allocation12 + $0x1c0] sm:$0xff]  ;;  %v5608_v31 = vld [vmem:[#allocation12 + $0x1d0] sm:$0xff] }
0x2b11   :  { %6776 = vmatprep.subr.bf16.mxu1 %v6775_v6  ;;  %v5592_v6 = vld [vmem:[#allocation12 + $0x150] sm:$0xff] }
0x2b12   :  { %6722 = vmatpush1.bf16.msra.mxu0 %v6721_v33  ;;  %v6797_v14 = vpack.c.bf16 %v5596_v3, %v5592_v6  ;;  %v5615_v33 = vld [vmem:[#allocation12 + $0x208] sm:$0xff]  ;;  %v5632_v6 = vld [vmem:[#allocation12 + $0x290] sm:$0xff] }
0x2b13   :  { %v5636_v3 = vld [vmem:[#allocation12 + $0x2b0] sm:$0xff] }
0x2bc6   :  { %v5395_v36 = vpop.f32.mrb[82].mxu1 }
0x2bc7   :  { %v5396_v29 = vadd.f32 %v5395_v36, %v5319_v24  ;;  %v5397_v38 = vpop.f32.mrb[83].mxu1  ;;  %v5579_v24 = vld [vmem:[#allocation12 + $0xe8] sm:$0xff]  ;;  %v6785_v36 = vpack.c.bf16 %v5572_v48, %v5568_v32  ;;  %v5612_v48 = vld [vmem:[#allocation12 + $0x1f0] sm:$0xff] }
0x2bc8   :  { %v5398_v62 = vadd.f32 %v5397_v38, %v5323_v35  ;;  %v5577_v35 = vld [vmem:[#allocation12 + $0xd8] sm:$0xff] }
0x2bc9   :  { %v5400_v39 = vmul.f32 %v5396_v29, %v5396_v29  ;;  %v5581_v38 = vld [vmem:[#allocation12 + $0xf8] sm:$0xff] }
0x2bca   :  { %v5401_v23 = vmul.f32 %v5398_v62, %v5398_v62 }
0x2bcb   :  { %v5402_v44 = vmul.f32 %v5400_v39, %v5396_v29  ;;  %v5578_v39 = vld [vmem:[#allocation12 + $0xe0] sm:$0xff] }
0x2bcc   :  { %v5403_v49 = vmul.f32 %v5401_v23, %v5398_v62  ;;  %v6787_v23 = vpack.c.bf16 %v5581_v38, %v5577_v35  ;;  %v5621_v35 = vld [vmem:[#allocation12 + $0x238] sm:$0xff] }
0x2bcd   :  { %v5404_v40 = vmul.f32 0.044715, %v5402_v44  ;;  %v5576_v44 = vld [vmem:[#allocation12 + $0xd0] sm:$0xff] }
0x2bce   :  { %v5405_v0 = vmul.f32 0.044715, %v5403_v49  ;;  %v5580_v49 = vld [vmem:[#allocation12 + $0xf0] sm:$0xff] }
0x2bcf   :  { %v5406_v45 = vadd.f32 %v5404_v40, %v5396_v29  ;;  %v5583_v40 = vld [vmem:[#allocation12 + $0x108] sm:$0xff] }
0x2bd0   :  { %v5407_v51 = vadd.f32 %v5405_v0, %v5398_v62  ;;  %v5587_v0 = vld [vmem:[#allocation12 + $0x128] sm:$0xff] }
0x2bd1   :  { %v5408_v53 = vmul.f32 0.7978846, %v5406_v45  ;;  %v5585_v45 = vld [vmem:[#allocation12 + $0x118] sm:$0xff] }
0x2bd2   :  { %v5409_v30 = vmul.f32 0.7978846, %v5407_v51  ;;  %v5589_v51 = vld [vmem:[#allocation12 + $0x138] sm:$0xff] }
0x2bd3   :  { %6981 = vtanh.f32 %v5408_v53 }
0x2bd4   :  { %6983 = vtanh.f32 %v5409_v30  ;;  %v6789_v30 = vpack.c.bf16 %v5580_v49, %v5576_v44  ;;  %v5620_v49 = vld [vmem:[#allocation12 + $0x230] sm:$0xff] }
0x2bdd   :  { %v6982_v41 = vpop.eup %6981 }
0x2bde   :  { %v6984_v57 = vpop.eup %6983  ;;  %v5412_v50 = vadd.f32 1.0, %v6982_v41  ;;  %v6727_v41 = vpack.c.bf16 %v5587_v0, %v5583_v40  ;;  %v5623_v40 = vld [vmem:[#allocation12 + $0x248] sm:$0xff] }
0x2bdf   :  { %v5413_v46 = vadd.f32 1.0, %v6984_v57  ;;  %v5582_v57 = vld [vmem:[#allocation12 + $0x100] sm:$0xff]  ;;  %v5627_v0 = vld [vmem:[#allocation12 + $0x268] sm:$0xff] }
0x2be0   :  { %v5414_v58 = vmul.f32 0.5, %v5412_v50  ;;  %v5586_v50 = vld [vmem:[#allocation12 + $0x120] sm:$0xff] }
0x2be1   :  { %v5415_v55 = vmul.f32 0.5, %v5413_v46  ;;  %v5584_v46 = vld [vmem:[#allocation12 + $0x110] sm:$0xff]  ;;  %v6729_v25 = vpack.c.bf16 %v5586_v50, %v5582_v57  ;;  %v5622_v57 = vld [vmem:[#allocation12 + $0x240] sm:$0xff] }
0x2be2   :  { %v5416_v60 = vmul.f32 %v5414_v58, %v5396_v29  ;;  %v6723_v29 = vpack.c.bf16 %v5579_v24, %v5575_v34  ;;  %v6791_v58 = vpack.c.bf16 %v5589_v51, %v5585_v45  ;;  %v5619_v34 = vld [vmem:[#allocation12 + $0x228] sm:$0xff]  ;;  %v5617_v24 = vld [vmem:[#allocation12 + $0x218] sm:$0xff]  ;;  %v5626_v50 = vld [vmem:[#allocation12 + $0x260] sm:$0xff] }
0x2be3   :  { %v5417_v59 = vmul.f32 %v5415_v55, %v5398_v62  ;;  %v5574_v62 = vld [vmem:[#allocation12 + $0xc0] sm:$0xff]  ;;  %v5588_v55 = vld [vmem:[#allocation12 + $0x130] sm:$0xff]  ;;  %v6743_v38 = vpack.c.bf16 %v5619_v34, %v5615_v33  ;;  %v6807_v44 = vpack.c.bf16 %v5621_v35, %v5617_v24  ;;  %v5625_v45 = vld [vmem:[#allocation12 + $0x258] sm:$0xff] }
0x2be4   :  { %v6725_v53 = vpack.c.bf16 %v5578_v39, %v5574_v62  ;;  %6724 = vmatprep.subr.bf16.mxu0 %v6723_v29  ;;  %v6793_v63 = vpack.c.bf16 %v5588_v55, %v5584_v46  ;;  %v6805_v29 = vpack.c.bf16 %v5612_v48, %v5608_v31  ;;  %v5614_v62 = vld [vmem:[#allocation12 + $0x200] sm:$0xff]  ;;  %v5629_v51 = vld [vmem:[#allocation12 + $0x278] sm:$0xff]  ;;  %v5624_v46 = vld [vmem:[#allocation12 + $0x250] sm:$0xff] }
0x2be5   :  { %5514 = vmatprep.mubr.f32.mxu1 %v5417_v59  ;;  %v5591_v59 = vld [vmem:[#allocation12 + $0x148] sm:$0xff]  ;;  %v5618_v39 = vld [vmem:[#allocation12 + $0x220] sm:$0xff]  ;;  %v5628_v55 = vld [vmem:[#allocation12 + $0x270] sm:$0xff] }
0x2be6   :  { %5515 = vmatmul.mubr.f32.vlgmr.msra.gmra.mrb[84].mxu1 %v5416_v60  ;;  %v5595_v60 = vld [vmem:[#allocation12 + $0x168] sm:$0xff]  ;;  %6726 = vmatpush1.bf16.msra.mxu0 %v6725_v53  ;;  %v6745_v53 = vpack.c.bf16 %v5618_v39, %v5614_v62  ;;  %v5648_v31 = vld [vmem:[#allocation12 + $0x310] sm:$0xff]  ;;  %v5657_v24 = vld [vmem:[#allocation12 + $0x358] sm:$0xff] }
0x2be7   :  { %6778 = vmatpush1.bf16.msra.mxu1 %v6777_v10  ;;  %6728 = vmatprep.subr.bf16.mxu0 %v6727_v41  ;;  %v6731_v42 = vpack.c.bf16 %v5595_v60, %v5591_v59  ;;  %v5601_v10 = vld [vmem:[#allocation12 + $0x198] sm:$0xff]  ;;  %v6747_v41 = vpack.c.bf16 %v5627_v0, %v5623_v40  ;;  %v5631_v59 = vld [vmem:[#allocation12 + $0x288] sm:$0xff]  ;;  %v5652_v48 = vld [vmem:[#allocation12 + $0x330] sm:$0xff] }
0x2be8   :  { %6780 = vmatprep.subr.bf16.mxu1 %v6779_v16  ;;  %v5598_v16 = vld [vmem:[#allocation12 + $0x180] sm:$0xff]  ;;  %v6799_v17 = vpack.c.bf16 %v5605_v11, %v5601_v10  ;;  %v5635_v60 = vld [vmem:[#allocation12 + $0x2a8] sm:$0xff]  ;;  %v5641_v10 = vld [vmem:[#allocation12 + $0x2d8] sm:$0xff] }
0x2be9   :  { %v6737_v13 = vpack.c.bf16 %v5602_v18, %v5598_v16  ;;  %v5645_v11 = vld [vmem:[#allocation12 + $0x2f8] sm:$0xff]  ;;  %v5638_v16 = vld [vmem:[#allocation12 + $0x2c0] sm:$0xff]  ;;  %v5655_v33 = vld [vmem:[#allocation12 + $0x348] sm:$0xff] }
0x2bea   :  { %6730 = vmatpush1.bf16.msra.mxu0 %v6729_v25  ;;  %v6749_v25 = vpack.c.bf16 %v5626_v50, %v5622_v57  ;;  %v5642_v18 = vld [vmem:[#allocation12 + $0x2e0] sm:$0xff]  ;;  %v5659_v34 = vld [vmem:[#allocation12 + $0x368] sm:$0xff]  ;;  %v5661_v35 = vld [vmem:[#allocation12 + $0x378] sm:$0xff] }
0x2beb   :  { %6782 = vmatpush1.bf16.msra.mxu1 %v6781_v9  ;;  %6732 = vmatprep.subr.bf16.mxu0 %v6731_v42  ;;  %v5613_v9 = vld [vmem:[#allocation12 + $0x1f8] sm:$0xff]  ;;  %v6751_v42 = vpack.c.bf16 %v5635_v60, %v5631_v59  ;;  %v5654_v62 = vld [vmem:[#allocation12 + $0x340] sm:$0xff]  ;;  %v5663_v40 = vld [vmem:[#allocation12 + $0x388] sm:$0xff] }
0x2bec   :  { %6784 = vmatprep.subr.bf16.mxu1 %v6783_v21  ;;  %v5610_v21 = vld [vmem:[#allocation12 + $0x1e0] sm:$0xff]  ;;  %v6803_v32 = vpack.c.bf16 %v5613_v9, %v5609_v22  ;;  %v5649_v22 = vld [vmem:[#allocation12 + $0x318] sm:$0xff]  ;;  %v5667_v0 = vld [vmem:[#allocation12 + $0x3a8] sm:$0xff] }
0x2bed   :  { %v5653_v9 = vld [vmem:[#allocation12 + $0x338] sm:$0xff]  ;;  %v5658_v39 = vld [vmem:[#allocation12 + $0x360] sm:$0xff]  ;;  %v5668_v59 = vld [vmem:[#allocation12 + $0x3b0] sm:$0xff] }
0x2bee   :  { %6734 = vmatpush1.bf16.msra.mxu0 %v6733_v4  ;;  %v6753_v4 = vpack.c.bf16 %v5634_v37, %v5630_v1  ;;  %v5662_v50 = vld [vmem:[#allocation12 + $0x380] sm:$0xff]  ;;  %v5677_v37 = vld [vmem:[#allocation12 + $0x3f8] sm:$0xff] }
0x2bef   :  { %6786 = vmatpush1.bf16.msra.mxu1 %v6785_v36  ;;  %6736 = vmatprep.subr.bf16.mxu0 %v6735_v15  ;;  %v6741_v36 = vpack.c.bf16 %v5610_v21, %v5606_v12  ;;  %v6755_v15 = vpack.c.bf16 %v5643_v52, %v5639_v5  ;;  %v5646_v12 = vld [vmem:[#allocation12 + $0x300] sm:$0xff] }
0x2bf0   :  { %6788 = vmatprep.subr.bf16.mxu1 %v6787_v23  ;;  %v5616_v23 = vld [vmem:[#allocation12 + $0x210] sm:$0xff]  ;;  %v5650_v21 = vld [vmem:[#allocation12 + $0x320] sm:$0xff] }
0x2bf2   :  { %6738 = vmatpush1.bf16.msra.mxu0 %v6737_v13  ;;  %v6757_v13 = vpack.c.bf16 %v5642_v18, %v5638_v16 }
0x2bf3   :  { %6790 = vmatpush1.bf16.msra.mxu1 %v6789_v30  ;;  %6740 = vmatprep.subr.bf16.mxu0 %v6739_v28  ;;  %v6809_v30 = vpack.c.bf16 %v5620_v49, %v5616_v23  ;;  %v6759_v28 = vpack.c.bf16 %v5651_v20, %v5647_v7  ;;  %v5656_v23 = vld [vmem:[#allocation12 + $0x350] sm:$0xff] }
0x2bf4   :  { %6792 = vmatprep.subr.bf16.mxu1 %v6791_v58  ;;  %v6811_v58 = vpack.c.bf16 %v5629_v51, %v5625_v45  ;;  %v5660_v49 = vld [vmem:[#allocation12 + $0x370] sm:$0xff]  ;;  %v5665_v45 = vld [vmem:[#allocation12 + $0x398] sm:$0xff] }
0x2bf5   :  { %v5669_v51 = vld [vmem:[#allocation12 + $0x3b8] sm:$0xff] }
0x2bf6   :  { %6742 = vmatpush1.bf16.msra.mxu0 %v6741_v36  ;;  %v6761_v36 = vpack.c.bf16 %v5650_v21, %v5646_v12  ;;  %v6831_v57 = vpack.c.bf16 %v5669_v51, %v5665_v45  ;;  %v5690_v21 = vsub.s32 2, %v7621_v47 }
0x2bf7   :  { %6794 = vmatpush1.bf16.msra.mxu1 %v6793_v63  ;;  %6744 = vmatprep.subr.bf16.mxu0 %v6743_v38  ;;  %v6813_v63 = vpack.c.bf16 %v5628_v55, %v5624_v46  ;;  %v6763_v38 = vpack.c.bf16 %v5659_v34, %v5655_v33  ;;  %v5666_v46 = vld [vmem:[#allocation12 + $0x3a0] sm:$0xff]  ;;  %v5694_v33 = vsub.s32 3, %v7621_v47 }
0x2bf8   :  { %6796 = vmatprep.subr.bf16.mxu1 %v6795_v26  ;;  %v6815_v26 = vpack.c.bf16 %v5637_v61, %v5633_v43  ;;  %v6769_v55 = vpack.c.bf16 %v5666_v46, %v5662_v50  ;;  %v5671_v61 = vld [vmem:[#allocation12 + $0x3c8] sm:$0xff] }
0x2bfa   :  { %6746 = vmatpush1.bf16.msra.mxu0 %v6745_v53  ;;  %v6765_v53 = vpack.c.bf16 %v5658_v39, %v5654_v62 }
0x2bfb   :  { %6798 = vmatpush1.bf16.msra.mxu1 %v6797_v14  ;;  %6748 = vmatprep.subr.bf16.mxu0 %v6747_v41  ;;  %v6817_v14 = vpack.c.bf16 %v5636_v3, %v5632_v6  ;;  %v6767_v41 = vpack.c.bf16 %v5667_v0, %v5663_v40  ;;  %v5670_v6 = vld [vmem:[#allocation12 + $0x3c0] sm:$0xff] }
0x2bfc   :  { %6800 = vmatprep.subr.bf16.mxu1 %v6799_v17  ;;  %v6819_v17 = vpack.c.bf16 %v5645_v11, %v5641_v10  ;;  %v5672_v10 = vld [vmem:[#allocation12 + $0x3d0] sm:$0xff] }
0x2bfd   :  { %v5676_v11 = vld [vmem:[#allocation12 + $0x3f0] sm:$0xff] }
0x2bfe   :  { %6750 = vmatpush1.bf16.msra.mxu0 %v6749_v25  ;;  %v5675_v25 = vld [vmem:[#allocation12 + $0x3e8] sm:$0xff] }
0x2bff   :  { %6802 = vmatpush1.bf16.msra.mxu1 %v6801_v27  ;;  %6752 = vmatprep.subr.bf16.mxu0 %v6751_v42  ;;  %v6821_v27 = vpack.c.bf16 %v5644_v19, %v5640_v8  ;;  %v6771_v1 = vpack.c.bf16 %v5675_v25, %v5671_v61 }
0x2c00   :  { %6804 = vmatprep.subr.bf16.mxu1 %v6803_v32  ;;  %v6823_v32 = vpack.c.bf16 %v5653_v9, %v5649_v22 }
0x2c02   :  { %6754 = vmatpush1.bf16.msra.mxu0 %v6753_v4  ;;  %v5982_v4 = vld [vmem:[%s8502_s20] ss:$0 sm:$0xff] }
0x2c03   :  { %6806 = vmatpush1.bf16.msra.mxu1 %v6805_v29  ;;  %6756 = vmatprep.subr.bf16.mxu0 %v6755_v15  ;;  %v6825_v29 = vpack.c.bf16 %v5652_v48, %v5648_v31  ;;  %v5678_v31 = vld [vmem:[%s8504_s22] sm:$0xf] }
0x2c04   :  { %6808 = vmatprep.subr.bf16.mxu1 %v6807_v44  ;;  %v6827_v44 = vpack.c.bf16 %v5661_v35, %v5657_v24  ;;  %v5683_v34 = vrot.slane %v5678_v31, %v7636_v54  ;;  %v5691_v24 = vrot.slane %v5678_v31, %v5690_v21  ;;  %v5687_v35 = vrot.slane %v5678_v31, %v7642_v56 }
0x2c06   :  { %6758 = vmatpush1.bf16.msra.mxu0 %v6757_v13 }
0x2c07   :  { %6810 = vmatpush1.bf16.msra.mxu1 %v6809_v30  ;;  %6760 = vmatprep.subr.bf16.mxu0 %v6759_v28  ;;  %v6829_v30 = vpack.c.bf16 %v5660_v49, %v5656_v23 }
0x2c08   :  { %6812 = vmatprep.subr.bf16.mxu1 %v6811_v58  ;;  %v5664_v58 = vld [vmem:[#allocation12 + $0x390] sm:$0xff] }
0x2c09   :  { %v6833_v60 = vpack.c.bf16 %v5668_v59, %v5664_v58 }
0x2c0a   :  { %6762 = vmatpush1.bf16.msra.mxu0 %v6761_v36 }
0x2c0b   :  { %6814 = vmatpush1.bf16.msra.mxu1 %v6813_v63  ;;  %6764 = vmatprep.subr.bf16.mxu0 %v6763_v38  ;;  %v5673_v63 = vld [vmem:[#allocation12 + $0x3d8] sm:$0xff] }
0x2c0c   :  { %6816 = vmatprep.subr.bf16.mxu1 %v6815_v26  ;;  %v5674_v26 = vld [vmem:[#allocation12 + $0x3e0] sm:$0xff]  ;;  %v6835_v5 = vpack.c.bf16 %v5677_v37, %v5673_v63 }
0x2c0d   :  { %v6773_v52 = vpack.c.bf16 %v5674_v26, %v5670_v6 }
0x2c0e   :  { %6766 = vmatpush1.bf16.msra.mxu0 %v6765_v53 }
0x2c0f   :  { %6818 = vmatpush1.bf16.msra.mxu1 %v6817_v14  ;;  %6768 = vmatprep.subr.bf16.mxu0 %v6767_v41  ;;  %v6837_v14 = vpack.c.bf16 %v5676_v11, %v5672_v10 }
0x2c10   :  { %6820 = vmatprep.subr.bf16.mxu1 %v6819_v17 }
0x2c12   :  { %6770 = vmatpush1.bf16.msra.mxu0 %v6769_v55 }
0x2c13   :  { %6822 = vmatpush1.bf16.msra.mxu1 %v6821_v27  ;;  %6772 = vmatprep.subr.bf16.mxu0 %v6771_v1 }
0x2c14   :  { %6824 = vmatprep.subr.bf16.mxu1 %v6823_v32  ;;  %v7168_v32 = vmov 1983009808  }
0x2c15   :  { %v5849_v48 = vunpack.c.l.s4 %v7168_v32 }
0x2c16   :  { %6774 = vmatpush1.bf16.msra.mxu0 %v6773_v52 }
0x2c17   :  { %6826 = vmatpush1.bf16.msra.mxu1 %v6825_v29  ;;  %v5850_v36 = vunpack.c.0.s8 %v5849_v48  ;;  %v5695_v29 = vrot.slane %v5678_v31, %v5694_v33 }
0x2c18   :  { %6828 = vmatprep.subr.bf16.mxu1 %v6827_v44 }
0x2c19   :  { %v5853_v0 = vsub.s32 %v5850_v36, %v7621_v47 }
0x2c1b   :  { %6830 = vmatpush1.bf16.msra.mxu1 %v6829_v30 }
0x2c1c   :  { %6832 = vmatprep.subr.bf16.mxu1 %v6831_v57 }
0x2c1f   :  { %6834 = vmatpush1.bf16.msra.mxu1 %v6833_v60 }
0x2c20   :  { %6836 = vmatprep.subr.bf16.mxu1 %v6835_v5 }
0x2c23   :  { %6838 = vmatpush1.bf16.msra.mxu1 %v6837_v14 }
0x2cb9   :  { %v6130_v43 = vpop.f32.mrb[84].mxu1 }
0x2cba   :  { %v6131_v42 = vpop.f32.mrb[85].mxu1 }
0x2cbb   :  { %v6132_v3 = vadd.f32 %v6131_v42, %v6130_v43 }
0x2cbd   :  { %v5520_v15 = vadd.f32 %v6132_v3, %v8348_v2 }
0x2cbf   :  { %v5528_v16 = vadd.f32 %v5982_v4, %v5520_v15 }
0x2cc1   :  { %v5530_v18 = vrot.slane %v5528_v16, 1  ;;  %v5536_v8 = vrot.slane %v5528_v16, 3  ;;  %v5534_v22 = vrot.slane %v5528_v16, 2 }
0x2cc3   :  { %v6875_v17 = vpack.i.bf16 %v5530_v18, %v5536_v8 }
0x2cc5   :  { %6876 = vrot.lane.b32.xlu0 %v6875_v17, %s7161_s13 }
0x2d37   :  { %v6877_v19 = vpop.permute.xlu0 %6876 }
0x2d38   :  { %v6879_v7 = vunpack.i.h.bf16 %v6877_v19  ;;  %v6878_v20 = vunpack.i.l.bf16 %v6877_v19 }
0x2d3a   :  { %v5540_v9 = vsel %vm418_vm7, %v5528_v16, %v6879_v7  ;;  %v5541_v13 = vsel %vm418_vm7, %v5534_v22, %v6878_v20 }
0x2d3b   :  { %v5544_v27 = vrot.slane %v5540_v9, 3  ;;  %v5545_v28 = vrot.slane %v5541_v13, 3 }
0x2d3d   :  { %v5549_v2 = vsel %vm360_vm0, %v5541_v13, %v5545_v28  ;;  %v5548_v12 = vsel %vm360_vm0, %v5540_v9, %v5544_v27 }
0x2d3e   :  { %5764 = vmatprep.mubr.f32.mxu0 %v5549_v2  ;;  %5835 = vmatprep.mubr.f32.mxu1 %v5549_v2 }
0x2d3f   :  { %5765 = vmatmul.mubr.f32.vlgmr.msra.gmra.mrb[28].mxu0 %v5548_v12  ;;  %5836 = vmatmul.mubr.f32.vlgmr.msra.gmra.mrb[86].mxu1 %v5548_v12 }
0x2e12   :  { %v5766_v38 = vpop.f32.mrb[28].mxu0  ;;  %v5837_v62 = vpop.f32.mrb[86].mxu1 }
0x2e13   :  { %v5767_v39 = vadd.f32 %v5766_v38, %v5683_v34  ;;  %v5838_v23 = vadd.f32 %v5837_v62, %v5691_v24  ;;  %v5768_v44 = vpop.f32.mrb[29].mxu0  ;;  %v5839_v49 = vpop.f32.mrb[87].mxu1 }
0x2e14   :  { %v5769_v40 = vadd.f32 %v5768_v44, %v5687_v35  ;;  %v5840_v45 = vadd.f32 %v5839_v49, %v5695_v29 }
0x2e16   :  { %v5846_v51 = vcombine.low %v5767_v39, %v5769_v40  ;;  %v5847_v53 = vcombine.low %v5838_v23, %v5840_v45 }
0x2e18   :  { %v5854_v30 = vrot.slane %v5846_v51, %v5853_v0  ;;  %v5861_v41 = vrot.slane %v5847_v53, %v5853_v0 }
0x2e1a   :  { %v5862_v54 = vcombine.low %v5854_v30, %v5861_v41 }
0x2e1c   :  { %5864 = vst [vmem:[%s8505_s23] sm:$0xff] %v5862_v54 }
0x2e1d   :  { %5869 = vsyncpa [#allocation3], 1 }
0x2e1e   :  { %5870 = vsyncpa [#allocation5], 1 }
0x2e1f   :  { %5871 = vsyncpa [#allocation8], 1 }
0x2e20   :  { %5872 = vsyncpa [#allocation11], 1 }

</bundles_post_ra>
